<compile_context>
chip_gen: v5e
topology: v5e:2x2
jax: 0.10.0
libtpu: 0.0.40
codegen_flags: <defaults>
</compile_context>

<pallas_src>
import jax
import jax.numpy as jnp
from jax.experimental import pallas as pl
from jax.experimental.pallas import tpu as pltpu

IN_DIM = 28 * 28   # 784 -- K of layer 1, NOT padded (Mosaic masks the partial lane group)
HID = 512
OUT_DIM = 10
OUT_PAD = 128      # lane-dense output block; real logits are cols [:10]


def mlp_kernel(x_ref, w1_ref, b1_ref, w2_ref, b2_ref, w3_ref, b3_ref, o_ref):
    # Three MXU matmuls with f32 accumulation; bias add + ReLU stay in f32 on
    # the VPU (safe on v5e which lacks bf16 VALUs).  x arrives as f32 and is
    # cast to the weight dtype in VMEM (cheaper than a separate wrapper pass).
    x = x_ref[...].astype(w1_ref.dtype)
    h1 = jnp.dot(x, w1_ref[...], preferred_element_type=jnp.float32) + b1_ref[...]
    h1 = jnp.maximum(h1, 0.0).astype(w2_ref.dtype)
    h2 = jnp.dot(h1, w2_ref[...], preferred_element_type=jnp.float32) + b2_ref[...]
    h2 = jnp.maximum(h2, 0.0).astype(w3_ref.dtype)
    logits = jnp.dot(h2, w3_ref[...], preferred_element_type=jnp.float32) + b3_ref[...]
    o_ref[...] = logits.astype(o_ref.dtype)


def _round_up(n, m):
    return ((n + m - 1) // m) * m


def prepare_params(params, *, use_bf16=True):
    """One-time parameter preparation (do this ONCE and cache the result).

    Pads the last layer's N dim (10 -> 128, zero contribution) and casts the
    matmul operands to bf16 (v6e/v7x MXU-native) while keeping biases in f32.
    """
    w1, b1, w2, b2, w3, b3 = params
    cdt = jnp.bfloat16 if use_bf16 else jnp.float32
    w3p = jnp.pad(w3, ((0, 0), (0, OUT_PAD - OUT_DIM)))
    b3p = jnp.pad(b3, ((0, 0), (0, OUT_PAD - OUT_DIM)))
    return (w1.astype(cdt), b1.astype(jnp.float32),
            w2.astype(cdt), b2.astype(jnp.float32),
            w3p.astype(cdt), b3p.astype(jnp.float32))


def neural_network_forward(x_nchw, prepared_params, *, tile_b=1024, core_parallel=False):
    """Forward pass: (B,1,28,28) float32 -> (B,10) float32 logits.

    prepared_params: output of prepare_params() (padded / pre-cast, cached).
    tile_b: batch tile.  Default 1024 (multiple of 256 to fill the v6e/v7x MXU
      rows and amortize per-grid-step overhead); 512 is a fine v5e choice.
      It is clamped for small batches; ragged last tiles are handled by Pallas
      (masked boundary writes), so any B works with no batch padding.
    core_parallel: set True on v7x (with >= 2 grid tiles) so the batch axis is
      split across both TensorCores.
    """
    w1, b1, w2, b2, w3, b3 = prepared_params
    B = x_nchw.shape[0]

    # nn.Flatten(): (B,1,28,28) -> (B,784).  No K pad, no batch pad, no cast.
    x = x_nchw.reshape(B, IN_DIM).astype(jnp.float32)

    # Clamp tile for tiny batches (keep >= 256 for throughput runs on v6e/v7x).
    tile_b = min(tile_b, _round_up(B, 8))
    grid = (pl.cdiv(B, tile_b),)

    # Resident weights/biases: constant index maps -> never re-fetched, so a
    # single pipeline buffer suffices (halves their VMEM footprint).
    def w_spec(shape):
        return pl.BlockSpec(shape, lambda i: (0, 0), pipeline_mode=pl.Buffered(1))

    batch_sem = pltpu.CORE_PARALLEL if core_parallel else "parallel"

    out = pl.pallas_call(
        mlp_kernel,
        out_shape=jax.ShapeDtypeStruct((B, OUT_PAD), jnp.float32),
        grid_spec=pltpu.PrefetchScalarGridSpec(
            num_scalar_prefetch=0,
            grid=grid,
            in_specs=[
                pl.BlockSpec((tile_b, IN_DIM), lambda i: (i, 0)),  # x stream (f32)
                w_spec((IN_DIM, HID)),    # W1 (VMEM resident)
                w_spec((1, HID)),         # b1
                w_spec((HID, HID)),       # W2
                w_spec((1, HID)),         # b2
                w_spec((HID, OUT_PAD)),   # W3 (N-padded, lane dense)
                w_spec((1, OUT_PAD)),     # b3 (N-padded)
            ],
            out_specs=pl.BlockSpec((tile_b, OUT_PAD), lambda i: (i, 0)),
        ),
        compiler_params=pltpu.CompilerParams(
            dimension_semantics=(batch_sem,),
            vmem_limit_bytes=48 * 1024 * 1024,   # headroom for tile_b=1024 on v5e defaults
        ),
    )(x, w1, b1, w2, b2, w3, b3)

    return out[:, :OUT_DIM]


def init_params(key):
    """Deterministic init. Linear weights stored pre-transposed as (in, out)
    so the kernel computes x @ W + b (== PyTorch x @ W_pt.T + b)."""
    k1, k2, k3, k4, k5, k6 = jax.random.split(key, 6)

    def uniform(k, shape, fan_in):
        bound = 1.0 / jnp.sqrt(fan_in)
        return jax.random.uniform(k, shape, jnp.float32, -bound, bound)

    w1 = uniform(k1, (IN_DIM, HID), IN_DIM)
    b1 = uniform(k2, (1, HID), IN_DIM)
    w2 = uniform(k3, (HID, HID), HID)
    b2 = uniform(k4, (1, HID), HID)
    w3 = uniform(k5, (HID, OUT_DIM), HID)
    b3 = uniform(k6, (1, OUT_DIM), HID)
    return (w1, b1, w2, b2, w3, b3)


def reference_forward(x_nchw, params, *, use_bf16=False):
    """Pure-JAX reference with the same operand casting as the kernel."""
    w1, b1, w2, b2, w3, b3 = params
    cdt = jnp.bfloat16 if use_bf16 else jnp.float32
    x = x_nchw.reshape(x_nchw.shape[0], -1).astype(cdt)
    h1 = jnp.dot(x, w1.astype(cdt), preferred_element_type=jnp.float32) + b1
    h1 = jnp.maximum(h1, 0.0).astype(cdt)
    h2 = jnp.dot(h1, w2.astype(cdt), preferred_element_type=jnp.float32) + b2
    h2 = jnp.maximum(h2, 0.0).astype(cdt)
    return jnp.dot(h2, w3.astype(cdt), preferred_element_type=jnp.float32) + b3


if __name__ == "__main__":
    key = jax.random.PRNGKey(0)
    kx, kp = jax.random.split(key)

    B = 32  # small demo batch; tile clamps automatically, ragged batches also OK
    x = jax.random.normal(kx, (B, 1, 28, 28), jnp.float32)
    params = init_params(kp)

    # Strict f32 correctness check.
    prep_f32 = prepare_params(params, use_bf16=False)
    logits_f32 = jax.block_until_ready(neural_network_forward(x, prep_f32))
    ref_f32 = reference_forward(x, params, use_bf16=False)
    assert logits_f32.shape == (B, OUT_DIM)
    assert jnp.allclose(logits_f32, ref_f32, atol=1e-3, rtol=1e-3), "f32 mismatch"

    # bf16-weight fast path (v6e/v7x): compare against identically-cast reference.
    prep_bf16 = prepare_params(params, use_bf16=True)
    logits_bf16 = jax.block_until_ready(neural_network_forward(x, prep_bf16))
    ref_bf16 = reference_forward(x, params, use_bf16=True)
    assert logits_bf16.shape == (B, OUT_DIM)
    assert jnp.allclose(logits_bf16, ref_bf16, atol=5e-2, rtol=5e-2), "bf16 mismatch"

    print("KERNEL_OK")
</pallas_src>

<mosaic_0001>
module attributes {stable_mosaic.version = 11 : i64} {
  func.func @mlp_kernel(%arg0: i32, %arg1: memref<32x784xf32, #tpu.memory_space<vmem>>, %arg2: memref<784x512xf32, #tpu.memory_space<vmem>>, %arg3: memref<1x512xf32, #tpu.memory_space<vmem>>, %arg4: memref<512x512xf32, #tpu.memory_space<vmem>>, %arg5: memref<1x512xf32, #tpu.memory_space<vmem>>, %arg6: memref<512x128xf32, #tpu.memory_space<vmem>>, %arg7: memref<1x128xf32, #tpu.memory_space<vmem>>, %arg8: memref<32x128xf32, #tpu.memory_space<vmem>>) attributes {dimension_semantics = [#tpu.dimension_semantics<parallel>], iteration_bounds = array<i64: 1>, scalar_prefetch = 0 : i64, scratch_operands = 0 : i64, tpu.core_type = #tpu.core_type<tc>, window_params = [{transform_indices = @transform_0, window_bounds = array<i64: 32, 784>}, {pipeline_mode = #tpu.pipeline_mode<synchronous>, transform_indices = @transform_1, window_bounds = array<i64: 784, 512>}, {pipeline_mode = #tpu.pipeline_mode<synchronous>, transform_indices = @transform_2, window_bounds = array<i64: 1, 512>}, {pipeline_mode = #tpu.pipeline_mode<synchronous>, transform_indices = @transform_3, window_bounds = array<i64: 512, 512>}, {pipeline_mode = #tpu.pipeline_mode<synchronous>, transform_indices = @transform_4, window_bounds = array<i64: 1, 512>}, {pipeline_mode = #tpu.pipeline_mode<synchronous>, transform_indices = @transform_5, window_bounds = array<i64: 512, 128>}, {pipeline_mode = #tpu.pipeline_mode<synchronous>, transform_indices = @transform_6, window_bounds = array<i64: 1, 128>}, {transform_indices = @transform_7, window_bounds = array<i64: 32, 128>}]} {
    %c0 = arith.constant 0 : index
    %c0_0 = arith.constant 0 : index
    %0 = vector.load %arg1[%c0, %c0_0] : memref<32x784xf32, #tpu.memory_space<vmem>>, vector<32x784xf32>
    %c0_1 = arith.constant 0 : index
    %c0_2 = arith.constant 0 : index
    %1 = vector.load %arg2[%c0_1, %c0_2] : memref<784x512xf32, #tpu.memory_space<vmem>>, vector<784x512xf32>
    %cst = arith.constant dense<0.000000e+00> : vector<32x512xf32>
    %2 = tpu.matmul %0, %1, %cst {dimension_numbers = #tpu.dot_dimension_numbers<[1], [0], [0], [1], [0, 0, 1, 1], [], []>} : vector<32x784xf32>, vector<784x512xf32>, vector<32x512xf32> -> vector<32x512xf32>
    %c0_3 = arith.constant 0 : index
    %c0_4 = arith.constant 0 : index
    %3 = vector.load %arg3[%c0_3, %c0_4] : memref<1x512xf32, #tpu.memory_space<vmem>>, vector<1x512xf32>
    %4 = vector.broadcast %3 : vector<1x512xf32> to vector<32x512xf32>
    %5 = arith.addf %2, %4 : vector<32x512xf32>
    %cst_5 = arith.constant 0.000000e+00 : f32
    %6 = vector.broadcast %cst_5 : f32 to vector<32x512xf32>
    %7 = arith.maximumf %5, %6 : vector<32x512xf32>
    %c0_6 = arith.constant 0 : index
    %c0_7 = arith.constant 0 : index
    %8 = vector.load %arg4[%c0_6, %c0_7] : memref<512x512xf32, #tpu.memory_space<vmem>>, vector<512x512xf32>
    %cst_8 = arith.constant dense<0.000000e+00> : vector<32x512xf32>
    %9 = tpu.matmul %7, %8, %cst_8 {dimension_numbers = #tpu.dot_dimension_numbers<[1], [0], [0], [1], [0, 0, 1, 1], [], []>} : vector<32x512xf32>, vector<512x512xf32>, vector<32x512xf32> -> vector<32x512xf32>
    %c0_9 = arith.constant 0 : index
    %c0_10 = arith.constant 0 : index
    %10 = vector.load %arg5[%c0_9, %c0_10] : memref<1x512xf32, #tpu.memory_space<vmem>>, vector<1x512xf32>
    %11 = vector.broadcast %10 : vector<1x512xf32> to vector<32x512xf32>
    %12 = arith.addf %9, %11 : vector<32x512xf32>
    %cst_11 = arith.constant 0.000000e+00 : f32
    %13 = vector.broadcast %cst_11 : f32 to vector<32x512xf32>
    %14 = arith.maximumf %12, %13 : vector<32x512xf32>
    %c0_12 = arith.constant 0 : index
    %c0_13 = arith.constant 0 : index
    %15 = vector.load %arg6[%c0_12, %c0_13] : memref<512x128xf32, #tpu.memory_space<vmem>>, vector<512x128xf32>
    %cst_14 = arith.constant dense<0.000000e+00> : vector<32x128xf32>
    %16 = tpu.matmul %14, %15, %cst_14 {dimension_numbers = #tpu.dot_dimension_numbers<[1], [0], [0], [1], [0, 0, 1, 1], [], []>} : vector<32x512xf32>, vector<512x128xf32>, vector<32x128xf32> -> vector<32x128xf32>
    %c0_15 = arith.constant 0 : index
    %c0_16 = arith.constant 0 : index
    %17 = vector.load %arg7[%c0_15, %c0_16] : memref<1x128xf32, #tpu.memory_space<vmem>>, vector<1x128xf32>
    %18 = vector.broadcast %17 : vector<1x128xf32> to vector<32x128xf32>
    %19 = arith.addf %16, %18 : vector<32x128xf32>
    %c0_17 = arith.constant 0 : index
    %c0_18 = arith.constant 0 : index
    %20 = vector.load %arg8[%c0_17, %c0_18] : memref<32x128xf32, #tpu.memory_space<vmem>>, vector<32x128xf32>
    tpu.vector_store %arg8[%c0_17, %c0_18], %19 {strides = array<i32>} : memref<32x128xf32, #tpu.memory_space<vmem>>, vector<32x128xf32>,
    return
  }
  func.func @transform_0(%arg0: i32) -> (i32, i32) {
    %c0_i32 = arith.constant 0 : i32
    %c0_i32_0 = arith.constant 0 : i32
    return %arg0, %c0_i32 : i32, i32
  }
  func.func @transform_1(%arg0: i32) -> (i32, i32) {
    %c0_i32 = arith.constant 0 : i32
    %c0_i32_0 = arith.constant 0 : i32
    %c0_i32_1 = arith.constant 0 : i32
    return %c0_i32, %c0_i32_0 : i32, i32
  }
  func.func @transform_2(%arg0: i32) -> (i32, i32) {
    %c0_i32 = arith.constant 0 : i32
    %c0_i32_0 = arith.constant 0 : i32
    %c0_i32_1 = arith.constant 0 : i32
    return %c0_i32, %c0_i32_0 : i32, i32
  }
  func.func @transform_3(%arg0: i32) -> (i32, i32) {
    %c0_i32 = arith.constant 0 : i32
    %c0_i32_0 = arith.constant 0 : i32
    %c0_i32_1 = arith.constant 0 : i32
    return %c0_i32, %c0_i32_0 : i32, i32
  }
  func.func @transform_4(%arg0: i32) -> (i32, i32) {
    %c0_i32 = arith.constant 0 : i32
    %c0_i32_0 = arith.constant 0 : i32
    %c0_i32_1 = arith.constant 0 : i32
    return %c0_i32, %c0_i32_0 : i32, i32
  }
  func.func @transform_5(%arg0: i32) -> (i32, i32) {
    %c0_i32 = arith.constant 0 : i32
    %c0_i32_0 = arith.constant 0 : i32
    %c0_i32_1 = arith.constant 0 : i32
    return %c0_i32, %c0_i32_0 : i32, i32
  }
  func.func @transform_6(%arg0: i32) -> (i32, i32) {
    %c0_i32 = arith.constant 0 : i32
    %c0_i32_0 = arith.constant 0 : i32
    %c0_i32_1 = arith.constant 0 : i32
    return %c0_i32, %c0_i32_0 : i32, i32
  }
  func.func @transform_7(%arg0: i32) -> (i32, i32) {
    %c0_i32 = arith.constant 0 : i32
    %c0_i32_0 = arith.constant 0 : i32
    return %arg0, %c0_i32 : i32, i32
  }
}

</mosaic_0001>

<bundles_post_ra>
// kernel: tpu_custom_call.1
= control target key start
LH: loop header
LB: loop body
LE: loop exit
PB: predicated region body
PF: predicated region fallthrough
CT: control target
= control target key end

     0   :  { %12 = vsyncpa [#allocation3], 0  ;;  %s3278_s0 = inlined_call_operand.hbm [shape: f32[32,784], index: 0, kind: input, shape index: {}]   ;;  %s3279_s1 = inlined_call_operand.hbm [shape: f32[784,512], index: 1, kind: input, shape index: {}]   ;;  %s3280_s2 = inlined_call_operand.hbm [shape: f32[1,512], index: 2, kind: input, shape index: {}]   ;;  %s3281_s3 = inlined_call_operand.hbm [shape: f32[512,512], index: 3, kind: input, shape index: {}]   ;;  %s3282_s4 = inlined_call_operand.hbm [shape: f32[1,512], index: 4, kind: input, shape index: {}]   ;;  %s3283_s5 = inlined_call_operand.hbm [shape: f32[512,128], index: 5, kind: input, shape index: {}]   ;;  %s3284_s6 = inlined_call_operand.hbm [shape: f32[1,128], index: 6, kind: input, shape index: {}]   ;;  %s3285_s7 = inlined_call_operand.hbm [shape: f32[32,128], index: 7, kind: output, shape index: {}]  }
   0x1   :  { %13 = vsyncpa [#allocation6], 0 }
   0x2   :  { %14 = vsyncpa [#allocation9], 0 }
   0x3   :  { %15 = vsyncpa [#allocation12], 0  ;;  %s34_s26 = sshll.u32 %s3279_s1, 4  ;;  %s35_s26 = int_to_ptr.hbm [resolvable:$true] %s34_s26 }
   0x4   :  { %16 = vsyncpa [#allocation4], 0  ;;  %s2618_s27 = smov [#allocation5]   ;;  %s58_s8 = sshll.u32 %s3281_s3, 4  ;;  %s59_s8 = int_to_ptr.hbm [resolvable:$true] %s58_s8 }
   0x5   :  { %s36_s28 = sshll.u32 %s2618_s27, 4  ;;  %s2619_s9 = smov 512   ;;  %s37_s28 = int_to_ptr.vmem [resolvable:$true] %s36_s28 }
   0x6   :  { %s2620_s10 = smov 32   ;;  %s2621_s11 = smov [#allocation8]  }
   0x7   :  { %42 = dma.hbm_to_vmem [thread:$0]  %s35_s26, 50176, %s37_s28, [#allocation6], %s2619_s9, %s2619_s9, %s2620_s10  }
   0x8   :  { %s60_s12 = sshll.u32 %s2621_s11, 4  ;;  %s82_s15 = sshll.u32 %s3283_s5, 4  ;;  %s61_s12 = int_to_ptr.vmem [resolvable:$true] %s60_s12  ;;  %s83_s15 = int_to_ptr.hbm [resolvable:$true] %s82_s15 }
   0x9   :  { %66 = dma.hbm_to_vmem [thread:$0]  %s59_s8, 32768, %s61_s12, [#allocation9], %s2619_s9, %s2619_s9, %s2620_s10  }
   0xa   :  { %s2622_s1 = smov [#allocation11]   ;;  %s21_s3 = sshll.u32 %s3278_s0, 4  ;;  %s22_s3 = int_to_ptr.hbm [resolvable:$true] %s21_s3 }
   0xb   :  { %s84_s16 = sshll.u32 %s2622_s1, 4  ;;  %s2623_s19 = smov 128   ;;  %s85_s16 = int_to_ptr.vmem [resolvable:$true] %s84_s16 }
   0xc   :  { %s2624_s20 = smov 8   ;;  %s2625_s21 = smov [#allocation2]  }
   0xd   :  { %90 = dma.hbm_to_vmem [thread:$0]  %s83_s15, 8192, %s85_s16, [#allocation12], %s2623_s19, %s2623_s19, %s2624_s20  }
   0xe   :  { %s23_s22 = sshll.u32 %s2625_s21, 4  ;;  %s2626_s5 = smov 896   ;;  %s24_s22 = int_to_ptr.vmem [resolvable:$true] %s23_s22 }
   0xf   :  { %s2627_s23 = smov 56   ;;  %s48_s26 = sshll.u32 %s3280_s2, 4  ;;  %s49_s26 = int_to_ptr.hbm [resolvable:$true] %s48_s26 }
  0x10   :  { %29 = dma.hbm_to_vmem [thread:$0]  %s22_s3, 3584, %s24_s22, [#allocation3], %s2626_s5, %s2626_s5, %s2627_s23  }
  0x11   :  { %s2628_s27 = smov [#allocation7]   ;;  %s72_s30 = sshll.u32 %s3282_s4, 4  ;;  %s73_s30 = int_to_ptr.hbm [resolvable:$true] %s72_s30 }
  0x12   :  { %s50_s0 = sshll.u32 %s2628_s27, 4  ;;  %s2629_s8 = smov [#allocation10]   ;;  %s51_s0 = int_to_ptr.vmem [resolvable:$true] %s50_s0 }
  0x13   :  { %53 = dma.hbm_to_vmem [thread:$0]  %s49_s26, 64, %s51_s0, [#allocation6]  }
  0x14   :  { %s74_s9 = sshll.u32 %s2629_s8, 4  ;;  %s96_s12 = sshll.u32 %s3284_s6, 4  ;;  %s75_s9 = int_to_ptr.vmem [resolvable:$true] %s74_s9  ;;  %s97_s12 = int_to_ptr.hbm [resolvable:$true] %s96_s12 }
  0x15   :  { %77 = dma.hbm_to_vmem [thread:$0]  %s73_s30, 64, %s75_s9, [#allocation9]  }
  0x16   :  { %s2630_s2 = smov [#allocation13]  }
  0x17   :  { %s98_s13 = sshll.u32 %s2630_s2, 4  ;;  %s99_s13 = int_to_ptr.vmem [resolvable:$true] %s98_s13 }
  0x18   :  { %101 = dma.hbm_to_vmem [thread:$0]  %s97_s12, 16, %s99_s13, [#allocation12]  }
  0x19   :  { %2608 = dma.done.wait [#allocation3], 3584  }
  0x1a   :  { %2609 = vsyncadd [#allocation3], 4294963712 }
  0x1b   :  { %2610 = dma.done.wait [#allocation6], 50240  }
  0x1c   :  { %2611 = vsyncadd [#allocation6], 4294917056 }
  0x1d   :  { %2612 = dma.done.wait [#allocation9], 32832  }
  0x1e   :  { %2613 = vsyncadd [#allocation9], 4294934464 }
  0x1f   :  { %2614 = dma.done.wait [#allocation12], 8208  }
  0x20   :  { %2615 = vsyncadd [#allocation12], 4294959088  ;;  %v218_v0 = vld [vmem:[#allocation5 + $0x1e0] sm:$0xff]  ;;  %v2698_v63 = vld [vmem:[#allocation2 + $0x10] sm:$0xff]  ;;  %vm560_vm0 = vcmask 130048   ;;  %s2631_s4 = smov [#allocation14]  }
  0x21   :  { %v346_v1 = vld [vmem:[#allocation5 + $0x5e0] sm:$0xff]  ;;  %573 = vmatpush.msra.mxu0 %v218_v0  ;;  %s2339_s6 = sshll.u32 %s2631_s4, 4  ;;  %s2341_s1 = sshll.u32 %s3285_s7, 4  ;;  %s2340_s6 = int_to_ptr.vmem [resolvable:$true] %s2339_s6  ;;  %s2342_s1 = int_to_ptr.hbm [resolvable:$true] %s2341_s1 }
  0x22   :  { %v214_v2 = vld [vmem:[#allocation5 + $0x1c0] sm:$0xff]  ;;  %631 = vmatpush.msra.mxu2 %v346_v1 }
  0x23   :  { %v282_v3 = vld [vmem:[#allocation5 + $0x3e0] sm:$0xff]  ;;  %574 = vmatpush.msra.mxu0 %v214_v2 }
  0x24   :  { %v342_v4 = vld [vmem:[#allocation5 + $0x5c0] sm:$0xff]  ;;  %602 = vmatpush.msra.mxu1 %v282_v3 }
  0x25   :  { %v410_v5 = vld [vmem:[#allocation5 + $0x7e0] sm:$0xff]  ;;  %632 = vmatpush.msra.mxu2 %v342_v4  ;;  %v2702_v4 = vld [vmem:[#allocation2 + $0x8] sm:$0xff] }
  0x26   :  { %660 = vmatpush.msra.mxu3 %v410_v5  ;;  %v210_v6 = vld [vmem:[#allocation5 + $0x1a0] sm:$0xff]  ;;  %v2704_v5 = vld [vmem:[#allocation2 + $0x18] sm:$0xff] }
  0x27   :  { %v278_v7 = vld [vmem:[#allocation5 + $0x3c0] sm:$0xff]  ;;  %575 = vmatpush.msra.mxu0 %v210_v6  ;;  %v219_v6 = vld [vmem:[#allocation5 + $0x1e8] sm:$0xff] }
  0x28   :  { %v338_v8 = vld [vmem:[#allocation5 + $0x5a0] sm:$0xff]  ;;  %603 = vmatpush.msra.mxu1 %v278_v7 }
  0x29   :  { %v406_v9 = vld [vmem:[#allocation5 + $0x7c0] sm:$0xff]  ;;  %633 = vmatpush.msra.mxu2 %v338_v8 }
  0x2a   :  { %v274_v10 = vld [vmem:[#allocation5 + $0x3a0] sm:$0xff]  ;;  %661 = vmatpush.msra.mxu3 %v406_v9 }
  0x2b   :  { %v206_v11 = vld [vmem:[#allocation5 + $0x180] sm:$0xff]  ;;  %604 = vmatpush.msra.mxu1 %v274_v10  ;;  %v215_v10 = vld [vmem:[#allocation5 + $0x1c8] sm:$0xff] }
  0x2c   :  { %v334_v12 = vld [vmem:[#allocation5 + $0x580] sm:$0xff]  ;;  %576 = vmatpush.msra.mxu0 %v206_v11 }
  0x2d   :  { %v402_v13 = vld [vmem:[#allocation5 + $0x7a0] sm:$0xff]  ;;  %634 = vmatpush.msra.mxu2 %v334_v12 }
  0x2e   :  { %v270_v14 = vld [vmem:[#allocation5 + $0x380] sm:$0xff]  ;;  %662 = vmatpush.msra.mxu3 %v402_v13  ;;  %v211_v13 = vld [vmem:[#allocation5 + $0x1a8] sm:$0xff] }
  0x2f   :  { %v398_v15 = vld [vmem:[#allocation5 + $0x780] sm:$0xff]  ;;  %605 = vmatpush.msra.mxu1 %v270_v14 }
  0x30   :  { %v202_v16 = vld [vmem:[#allocation5 + $0x160] sm:$0xff]  ;;  %663 = vmatpush.msra.mxu3 %v398_v15 }
  0x31   :  { %v330_v17 = vld [vmem:[#allocation5 + $0x560] sm:$0xff]  ;;  %577 = vmatpush.msra.mxu0 %v202_v16  ;;  %v2708_v16 = vld [vmem:[#allocation2 + $0x38] sm:$0xff] }
  0x32   :  { %v266_v18 = vld [vmem:[#allocation5 + $0x360] sm:$0xff]  ;;  %635 = vmatpush.msra.mxu2 %v330_v17  ;;  %v2710_v17 = vld [vmem:[#allocation2 + $0x48] sm:$0xff] }
  0x33   :  { %v394_v19 = vld [vmem:[#allocation5 + $0x760] sm:$0xff]  ;;  %606 = vmatpush.msra.mxu1 %v266_v18  ;;  %v207_v18 = vld [vmem:[#allocation5 + $0x188] sm:$0xff] }
  0x34   :  { %v198_v20 = vld [vmem:[#allocation5 + $0x140] sm:$0xff]  ;;  %664 = vmatpush.msra.mxu3 %v394_v19 }
  0x35   :  { %v326_v21 = vld [vmem:[#allocation5 + $0x540] sm:$0xff]  ;;  %578 = vmatpush.msra.mxu0 %v198_v20 }
  0x36   :  { %v262_v22 = vld [vmem:[#allocation5 + $0x340] sm:$0xff]  ;;  %636 = vmatpush.msra.mxu2 %v326_v21 }
  0x37   :  { %v390_v23 = vld [vmem:[#allocation5 + $0x740] sm:$0xff]  ;;  %607 = vmatpush.msra.mxu1 %v262_v22  ;;  %v2715_v22 = vld [vmem:[#allocation2 + $0x50] sm:$0xff] }
  0x38   :  { %v194_v24 = vld [vmem:[#allocation5 + $0x120] sm:$0xff]  ;;  %665 = vmatpush.msra.mxu3 %v390_v23  ;;  %v203_v23 = vld [vmem:[#allocation5 + $0x168] sm:$0xff] }
  0x39   :  { %v322_v25 = vld [vmem:[#allocation5 + $0x520] sm:$0xff]  ;;  %579 = vmatpush.msra.mxu0 %v194_v24 }
  0x3a   :  { %v258_v26 = vld [vmem:[#allocation5 + $0x320] sm:$0xff]  ;;  %637 = vmatpush.msra.mxu2 %v322_v25 }
  0x3b   :  { %v386_v27 = vld [vmem:[#allocation5 + $0x720] sm:$0xff]  ;;  %608 = vmatpush.msra.mxu1 %v258_v26  ;;  %v411_v26 = vld [vmem:[#allocation5 + $0x7e8] sm:$0xff] }
  0x3c   :  { %v190_v28 = vld [vmem:[#allocation5 + $0x100] sm:$0xff]  ;;  %666 = vmatpush.msra.mxu3 %v386_v27  ;;  %v199_v27 = vld [vmem:[#allocation5 + $0x148] sm:$0xff] }
  0x3d   :  { %v318_v29 = vld [vmem:[#allocation5 + $0x500] sm:$0xff]  ;;  %580 = vmatpush.msra.mxu0 %v190_v28 }
  0x3e   :  { %v254_v30 = vld [vmem:[#allocation5 + $0x300] sm:$0xff]  ;;  %638 = vmatpush.msra.mxu2 %v318_v29 }
  0x3f   :  { %v382_v31 = vld [vmem:[#allocation5 + $0x700] sm:$0xff]  ;;  %609 = vmatpush.msra.mxu1 %v254_v30  ;;  %v407_v30 = vld [vmem:[#allocation5 + $0x7c8] sm:$0xff] }
  0x40   :  { %v186_v32 = vld [vmem:[#allocation5 + $0xe0] sm:$0xff]  ;;  %667 = vmatpush.msra.mxu3 %v382_v31  ;;  %v195_v31 = vld [vmem:[#allocation5 + $0x128] sm:$0xff] }
  0x41   :  { %v314_v33 = vld [vmem:[#allocation5 + $0x4e0] sm:$0xff]  ;;  %581 = vmatpush.msra.mxu0 %v186_v32 }
  0x42   :  { %v250_v34 = vld [vmem:[#allocation5 + $0x2e0] sm:$0xff]  ;;  %639 = vmatpush.msra.mxu2 %v314_v33 }
  0x43   :  { %v378_v35 = vld [vmem:[#allocation5 + $0x6e0] sm:$0xff]  ;;  %610 = vmatpush.msra.mxu1 %v250_v34  ;;  %v2720_v34 = vld [vmem:[#allocation2 + $0x70] sm:$0xff] }
  0x44   :  { %v182_v36 = vld [vmem:[#allocation5 + $0xc0] sm:$0xff]  ;;  %668 = vmatpush.msra.mxu3 %v378_v35 }
  0x45   :  { %v310_v37 = vld [vmem:[#allocation5 + $0x4c0] sm:$0xff]  ;;  %582 = vmatpush.msra.mxu0 %v182_v36  ;;  %v191_v36 = vld [vmem:[#allocation5 + $0x108] sm:$0xff] }
  0x46   :  { %v246_v38 = vld [vmem:[#allocation5 + $0x2c0] sm:$0xff]  ;;  %640 = vmatpush.msra.mxu2 %v310_v37 }
  0x47   :  { %v374_v39 = vld [vmem:[#allocation5 + $0x6c0] sm:$0xff]  ;;  %611 = vmatpush.msra.mxu1 %v246_v38 }
  0x48   :  { %v178_v40 = vld [vmem:[#allocation5 + $0xa0] sm:$0xff]  ;;  %669 = vmatpush.msra.mxu3 %v374_v39  ;;  %v2725_v39 = vld [vmem:[#allocation2 + $0x78] sm:$0xff] }
  0x49   :  { %v306_v41 = vld [vmem:[#allocation5 + $0x4a0] sm:$0xff]  ;;  %583 = vmatpush.msra.mxu0 %v178_v40  ;;  %v2727_v40 = vld [vmem:[#allocation2 + $0x88] sm:$0xff] }
  0x4a   :  { %v242_v42 = vld [vmem:[#allocation5 + $0x2a0] sm:$0xff]  ;;  %641 = vmatpush.msra.mxu2 %v306_v41  ;;  %v187_v41 = vld [vmem:[#allocation5 + $0xe8] sm:$0xff] }
  0x4b   :  { %v370_v43 = vld [vmem:[#allocation5 + $0x6a0] sm:$0xff]  ;;  %612 = vmatpush.msra.mxu1 %v242_v42 }
  0x4c   :  { %v174_v44 = vld [vmem:[#allocation5 + $0x80] sm:$0xff]  ;;  %670 = vmatpush.msra.mxu3 %v370_v43 }
  0x4d   :  { %v302_v45 = vld [vmem:[#allocation5 + $0x480] sm:$0xff]  ;;  %584 = vmatpush.msra.mxu0 %v174_v44  ;;  %v403_v44 = vld [vmem:[#allocation5 + $0x7a8] sm:$0xff] }
  0x4e   :  { %v238_v46 = vld [vmem:[#allocation5 + $0x280] sm:$0xff]  ;;  %642 = vmatpush.msra.mxu2 %v302_v45  ;;  %v183_v45 = vld [vmem:[#allocation5 + $0xc8] sm:$0xff] }
  0x4f   :  { %v366_v47 = vld [vmem:[#allocation5 + $0x680] sm:$0xff]  ;;  %613 = vmatpush.msra.mxu1 %v238_v46 }
  0x50   :  { %v170_v48 = vld [vmem:[#allocation5 + $0x60] sm:$0xff]  ;;  %671 = vmatpush.msra.mxu3 %v366_v47 }
  0x51   :  { %v298_v49 = vld [vmem:[#allocation5 + $0x460] sm:$0xff]  ;;  %585 = vmatpush.msra.mxu0 %v170_v48  ;;  %v399_v48 = vld [vmem:[#allocation5 + $0x788] sm:$0xff] }
  0x52   :  { %v234_v50 = vld [vmem:[#allocation5 + $0x260] sm:$0xff]  ;;  %643 = vmatpush.msra.mxu2 %v298_v49  ;;  %v179_v49 = vld [vmem:[#allocation5 + $0xa8] sm:$0xff] }
  0x53   :  { %v362_v51 = vld [vmem:[#allocation5 + $0x660] sm:$0xff]  ;;  %614 = vmatpush.msra.mxu1 %v234_v50 }
  0x54   :  { %v166_v52 = vld [vmem:[#allocation5 + $0x40] sm:$0xff]  ;;  %672 = vmatpush.msra.mxu3 %v362_v51 }
  0x55   :  { %v294_v53 = vld [vmem:[#allocation5 + $0x440] sm:$0xff]  ;;  %586 = vmatpush.msra.mxu0 %v166_v52  ;;  %v2732_v52 = vld [vmem:[#allocation2 + $0xa8] sm:$0xff] }
  0x56   :  { %v230_v54 = vld [vmem:[#allocation5 + $0x240] sm:$0xff]  ;;  %644 = vmatpush.msra.mxu2 %v294_v53  ;;  %v2734_v53 = vld [vmem:[#allocation2 + $0xb8] sm:$0xff] }
  0x57   :  { %v358_v55 = vld [vmem:[#allocation5 + $0x640] sm:$0xff]  ;;  %615 = vmatpush.msra.mxu1 %v230_v54  ;;  %v175_v54 = vld [vmem:[#allocation5 + $0x88] sm:$0xff] }
  0x58   :  { %v162_v56 = vld [vmem:[#allocation5 + $0x20] sm:$0xff]  ;;  %673 = vmatpush.msra.mxu3 %v358_v55 }
  0x59   :  { %v290_v57 = vld [vmem:[#allocation5 + $0x420] sm:$0xff]  ;;  %587 = vmatpush.msra.mxu0 %v162_v56 }
  0x5a   :  { %v226_v58 = vld [vmem:[#allocation5 + $0x220] sm:$0xff]  ;;  %645 = vmatpush.msra.mxu2 %v290_v57  ;;  %v2737_v57 = vld [vmem:[#allocation2 + $0xb0] sm:$0xff] }
  0x5b   :  { %v354_v59 = vld [vmem:[#allocation5 + $0x620] sm:$0xff]  ;;  %616 = vmatpush.msra.mxu1 %v226_v58 }
  0x5c   :  { %v158_v60 = vld [vmem:[#allocation5] sm:$0xff]  ;;  %674 = vmatpush.msra.mxu3 %v354_v59  ;;  %v171_v59 = vld [vmem:[#allocation5 + $0x68] sm:$0xff] }
  0x5d   :  { %v286_v61 = vld [vmem:[#allocation5 + $0x400] sm:$0xff]  ;;  %588 = vmatpush.msra.mxu0 %v158_v60 }
  0x5e   :  { %v2696_v62 = vld [vmem:[#allocation2] sm:$0xff]  ;;  %646 = vmatpush.msra.mxu2 %v286_v61 }
  0x5f   :  { %v546_v0 = vld [vmem:[#allocation5 + $0xc20] sm:$0xff]  ;;  %589 = vmatmul.f32.vlgmr.msra.gmra.mxu0 %v2696_v62  ;;  %647 = vmatmul.f32.vlgmr.msra.gmra.mxu2 %v2698_v63 }
  0x60   :  { %v222_v1 = vld [vmem:[#allocation5 + $0x200] sm:$0xff]  ;;  %761 = vmatpush.msrb.mxu2 %v546_v0  ;;  %v395_v0 = vld [vmem:[#allocation5 + $0x768] sm:$0xff] }
  0x61   :  { %v350_v2 = vld [vmem:[#allocation5 + $0x600] sm:$0xff]  ;;  %617 = vmatpush.msra.mxu1 %v222_v1  ;;  %v167_v1 = vld [vmem:[#allocation5 + $0x48] sm:$0xff] }
  0x62   :  { %v474_v3 = vld [vmem:[#allocation5 + $0x9e0] sm:$0xff]  ;;  %675 = vmatpush.msra.mxu3 %v350_v2  ;;  %618 = vmatmul.f32.vlgmr.msra.gmra.mxu1 %v2702_v4 }
  0x63   :  { %v470_v7 = vld [vmem:[#allocation5 + $0x9c0] sm:$0xff]  ;;  %689 = vmatpush.msrb.mxu0 %v474_v3  ;;  %676 = vmatmul.f32.vlgmr.msra.gmra.mxu3 %v2704_v5 }
  0x64   :  { %v538_v8 = vld [vmem:[#allocation5 + $0xbe0] sm:$0xff]  ;;  %776 = vmatpush.msrb.mxu3 %v219_v6  ;;  %v391_v6 = vld [vmem:[#allocation5 + $0x748] sm:$0xff] }
  0x65   :  { %v542_v9 = vld [vmem:[#allocation5 + $0xc00] sm:$0xff]  ;;  %690 = vmatpush.msrb.mxu0 %v470_v7  ;;  %718 = vmatpush.msrb.mxu1 %v538_v8  ;;  %v163_v7 = vld [vmem:[#allocation5 + $0x28] sm:$0xff] }
  0x66   :  { %v466_v11 = vld [vmem:[#allocation5 + $0x9a0] sm:$0xff]  ;;  %762 = vmatpush.msrb.mxu2 %v542_v9  ;;  %777 = vmatpush.msrb.mxu3 %v215_v10 }
  0x67   :  { %v534_v12 = vld [vmem:[#allocation5 + $0xbc0] sm:$0xff]  ;;  %691 = vmatpush.msrb.mxu0 %v466_v11  ;;  %650 = vmatmul.f32.gmra.mxu2 %v2710_v17  ;;  %v2746_v11 = vld [vmem:[#allocation2 + $0x30] sm:$0xff] }
  0x68   :  { %v462_v14 = vld [vmem:[#allocation5 + $0x980] sm:$0xff]  ;;  %719 = vmatpush.msrb.mxu1 %v534_v12  ;;  %778 = vmatpush.msrb.mxu3 %v211_v13  ;;  %v159_v12 = vld [vmem:[#allocation5 + $0x8] sm:$0xff] }
  0x69   :  { %v530_v15 = vld [vmem:[#allocation5 + $0xba0] sm:$0xff]  ;;  %692 = vmatpush.msrb.mxu0 %v462_v14  ;;  %863 = vmatpush.msra.mxu2 %v411_v26  ;;  %v283_v14 = vld [vmem:[#allocation5 + $0x3e8] sm:$0xff] }
  0x6a   :  { %v458_v19 = vld [vmem:[#allocation5 + $0x960] sm:$0xff]  ;;  %720 = vmatpush.msrb.mxu1 %v530_v15  ;;  %592 = vmatmul.f32.gmra.mxu0 %v2708_v16  ;;  %v2749_v15 = vld [vmem:[#allocation2 + $0x28] sm:$0xff] }
  0x6b   :  { %v526_v20 = vld [vmem:[#allocation5 + $0xb80] sm:$0xff]  ;;  %779 = vmatpush.msrb.mxu3 %v207_v18  ;;  %693 = vmatpush.msrb.mxu0 %v458_v19  ;;  %v475_v18 = vld [vmem:[#allocation5 + $0x9e8] sm:$0xff] }
  0x6c   :  { %v2713_v21 = vld [vmem:[#allocation2 + $0x40] sm:$0xff]  ;;  %721 = vmatpush.msrb.mxu1 %v526_v20  ;;  %679 = vmatmul.f32.gmra.mxu3 %v2715_v22  ;;  %v279_v19 = vld [vmem:[#allocation5 + $0x3c8] sm:$0xff] }
  0x6d   :  { %v454_v24 = vld [vmem:[#allocation5 + $0x940] sm:$0xff]  ;;  %621 = vmatmul.f32.gmra.mxu1 %v2713_v21  ;;  %780 = vmatpush.msrb.mxu3 %v203_v23  ;;  %v347_v20 = vld [vmem:[#allocation5 + $0x5e8] sm:$0xff] }
  0x6e   :  { %v522_v25 = vld [vmem:[#allocation5 + $0xb60] sm:$0xff]  ;;  %694 = vmatpush.msrb.mxu0 %v454_v24  ;;  %864 = vmatpush.msra.mxu2 %v407_v30  ;;  %v387_v23 = vld [vmem:[#allocation5 + $0x728] sm:$0xff] }
  0x6f   :  { %v450_v28 = vld [vmem:[#allocation5 + $0x920] sm:$0xff]  ;;  %722 = vmatpush.msrb.mxu1 %v522_v25  ;;  %781 = vmatpush.msrb.mxu3 %v199_v27  ;;  %v471_v24 = vld [vmem:[#allocation5 + $0x9c8] sm:$0xff] }
  0x70   :  { %v518_v29 = vld [vmem:[#allocation5 + $0xb40] sm:$0xff]  ;;  %695 = vmatpush.msrb.mxu0 %v450_v28  ;;  %865 = vmatpush.msra.mxu2 %v403_v44  ;;  %v275_v25 = vld [vmem:[#allocation5 + $0x3a8] sm:$0xff] }
  0x71   :  { %v446_v32 = vld [vmem:[#allocation5 + $0x900] sm:$0xff]  ;;  %723 = vmatpush.msrb.mxu1 %v518_v29  ;;  %782 = vmatpush.msrb.mxu3 %v195_v31  ;;  %v343_v26 = vld [vmem:[#allocation5 + $0x5c8] sm:$0xff]  ;;  %v2755_v31 = vld [vmem:[#allocation2 + $0x58] sm:$0xff] }
  0x72   :  { %v514_v33 = vld [vmem:[#allocation5 + $0xb20] sm:$0xff]  ;;  %696 = vmatpush.msrb.mxu0 %v446_v32  ;;  %866 = vmatpush.msra.mxu2 %v399_v48  ;;  %v383_v27 = vld [vmem:[#allocation5 + $0x708] sm:$0xff] }
  0x73   :  { %v2722_v35 = vld [vmem:[#allocation2 + $0x80] sm:$0xff]  ;;  %724 = vmatpush.msrb.mxu1 %v514_v33  ;;  %595 = vmatmul.f32.gmra.mxu0 %v2720_v34  ;;  %v467_v28 = vld [vmem:[#allocation5 + $0x9a8] sm:$0xff] }
  0x74   :  { %v442_v37 = vld [vmem:[#allocation5 + $0x8e0] sm:$0xff]  ;;  %653 = vmatmul.f32.gmra.mxu2 %v2722_v35  ;;  %783 = vmatpush.msrb.mxu3 %v191_v36  ;;  %v271_v29 = vld [vmem:[#allocation5 + $0x388] sm:$0xff] }
  0x75   :  { %v510_v38 = vld [vmem:[#allocation5 + $0xb00] sm:$0xff]  ;;  %697 = vmatpush.msrb.mxu0 %v442_v37  ;;  %624 = vmatmul.f32.gmra.mxu1 %v2725_v39  ;;  %v339_v30 = vld [vmem:[#allocation5 + $0x5a8] sm:$0xff] }
  0x76   :  { %v438_v42 = vld [vmem:[#allocation5 + $0x8c0] sm:$0xff]  ;;  %725 = vmatpush.msrb.mxu1 %v510_v38  ;;  %682 = vmatmul.f32.gmra.mxu3 %v2727_v40  ;;  %v2757_v32 = vld [vmem:[#allocation2 + $0x68] sm:$0xff] }
  0x77   :  { %v506_v43 = vld [vmem:[#allocation5 + $0xae0] sm:$0xff]  ;;  %784 = vmatpush.msrb.mxu3 %v187_v41  ;;  %698 = vmatpush.msrb.mxu0 %v438_v42  ;;  %v463_v33 = vld [vmem:[#allocation5 + $0x988] sm:$0xff] }
  0x78   :  { %v434_v46 = vld [vmem:[#allocation5 + $0x8a0] sm:$0xff]  ;;  %726 = vmatpush.msrb.mxu1 %v506_v43  ;;  %867 = vmatpush.msra.mxu2 %v395_v0  ;;  %v267_v36 = vld [vmem:[#allocation5 + $0x368] sm:$0xff] }
  0x79   :  { %v502_v47 = vld [vmem:[#allocation5 + $0xac0] sm:$0xff]  ;;  %785 = vmatpush.msrb.mxu3 %v183_v45  ;;  %699 = vmatpush.msrb.mxu0 %v434_v46  ;;  %v335_v37 = vld [vmem:[#allocation5 + $0x588] sm:$0xff] }
  0x7a   :  { %v430_v50 = vld [vmem:[#allocation5 + $0x880] sm:$0xff]  ;;  %727 = vmatpush.msrb.mxu1 %v502_v47  ;;  %868 = vmatpush.msra.mxu2 %v391_v6  ;;  %v459_v41 = vld [vmem:[#allocation5 + $0x968] sm:$0xff] }
  0x7b   :  { %v498_v51 = vld [vmem:[#allocation5 + $0xaa0] sm:$0xff]  ;;  %786 = vmatpush.msrb.mxu3 %v179_v49  ;;  %700 = vmatpush.msrb.mxu0 %v430_v50  ;;  %v263_v42 = vld [vmem:[#allocation5 + $0x348] sm:$0xff] }
  0x7c   :  { %v426_v55 = vld [vmem:[#allocation5 + $0x860] sm:$0xff]  ;;  %728 = vmatpush.msrb.mxu1 %v498_v51  ;;  %598 = vmatmul.f32.gmra.mxu0 %v2732_v52  ;;  %v331_v43 = vld [vmem:[#allocation5 + $0x568] sm:$0xff] }
  0x7d   :  { %v494_v56 = vld [vmem:[#allocation5 + $0xa80] sm:$0xff]  ;;  %656 = vmatmul.f32.gmra.mxu2 %v2734_v53  ;;  %787 = vmatpush.msrb.mxu3 %v175_v54  ;;  %v379_v44 = vld [vmem:[#allocation5 + $0x6e8] sm:$0xff]  ;;  %v2766_v54 = vld [vmem:[#allocation2 + $0x90] sm:$0xff] }
  0x7e   :  { %v2739_v58 = vld [vmem:[#allocation2 + $0xc0] sm:$0xff]  ;;  %701 = vmatpush.msrb.mxu0 %v426_v55  ;;  %729 = vmatpush.msrb.mxu1 %v494_v56  ;;  %v455_v45 = vld [vmem:[#allocation5 + $0x948] sm:$0xff] }
  0x7f   :  { %v422_v60 = vld [vmem:[#allocation5 + $0x840] sm:$0xff]  ;;  %627 = vmatmul.f32.gmra.mxu1 %v2737_v57  ;;  %685 = vmatmul.f32.gmra.mxu3 %v2739_v58  ;;  %v259_v46 = vld [vmem:[#allocation5 + $0x328] sm:$0xff] }
  0x80   :  { %v490_v61 = vld [vmem:[#allocation5 + $0xa60] sm:$0xff]  ;;  %788 = vmatpush.msrb.mxu3 %v171_v59  ;;  %702 = vmatpush.msrb.mxu0 %v422_v60  ;;  %v327_v47 = vld [vmem:[#allocation5 + $0x548] sm:$0xff] }
  0x81   :  { %v418_v2 = vld [vmem:[#allocation5 + $0x820] sm:$0xff]  ;;  %730 = vmatpush.msrb.mxu1 %v490_v61  ;;  %869 = vmatpush.msra.mxu2 %v387_v23  ;;  %v375_v48 = vld [vmem:[#allocation5 + $0x6c8] sm:$0xff]  ;;  %v2771_v61 = vld [vmem:[#allocation2 + $0x98] sm:$0xff] }
  0x82   :  { %v486_v3 = vld [vmem:[#allocation5 + $0xa40] sm:$0xff]  ;;  %789 = vmatpush.msrb.mxu3 %v167_v1  ;;  %703 = vmatpush.msrb.mxu0 %v418_v2  ;;  %v451_v49 = vld [vmem:[#allocation5 + $0x928] sm:$0xff] }
  0x83   :  { %v414_v8 = vld [vmem:[#allocation5 + $0x800] sm:$0xff]  ;;  %731 = vmatpush.msrb.mxu1 %v486_v3  ;;  %870 = vmatpush.msra.mxu2 %v383_v27  ;;  %v255_v50 = vld [vmem:[#allocation5 + $0x308] sm:$0xff] }
  0x84   :  { %v482_v9 = vld [vmem:[#allocation5 + $0xa20] sm:$0xff]  ;;  %790 = vmatpush.msrb.mxu3 %v163_v7  ;;  %704 = vmatpush.msrb.mxu0 %v414_v8  ;;  %v323_v51 = vld [vmem:[#allocation5 + $0x528] sm:$0xff] }
  0x85   :  { %v2744_v10 = vld [vmem:[#allocation2 + $0x20] sm:$0xff]  ;;  %732 = vmatpush.msrb.mxu1 %v482_v9  ;;  %2357 = vmatmul.msk.f32.vlgmr.msrb.gmra.mxu2 %vm560_vm0, %v2746_v11  ;;  %v447_v56 = vld [vmem:[#allocation5 + $0x908] sm:$0xff] }
  0x86   :  { %v478_v13 = vld [vmem:[#allocation5 + $0xa00] sm:$0xff]  ;;  %705 = vmatmul.f32.vlgmr.msrb.gmra.mxu0 %v2744_v10  ;;  %791 = vmatpush.msrb.mxu3 %v159_v12  ;;  %v251_v59 = vld [vmem:[#allocation5 + $0x2e8] sm:$0xff] }
  0x87   :  { %733 = vmatpush.msrb.mxu1 %v478_v13  ;;  %805 = vmatpush.msra.mxu0 %v283_v14  ;;  %v2760_v38 = vld [vmem:[#allocation2 + $0x60] sm:$0xff]  ;;  %v319_v60 = vld [vmem:[#allocation5 + $0x508] sm:$0xff] }
  0x88   :  { %734 = vmatmul.f32.vlgmr.msrb.gmra.mxu1 %v2749_v15  ;;  %792 = vmatmul.f32.vlgmr.msrb.gmra.mxu3 %v2696_v62  ;;  %v2768_v55 = vld [vmem:[#allocation2 + $0xa0] sm:$0xff]  ;;  %v443_v0 = vld [vmem:[#allocation5 + $0x8e8] sm:$0xff] }
  0x89   :  { %892 = vmatpush.msra.mxu3 %v475_v18  ;;  %806 = vmatpush.msra.mxu0 %v279_v19  ;;  %v247_v1 = vld [vmem:[#allocation5 + $0x2c8] sm:$0xff]  ;;  %v2779_v19 = vld [vmem:[#allocation2 + $0xd8] sm:$0xff] }
  0x8a   :  { %834 = vmatpush.msra.mxu1 %v347_v20  ;;  %871 = vmatpush.msra.mxu2 %v379_v44  ;;  %v315_v2 = vld [vmem:[#allocation5 + $0x4e8] sm:$0xff] }
  0x8b   :  { %893 = vmatpush.msra.mxu3 %v471_v24  ;;  %807 = vmatpush.msra.mxu0 %v275_v25  ;;  %v371_v3 = vld [vmem:[#allocation5 + $0x6a8] sm:$0xff] }
  0x8c   :  { %835 = vmatpush.msra.mxu1 %v343_v26  ;;  %872 = vmatpush.msra.mxu2 %v375_v48  ;;  %v439_v6 = vld [vmem:[#allocation5 + $0x8c8] sm:$0xff]  ;;  %v2784_v26 = vld [vmem:[#allocation2 + $0xd0] sm:$0xff] }
  0x8d   :  { %894 = vmatpush.msra.mxu3 %v467_v28  ;;  %808 = vmatpush.msra.mxu0 %v271_v29  ;;  %v243_v7 = vld [vmem:[#allocation5 + $0x2a8] sm:$0xff] }
  0x8e   :  { %836 = vmatpush.msra.mxu1 %v339_v30  ;;  %708 = vmatmul.f32.gmra.mxu0 %v2755_v31  ;;  %v311_v8 = vld [vmem:[#allocation5 + $0x4c8] sm:$0xff] }
  0x8f   :  { %2358 = vmatmul.msk.f32.gmra.mxu2 %vm560_vm0, %v2757_v32  ;;  %895 = vmatpush.msra.mxu3 %v463_v33  ;;  %v367_v9 = vld [vmem:[#allocation5 + $0x688] sm:$0xff] }
  0x90   :  { %809 = vmatpush.msra.mxu0 %v267_v36  ;;  %837 = vmatpush.msra.mxu1 %v335_v37  ;;  %v435_v12 = vld [vmem:[#allocation5 + $0x8a8] sm:$0xff] }
  0x91   :  { %737 = vmatmul.f32.gmra.mxu1 %v2760_v38  ;;  %795 = vmatmul.f32.gmra.mxu3 %v2708_v16  ;;  %v239_v13 = vld [vmem:[#allocation5 + $0x288] sm:$0xff] }
  0x92   :  { %896 = vmatpush.msra.mxu3 %v459_v41  ;;  %810 = vmatpush.msra.mxu0 %v263_v42  ;;  %v307_v14 = vld [vmem:[#allocation5 + $0x4a8] sm:$0xff] }
  0x93   :  { %838 = vmatpush.msra.mxu1 %v331_v43  ;;  %873 = vmatpush.msra.mxu2 %v371_v3  ;;  %v2777_v18 = vld [vmem:[#allocation2 + $0xc8] sm:$0xff] }
  0x94   :  { %897 = vmatpush.msra.mxu3 %v455_v45  ;;  %811 = vmatpush.msra.mxu0 %v259_v46  ;;  %v431_v20 = vld [vmem:[#allocation5 + $0x888] sm:$0xff] }
  0x95   :  { %839 = vmatpush.msra.mxu1 %v327_v47  ;;  %874 = vmatpush.msra.mxu2 %v367_v9  ;;  %v363_v23 = vld [vmem:[#allocation5 + $0x668] sm:$0xff]  ;;  %v220_v47 = vld [vmem:[#allocation5 + $0x1f0] sm:$0xff] }
  0x96   :  { %898 = vmatpush.msra.mxu3 %v451_v49  ;;  %812 = vmatpush.msra.mxu0 %v255_v50  ;;  %v235_v24 = vld [vmem:[#allocation5 + $0x268] sm:$0xff]  ;;  %v216_v50 = vld [vmem:[#allocation5 + $0x1d0] sm:$0xff] }
  0x97   :  { %840 = vmatpush.msra.mxu1 %v323_v51  ;;  %711 = vmatmul.f32.gmra.mxu0 %v2766_v54  ;;  %v303_v25 = vld [vmem:[#allocation5 + $0x488] sm:$0xff]  ;;  %v284_v51 = vld [vmem:[#allocation5 + $0x3f0] sm:$0xff] }
  0x98   :  { %2359 = vmatmul.msk.f32.gmra.mxu2 %vm560_vm0, %v2768_v55  ;;  %899 = vmatpush.msra.mxu3 %v447_v56  ;;  %v359_v27 = vld [vmem:[#allocation5 + $0x648] sm:$0xff]  ;;  %v200_v9 = vld [vmem:[#allocation5 + $0x150] sm:$0xff] }
  0x99   :  { %813 = vmatpush.msra.mxu0 %v251_v59  ;;  %841 = vmatpush.msra.mxu1 %v319_v60  ;;  %v427_v28 = vld [vmem:[#allocation5 + $0x868] sm:$0xff]  ;;  %v212_v60 = vld [vmem:[#allocation5 + $0x1b0] sm:$0xff] }
  0x9a   :  { %740 = vmatmul.f32.gmra.mxu1 %v2771_v61  ;;  %798 = vmatmul.f32.gmra.mxu3 %v2720_v34  ;;  %v231_v29 = vld [vmem:[#allocation5 + $0x248] sm:$0xff] }
  0x9b   :  { %900 = vmatpush.msra.mxu3 %v443_v0  ;;  %814 = vmatpush.msra.mxu0 %v247_v1  ;;  %v299_v30 = vld [vmem:[#allocation5 + $0x468] sm:$0xff]  ;;  %v280_v0 = vld [vmem:[#allocation5 + $0x3d0] sm:$0xff] }
  0x9c   :  { %842 = vmatpush.msra.mxu1 %v315_v2  ;;  %875 = vmatpush.msra.mxu2 %v363_v23  ;;  %v355_v33 = vld [vmem:[#allocation5 + $0x628] sm:$0xff]  ;;  %v208_v2 = vld [vmem:[#allocation5 + $0x190] sm:$0xff] }
  0x9d   :  { %901 = vmatpush.msra.mxu3 %v439_v6  ;;  %815 = vmatpush.msra.mxu0 %v243_v7  ;;  %v423_v36 = vld [vmem:[#allocation5 + $0x848] sm:$0xff]  ;;  %v272_v7 = vld [vmem:[#allocation5 + $0x390] sm:$0xff] }
  0x9e   :  { %843 = vmatpush.msra.mxu1 %v311_v8  ;;  %876 = vmatpush.msra.mxu2 %v359_v27  ;;  %v227_v37 = vld [vmem:[#allocation5 + $0x228] sm:$0xff]  ;;  %v264_v23 = vld [vmem:[#allocation5 + $0x350] sm:$0xff] }
  0x9f   :  { %902 = vmatpush.msra.mxu3 %v435_v12  ;;  %816 = vmatpush.msra.mxu0 %v239_v13  ;;  %v295_v41 = vld [vmem:[#allocation5 + $0x448] sm:$0xff]  ;;  %v268_v12 = vld [vmem:[#allocation5 + $0x370] sm:$0xff] }
  0xa0   :  { %844 = vmatpush.msra.mxu1 %v307_v14  ;;  %714 = vmatmul.f32.gmra.mxu0 %v2777_v18  ;;  %v351_v42 = vld [vmem:[#allocation5 + $0x608] sm:$0xff]  ;;  %v196_v14 = vld [vmem:[#allocation5 + $0x130] sm:$0xff] }
  0xa1   :  { %2360 = vmatmul.msk.f32.gmra.mxu2 %vm560_vm0, %v2779_v19  ;;  %903 = vmatpush.msra.mxu3 %v431_v20  ;;  %v419_v43 = vld [vmem:[#allocation5 + $0x828] sm:$0xff]  ;;  %v412_v20 = vld [vmem:[#allocation5 + $0x7f0] sm:$0xff] }
  0xa2   :  { %817 = vmatpush.msra.mxu0 %v235_v24  ;;  %845 = vmatpush.msra.mxu1 %v303_v25  ;;  %v223_v44 = vld [vmem:[#allocation5 + $0x208] sm:$0xff]  ;;  %v192_v25 = vld [vmem:[#allocation5 + $0x110] sm:$0xff] }
  0xa3   :  { %801 = vmatmul.f32.gmra.mxu3 %v2732_v52  ;;  %743 = vmatmul.f32.gmra.mxu1 %v2784_v26  ;;  %v291_v45 = vld [vmem:[#allocation5 + $0x428] sm:$0xff] }
  0xa4   :  { %904 = vmatpush.msra.mxu3 %v427_v28  ;;  %818 = vmatpush.msra.mxu0 %v231_v29  ;;  %v415_v46 = vld [vmem:[#allocation5 + $0x808] sm:$0xff]  ;;  %v408_v28 = vld [vmem:[#allocation5 + $0x7d0] sm:$0xff] }
  0xa5   :  { %846 = vmatpush.msra.mxu1 %v299_v30  ;;  %877 = vmatpush.msra.mxu2 %v355_v33  ;;  %v287_v48 = vld [vmem:[#allocation5 + $0x408] sm:$0xff]  ;;  %v256_v29 = vld [vmem:[#allocation5 + $0x310] sm:$0xff] }
  0xa6   :  { %905 = vmatpush.msra.mxu3 %v423_v36  ;;  %819 = vmatpush.msra.mxu0 %v227_v37  ;;  %v539_v49 = vld [vmem:[#allocation5 + $0xbe8] sm:$0xff]  ;;  %v184_v33 = vld [vmem:[#allocation5 + $0xd0] sm:$0xff] }
  0xa7   :  { %847 = vmatpush.msra.mxu1 %v295_v41  ;;  %878 = vmatpush.msra.mxu2 %v351_v42  ;;  %v535_v56 = vld [vmem:[#allocation5 + $0xbc8] sm:$0xff]  ;;  %v252_v36 = vld [vmem:[#allocation5 + $0x2f0] sm:$0xff] }
  0xa8   :  { %906 = vmatpush.msra.mxu3 %v419_v43  ;;  %820 = vmatpush.msra.mxu0 %v223_v44  ;;  %v547_v59 = vld [vmem:[#allocation5 + $0xc28] sm:$0xff]  ;;  %v180_v41 = vld [vmem:[#allocation5 + $0xb0] sm:$0xff] }
  0xa9   :  { %848 = vmatpush.msra.mxu1 %v291_v45  ;;  %821 = vmatmul.f32.vlgmr.msra.gmra.mxu0 %v2702_v4  ;;  %v531_v1 = vld [vmem:[#allocation5 + $0xba8] sm:$0xff]  ;;  %v404_v42 = vld [vmem:[#allocation5 + $0x7b0] sm:$0xff] }
  0xaa   :  { %879 = vmatmul.f32.vlgmr.msra.gmra.mxu2 %v2704_v5  ;;  %907 = vmatpush.msra.mxu3 %v415_v46  ;;  %v276_v5 = vld [vmem:[#allocation5 + $0x3b0] sm:$0xff]  ;;  %v527_v3 = vld [vmem:[#allocation5 + $0xb88] sm:$0xff] }
  0xab   :  { %979 = vmatpush.msrb.mxu2 %v220_v47  ;;  %849 = vmatpush.msra.mxu1 %v287_v48  ;;  %v543_v6 = vld [vmem:[#allocation5 + $0xc08] sm:$0xff]  ;;  %v248_v43 = vld [vmem:[#allocation5 + $0x2d0] sm:$0xff] }
  0xac   :  { %921 = vmatpush.msrb.mxu0 %v539_v49  ;;  %850 = vmatmul.f32.vlgmr.msra.gmra.mxu1 %v2698_v63  ;;  %v204_v63 = vld [vmem:[#allocation5 + $0x170] sm:$0xff]  ;;  %v523_v8 = vld [vmem:[#allocation5 + $0xb68] sm:$0xff] }
  0xad   :  { %908 = vmatmul.f32.vlgmr.msra.gmra.mxu3 %v2744_v10  ;;  %980 = vmatpush.msrb.mxu2 %v216_v50  ;;  %v519_v13 = vld [vmem:[#allocation5 + $0xb48] sm:$0xff]  ;;  %v176_v45 = vld [vmem:[#allocation5 + $0x90] sm:$0xff] }
  0xae   :  { %1008 = vmatpush.msrb.mxu3 %v284_v51  ;;  %922 = vmatpush.msrb.mxu0 %v535_v56  ;;  %v515_v24 = vld [vmem:[#allocation5 + $0xb28] sm:$0xff]  ;;  %v400_v47 = vld [vmem:[#allocation5 + $0x790] sm:$0xff] }
  0xaf   :  { %964 = vmatpush.msrb.mxu1 %v547_v59  ;;  %981 = vmatpush.msrb.mxu2 %v212_v60  ;;  %v511_v27 = vld [vmem:[#allocation5 + $0xb08] sm:$0xff]  ;;  %v240_v48 = vld [vmem:[#allocation5 + $0x290] sm:$0xff] }
  0xb0   :  { %1009 = vmatpush.msrb.mxu3 %v280_v0  ;;  %923 = vmatpush.msrb.mxu0 %v531_v1  ;;  %v507_v30 = vld [vmem:[#allocation5 + $0xae8] sm:$0xff]  ;;  %v168_v50 = vld [vmem:[#allocation5 + $0x50] sm:$0xff] }
  0xb1   :  { %982 = vmatpush.msrb.mxu2 %v208_v2  ;;  %824 = vmatmul.f32.gmra.mxu0 %v2713_v21  ;;  %v503_v37 = vld [vmem:[#allocation5 + $0xac8] sm:$0xff]  ;;  %v236_v51 = vld [vmem:[#allocation5 + $0x270] sm:$0xff] }
  0xb2   :  { %1010 = vmatpush.msrb.mxu3 %v276_v5  ;;  %924 = vmatpush.msrb.mxu0 %v527_v3  ;;  %v499_v44 = vld [vmem:[#allocation5 + $0xaa8] sm:$0xff]  ;;  %v164_v59 = vld [vmem:[#allocation5 + $0x30] sm:$0xff] }
  0xb3   :  { %882 = vmatmul.f32.gmra.mxu2 %v2715_v22  ;;  %965 = vmatpush.msrb.mxu1 %v543_v6  ;;  %v260_v22 = vld [vmem:[#allocation5 + $0x330] sm:$0xff]  ;;  %v495_v46 = vld [vmem:[#allocation5 + $0xa88] sm:$0xff] }
  0xb4   :  { %983 = vmatpush.msrb.mxu2 %v204_v63  ;;  %1011 = vmatpush.msrb.mxu3 %v272_v7  ;;  %v491_v49 = vld [vmem:[#allocation5 + $0xa68] sm:$0xff]  ;;  %v396_v60 = vld [vmem:[#allocation5 + $0x770] sm:$0xff] }
  0xb5   :  { %925 = vmatpush.msrb.mxu0 %v523_v8  ;;  %853 = vmatmul.f32.gmra.mxu1 %v2710_v17  ;;  %v188_v17 = vld [vmem:[#allocation5 + $0xf0] sm:$0xff]  ;;  %v487_v56 = vld [vmem:[#allocation5 + $0xa48] sm:$0xff] }
  0xb6   :  { %911 = vmatmul.f32.gmra.mxu3 %v2755_v31  ;;  %984 = vmatpush.msrb.mxu2 %v200_v9  ;;  %v232_v0 = vld [vmem:[#allocation5 + $0x250] sm:$0xff]  ;;  %v483_v1 = vld [vmem:[#allocation5 + $0xa28] sm:$0xff] }
  0xb7   :  { %1012 = vmatpush.msrb.mxu3 %v268_v12  ;;  %926 = vmatpush.msrb.mxu0 %v519_v13  ;;  %v160_v2 = vld [vmem:[#allocation5 + $0x10] sm:$0xff]  ;;  %v479_v3 = vld [vmem:[#allocation5 + $0xa08] sm:$0xff] }
  0xb8   :  { %985 = vmatpush.msrb.mxu2 %v196_v14  ;;  %1066 = vmatpush.msra.mxu1 %v412_v20  ;;  %v228_v5 = vld [vmem:[#allocation5 + $0x230] sm:$0xff] }
  0xb9   :  { %1013 = vmatpush.msrb.mxu3 %v264_v23  ;;  %927 = vmatpush.msrb.mxu0 %v515_v24  ;;  %v224_v6 = vld [vmem:[#allocation5 + $0x210] sm:$0xff] }
  0xba   :  { %986 = vmatpush.msrb.mxu2 %v192_v25  ;;  %827 = vmatmul.f32.gmra.mxu0 %v2725_v39  ;;  %v348_v63 = vld [vmem:[#allocation5 + $0x5f0] sm:$0xff] }
  0xbb   :  { %1014 = vmatpush.msrb.mxu3 %v260_v22  ;;  %928 = vmatpush.msrb.mxu0 %v511_v27  ;;  %v472_v7 = vld [vmem:[#allocation5 + $0x9d0] sm:$0xff] }
  0xbc   :  { %885 = vmatmul.f32.gmra.mxu2 %v2727_v40  ;;  %1067 = vmatpush.msra.mxu1 %v408_v28  ;;  %v244_v40 = vld [vmem:[#allocation5 + $0x2b0] sm:$0xff] }
  0xbd   :  { %987 = vmatpush.msrb.mxu2 %v188_v17  ;;  %1015 = vmatpush.msrb.mxu3 %v256_v29  ;;  %v540_v8 = vld [vmem:[#allocation5 + $0xbf0] sm:$0xff] }
  0xbe   :  { %929 = vmatpush.msrb.mxu0 %v507_v30  ;;  %856 = vmatmul.f32.gmra.mxu1 %v2722_v35  ;;  %v172_v35 = vld [vmem:[#allocation5 + $0x70] sm:$0xff] }
  0xbf   :  { %914 = vmatmul.f32.gmra.mxu3 %v2766_v54  ;;  %988 = vmatpush.msrb.mxu2 %v184_v33  ;;  %v344_v9 = vld [vmem:[#allocation5 + $0x5d0] sm:$0xff] }
  0xc0   :  { %1016 = vmatpush.msrb.mxu3 %v252_v36  ;;  %930 = vmatpush.msrb.mxu0 %v503_v37  ;;  %v468_v12 = vld [vmem:[#allocation5 + $0x9b0] sm:$0xff] }
  0xc1   :  { %989 = vmatpush.msrb.mxu2 %v180_v41  ;;  %1068 = vmatpush.msra.mxu1 %v404_v42  ;;  %v388_v13 = vld [vmem:[#allocation5 + $0x730] sm:$0xff] }
  0xc2   :  { %1017 = vmatpush.msrb.mxu3 %v248_v43  ;;  %931 = vmatpush.msrb.mxu0 %v499_v44  ;;  %v536_v14 = vld [vmem:[#allocation5 + $0xbd0] sm:$0xff] }
  0xc3   :  { %990 = vmatpush.msrb.mxu2 %v176_v45  ;;  %830 = vmatmul.f32.gmra.mxu0 %v2737_v57  ;;  %v340_v20 = vld [vmem:[#allocation5 + $0x5b0] sm:$0xff] }
  0xc4   :  { %1018 = vmatpush.msrb.mxu3 %v244_v40  ;;  %932 = vmatpush.msrb.mxu0 %v495_v46  ;;  %v464_v23 = vld [vmem:[#allocation5 + $0x990] sm:$0xff] }
  0xc5   :  { %888 = vmatmul.f32.gmra.mxu2 %v2739_v58  ;;  %1069 = vmatpush.msra.mxu1 %v400_v47  ;;  %v392_v58 = vld [vmem:[#allocation5 + $0x750] sm:$0xff] }
  0xc6   :  { %991 = vmatpush.msrb.mxu2 %v172_v35  ;;  %1019 = vmatpush.msrb.mxu3 %v240_v48  ;;  %v532_v24 = vld [vmem:[#allocation5 + $0xbb0] sm:$0xff] }
  0xc7   :  { %933 = vmatpush.msrb.mxu0 %v491_v49  ;;  %859 = vmatmul.f32.gmra.mxu1 %v2734_v53  ;;  %v476_v53 = vld [vmem:[#allocation5 + $0x9f0] sm:$0xff] }
  0xc8   :  { %917 = vmatmul.f32.gmra.mxu3 %v2777_v18  ;;  %992 = vmatpush.msrb.mxu2 %v168_v50  ;;  %v336_v25 = vld [vmem:[#allocation5 + $0x590] sm:$0xff] }
  0xc9   :  { %1020 = vmatpush.msrb.mxu3 %v236_v51  ;;  %934 = vmatpush.msrb.mxu0 %v487_v56  ;;  %v460_v22 = vld [vmem:[#allocation5 + $0x970] sm:$0xff] }
  0xca   :  { %993 = vmatpush.msrb.mxu2 %v164_v59  ;;  %1070 = vmatpush.msra.mxu1 %v396_v60  ;;  %v456_v27 = vld [vmem:[#allocation5 + $0x950] sm:$0xff] }
  0xcb   :  { %1021 = vmatpush.msrb.mxu3 %v232_v0  ;;  %935 = vmatpush.msrb.mxu0 %v483_v1  ;;  %v524_v28 = vld [vmem:[#allocation5 + $0xb70] sm:$0xff] }
  0xcc   :  { %994 = vmatpush.msrb.mxu2 %v160_v2  ;;  %1071 = vmatpush.msra.mxu1 %v392_v58  ;;  %v328_v17 = vld [vmem:[#allocation5 + $0x550] sm:$0xff] }
  0xcd   :  { %1022 = vmatpush.msrb.mxu3 %v228_v5  ;;  %936 = vmatpush.msrb.mxu0 %v479_v3  ;;  %v452_v29 = vld [vmem:[#allocation5 + $0x930] sm:$0xff] }
  0xce   :  { %937 = vmatmul.f32.vlgmr.msrb.gmra.mxu0 %v2749_v15  ;;  %995 = vmatmul.f32.vlgmr.msrb.gmra.mxu2 %v2696_v62  ;;  %v384_v62 = vld [vmem:[#allocation5 + $0x710] sm:$0xff] }
  0xcf   :  { %1023 = vmatpush.msrb.mxu3 %v224_v6  ;;  %1095 = vmatpush.msra.mxu2 %v476_v53  ;;  %v380_v30 = vld [vmem:[#allocation5 + $0x6f0] sm:$0xff] }
  0xd0   :  { %1037 = vmatpush.msra.mxu0 %v348_v63  ;;  %2361 = vmatmul.msk.f32.vlgmr.msrb.gmra.mxu1 %vm560_vm0, %v2746_v11  ;;  %v528_v11 = vld [vmem:[#allocation5 + $0xb90] sm:$0xff] }
  0xd1   :  { %1024 = vmatmul.f32.vlgmr.msrb.gmra.mxu3 %v2702_v4  ;;  %1096 = vmatpush.msra.mxu2 %v472_v7  ;;  %v332_v4 = vld [vmem:[#allocation5 + $0x570] sm:$0xff] }
  0xd2   :  { %1124 = vmatpush.msra.mxu3 %v540_v8  ;;  %1038 = vmatpush.msra.mxu0 %v344_v9  ;;  %v520_v33 = vld [vmem:[#allocation5 + $0xb50] sm:$0xff] }
  0xd3   :  { %1097 = vmatpush.msra.mxu2 %v468_v12  ;;  %1072 = vmatpush.msra.mxu1 %v388_v13  ;;  %v324_v36 = vld [vmem:[#allocation5 + $0x530] sm:$0xff] }
  0xd4   :  { %1125 = vmatpush.msra.mxu3 %v536_v14  ;;  %1039 = vmatpush.msra.mxu0 %v340_v20  ;;  %v448_v37 = vld [vmem:[#allocation5 + $0x910] sm:$0xff] }
  0xd5   :  { %1098 = vmatpush.msra.mxu2 %v464_v23  ;;  %1073 = vmatpush.msra.mxu1 %v384_v62  ;;  %v516_v41 = vld [vmem:[#allocation5 + $0xb30] sm:$0xff]  ;;  %v285_v62 = vld [vmem:[#allocation5 + $0x3f8] sm:$0xff] }
  0xd6   :  { %1126 = vmatpush.msra.mxu3 %v532_v24  ;;  %1040 = vmatpush.msra.mxu0 %v336_v25  ;;  %v320_v42 = vld [vmem:[#allocation5 + $0x510] sm:$0xff] }
  0xd7   :  { %940 = vmatmul.f32.gmra.mxu0 %v2760_v38  ;;  %998 = vmatmul.f32.gmra.mxu2 %v2708_v16  ;;  %v376_v16 = vld [vmem:[#allocation5 + $0x6d0] sm:$0xff] }
  0xd8   :  { %1099 = vmatpush.msra.mxu2 %v460_v22  ;;  %1127 = vmatpush.msra.mxu3 %v528_v11  ;;  %v512_v44 = vld [vmem:[#allocation5 + $0xb10] sm:$0xff] }
  0xd9   :  { %1041 = vmatpush.msra.mxu0 %v332_v4  ;;  %2362 = vmatmul.msk.f32.gmra.mxu1 %vm560_vm0, %v2757_v32  ;;  %v444_v32 = vld [vmem:[#allocation5 + $0x8f0] sm:$0xff]  ;;  %v281_v4 = vld [vmem:[#allocation5 + $0x3d8] sm:$0xff] }
  0xda   :  { %1027 = vmatmul.f32.gmra.mxu3 %v2713_v21  ;;  %1100 = vmatpush.msra.mxu2 %v456_v27  ;;  %v316_v21 = vld [vmem:[#allocation5 + $0x4f0] sm:$0xff]  ;;  %v349_v27 = vld [vmem:[#allocation5 + $0x5f8] sm:$0xff] }
  0xdb   :  { %1128 = vmatpush.msra.mxu3 %v524_v28  ;;  %1042 = vmatpush.msra.mxu0 %v328_v17  ;;  %v440_v45 = vld [vmem:[#allocation5 + $0x8d0] sm:$0xff]  ;;  %v221_v28 = vld [vmem:[#allocation5 + $0x1f8] sm:$0xff] }
  0xdc   :  { %1101 = vmatpush.msra.mxu2 %v452_v29  ;;  %1074 = vmatpush.msra.mxu1 %v380_v30  ;;  %v2814_v43 = vpop.f32.mrf.mxu0  ;;  %v508_v46 = vld [vmem:[#allocation5 + $0xaf0] sm:$0xff]  ;;  %v2848_v17 = vld [vmem:[#allocation2 + $0x18] sm:$0xff] }
  0xdd   :  { %1129 = vmatpush.msra.mxu3 %v520_v33  ;;  %1043 = vmatpush.msra.mxu0 %v324_v36  ;;  %v312_v47 = vld [vmem:[#allocation5 + $0x4d0] sm:$0xff]  ;;  %v277_v29 = vld [vmem:[#allocation5 + $0x3b8] sm:$0xff] }
  0xde   :  { %1102 = vmatpush.msra.mxu2 %v448_v37  ;;  %1075 = vmatpush.msra.mxu1 %v376_v16  ;;  %v436_v35 = vld [vmem:[#allocation5 + $0x8b0] sm:$0xff]  ;;  %v345_v33 = vld [vmem:[#allocation5 + $0x5d8] sm:$0xff] }
  0xdf   :  { %1130 = vmatpush.msra.mxu3 %v516_v41  ;;  %1044 = vmatpush.msra.mxu0 %v320_v42  ;;  %v2818_v40 = vpop.f32.mrf.mxu1  ;;  %v372_v48 = vld [vmem:[#allocation5 + $0x6b0] sm:$0xff]  ;;  %v217_v36 = vld [vmem:[#allocation5 + $0x1d8] sm:$0xff] }
  0xe0   :  { %943 = vmatmul.f32.gmra.mxu0 %v2771_v61  ;;  %1001 = vmatmul.f32.gmra.mxu2 %v2720_v34  ;;  %v504_v49 = vld [vmem:[#allocation5 + $0xad0] sm:$0xff]  ;;  %v273_v37 = vld [vmem:[#allocation5 + $0x398] sm:$0xff] }
  0xe1   :  { %1103 = vmatpush.msra.mxu2 %v444_v32  ;;  %1131 = vmatpush.msra.mxu3 %v512_v44  ;;  %v308_v50 = vld [vmem:[#allocation5 + $0x4b0] sm:$0xff]  ;;  %v341_v16 = vld [vmem:[#allocation5 + $0x5b8] sm:$0xff]  ;;  %v2858_v44 = vld [vmem:[#allocation2 + $0x48] sm:$0xff] }
  0xe2   :  { %1045 = vmatpush.msra.mxu0 %v316_v21  ;;  %2363 = vmatmul.msk.f32.gmra.mxu1 %vm560_vm0, %v2768_v55  ;;  %v2823_v51 = vpop.f32.mrf.mxu2  ;;  %v432_v34 = vld [vmem:[#allocation5 + $0x890] sm:$0xff]  ;;  %v213_v41 = vld [vmem:[#allocation5 + $0x1b8] sm:$0xff] }
  0xe3   :  { %1030 = vmatmul.f32.gmra.mxu3 %v2725_v39  ;;  %1104 = vmatpush.msra.mxu2 %v440_v45  ;;  %v368_v56 = vld [vmem:[#allocation5 + $0x690] sm:$0xff]  ;;  %v269_v21 = vld [vmem:[#allocation5 + $0x378] sm:$0xff] }
  0xe4   :  { %1132 = vmatpush.msra.mxu3 %v508_v46  ;;  %1046 = vmatpush.msra.mxu0 %v312_v47  ;;  %v500_v59 = vld [vmem:[#allocation5 + $0xab0] sm:$0xff]  ;;  %v337_v45 = vld [vmem:[#allocation5 + $0x598] sm:$0xff] }
  0xe5   :  { %1105 = vmatpush.msra.mxu2 %v436_v35  ;;  %v304_v60 = vld [vmem:[#allocation5 + $0x490] sm:$0xff]  ;;  %1076 = vmatpush.msra.mxu1 %v372_v48  ;;  %v209_v46 = vld [vmem:[#allocation5 + $0x198] sm:$0xff] }
  0xe6   :  { %1133 = vmatpush.msra.mxu3 %v504_v49  ;;  %1047 = vmatpush.msra.mxu0 %v308_v50  ;;  %v2827_v0 = vpop.f32.mrf.mxu3  ;;  %v428_v39 = vld [vmem:[#allocation5 + $0x870] sm:$0xff]  ;;  %v265_v35 = vld [vmem:[#allocation5 + $0x358] sm:$0xff] }
  0xe7   :  { %v2825_v55 = vpop.f32.mrf.mxu0  ;;  %1106 = vmatpush.msra.mxu2 %v432_v34  ;;  %v496_v1 = vld [vmem:[#allocation5 + $0xa90] sm:$0xff]  ;;  %1077 = vmatpush.msra.mxu1 %v368_v56  ;;  %v333_v48 = vld [vmem:[#allocation5 + $0x578] sm:$0xff] }
  0xe8   :  { %1134 = vmatpush.msra.mxu3 %v500_v59  ;;  %1048 = vmatpush.msra.mxu0 %v304_v60  ;;  %v300_v2 = vld [vmem:[#allocation5 + $0x470] sm:$0xff]  ;;  %v205_v49 = vld [vmem:[#allocation5 + $0x178] sm:$0xff] }
  0xe9   :  { %946 = vmatmul.f32.gmra.mxu0 %v2784_v26  ;;  %1004 = vmatmul.f32.gmra.mxu2 %v2732_v52  ;;  %v424_v58 = vld [vmem:[#allocation5 + $0x850] sm:$0xff]  ;;  %v261_v50 = vld [vmem:[#allocation5 + $0x338] sm:$0xff] }
  0xea   :  { %v2831_v5 = vpop.f32.mrf.mxu1  ;;  %1107 = vmatpush.msra.mxu2 %v428_v39  ;;  %1135 = vmatpush.msra.mxu3 %v496_v1  ;;  %v492_v3 = vld [vmem:[#allocation5 + $0xa70] sm:$0xff]  ;;  %v2836_v12 = vpop.f32.mrf.mxu2  ;;  %v409_v34 = vld [vmem:[#allocation5 + $0x7d8] sm:$0xff] }
  0xeb   :  { %v296_v6 = vld [vmem:[#allocation5 + $0x450] sm:$0xff]  ;;  %1049 = vmatpush.msra.mxu0 %v300_v2  ;;  %2364 = vmatmul.msk.f32.gmra.mxu1 %vm560_vm0, %v2779_v19  ;;  %v329_v59 = vld [vmem:[#allocation5 + $0x558] sm:$0xff] }
  0xec   :  { %v364_v53 = vld [vmem:[#allocation5 + $0x670] sm:$0xff]  ;;  %1033 = vmatmul.f32.gmra.mxu3 %v2737_v57  ;;  %1108 = vmatpush.msra.mxu2 %v424_v58  ;;  %v201_v60 = vld [vmem:[#allocation5 + $0x158] sm:$0xff] }
  0xed   :  { %v420_v63 = vld [vmem:[#allocation5 + $0x830] sm:$0xff]  ;;  %1136 = vmatpush.msra.mxu3 %v492_v3  ;;  %1050 = vmatpush.msra.mxu0 %v296_v6  ;;  %v325_v1 = vld [vmem:[#allocation5 + $0x538] sm:$0xff]  ;;  %v2874_v6 = vld [vmem:[#allocation2 + $0x80] sm:$0xff] }
  0xee   :  { %v488_v7 = vld [vmem:[#allocation5 + $0xa50] sm:$0xff]  ;;  %1078 = vmatpush.msra.mxu1 %v364_v53  ;;  %1109 = vmatpush.msra.mxu2 %v420_v63  ;;  %v197_v2 = vld [vmem:[#allocation5 + $0x138] sm:$0xff] }
  0xef   :  { %v292_v8 = vld [vmem:[#allocation5 + $0x430] sm:$0xff]  ;;  %1137 = vmatpush.msra.mxu3 %v488_v7  ;;  %v2840_v23 = vpop.f32.mrf.mxu3  ;;  %v405_v3 = vld [vmem:[#allocation5 + $0x7b8] sm:$0xff] }
  0xf0   :  { %v360_v52 = vld [vmem:[#allocation5 + $0x650] sm:$0xff]  ;;  %1051 = vmatpush.msra.mxu0 %v292_v8  ;;  %v2838_v20 = vpop.f32.mrf.mxu0  ;;  %v253_v53 = vld [vmem:[#allocation5 + $0x2f8] sm:$0xff] }
  0xf1   :  { %v416_v9 = vld [vmem:[#allocation5 + $0x810] sm:$0xff]  ;;  %1079 = vmatpush.msra.mxu1 %v360_v52  ;;  %v321_v63 = vld [vmem:[#allocation5 + $0x518] sm:$0xff] }
  0xf2   :  { %v484_v13 = vld [vmem:[#allocation5 + $0xa30] sm:$0xff]  ;;  %1110 = vmatpush.msra.mxu2 %v416_v9  ;;  %v2845_v22 = vpop.f32.mrf.mxu1  ;;  %v193_v7 = vld [vmem:[#allocation5 + $0x118] sm:$0xff] }
  0xf3   :  { %v288_v14 = vld [vmem:[#allocation5 + $0x410] sm:$0xff]  ;;  %1138 = vmatpush.msra.mxu3 %v484_v13  ;;  %1111 = vmatmul.f32.vlgmr.msra.gmra.mxu2 %v2744_v10  ;;  %v249_v52 = vld [vmem:[#allocation5 + $0x2d8] sm:$0xff] }
  0xf4   :  { %v356_v19 = vld [vmem:[#allocation5 + $0x630] sm:$0xff]  ;;  %1052 = vmatpush.msra.mxu0 %v288_v14  ;;  %1211 = vmatpush.msrb.mxu2 %v285_v62  ;;  %v317_v9 = vld [vmem:[#allocation5 + $0x4f8] sm:$0xff] }
  0xf5   :  { %v480_v57 = vld [vmem:[#allocation5 + $0xa10] sm:$0xff]  ;;  %1080 = vmatpush.msra.mxu1 %v356_v19  ;;  %v189_v13 = vld [vmem:[#allocation5 + $0xf8] sm:$0xff] }
  0xf6   :  { %v352_v24 = vld [vmem:[#allocation5 + $0x610] sm:$0xff]  ;;  %1139 = vmatpush.msra.mxu3 %v480_v57  ;;  %1212 = vmatpush.msrb.mxu2 %v281_v4  ;;  %v245_v14 = vld [vmem:[#allocation5 + $0x2b8] sm:$0xff]  ;;  %v2881_v57 = vld [vmem:[#allocation2 + $0x88] sm:$0xff] }
  0xf7   :  { %v2842_v25 = vld [vmem:[#allocation2 + $0x10] sm:$0xff]  ;;  %1081 = vmatpush.msra.mxu1 %v352_v24  ;;  %1140 = vmatmul.f32.vlgmr.msra.gmra.mxu3 %v2749_v15  ;;  %v2852_v10 = vpop.f32.mrf.mxu2  ;;  %v413_v15 = vld [vmem:[#allocation5 + $0x7f8] sm:$0xff] }
  0xf8   :  { %1053 = vmatmul.f32.vlgmr.msra.gmra.mxu0 %v2842_v25  ;;  %v548_v11 = vld [vmem:[#allocation5 + $0xc30] sm:$0xff]  ;;  %1082 = vmatmul.f32.vlgmr.msra.gmra.mxu1 %v2848_v17  ;;  %v401_v19 = vld [vmem:[#allocation5 + $0x798] sm:$0xff] }
  0xf9   :  { %v544_v30 = vld [vmem:[#allocation5 + $0xc10] sm:$0xff]  ;;  %1167 = vmatpush.msrb.mxu0 %v548_v11  ;;  %1240 = vmatpush.msrb.mxu3 %v349_v27  ;;  %v2854_v42 = vpop.f32.mrf.mxu0  ;;  %v2856_v32 = vpop.f32.mrf.mxu3  ;;  %v313_v62 = vld [vmem:[#allocation5 + $0x4d8] sm:$0xff] }
  0xfa   :  { %1182 = vmatpush.msrb.mxu1 %v221_v28  ;;  %1213 = vmatpush.msrb.mxu2 %v277_v29  ;;  %v2865_v56 = vld [vmem:[#allocation2 + $0x50] sm:$0xff]  ;;  %v185_v24 = vld [vmem:[#allocation5 + $0xd8] sm:$0xff] }
  0xfb   :  { %1168 = vmatpush.msrb.mxu0 %v544_v30  ;;  %1241 = vmatpush.msrb.mxu3 %v345_v33  ;;  %v309_v4 = vld [vmem:[#allocation5 + $0x4b8] sm:$0xff] }
  0xfc   :  { %1183 = vmatpush.msrb.mxu1 %v217_v36  ;;  %1214 = vmatpush.msrb.mxu2 %v273_v37  ;;  %v2861_v47 = vpop.f32.mrf.mxu1  ;;  %v181_v27 = vld [vmem:[#allocation5 + $0xb8] sm:$0xff] }
  0xfd   :  { %1242 = vmatpush.msrb.mxu3 %v341_v16  ;;  %1114 = vmatmul.f32.gmra.mxu2 %v2755_v31  ;;  %v257_v31 = vld [vmem:[#allocation5 + $0x318] sm:$0xff] }
  0xfe   :  { %1184 = vmatpush.msrb.mxu1 %v213_v41  ;;  %1269 = vmatpush.msra.mxu0 %v413_v15  ;;  %v397_v29 = vld [vmem:[#allocation5 + $0x778] sm:$0xff] }
  0xff   :  { %1215 = vmatpush.msrb.mxu2 %v269_v21  ;;  %1243 = vmatpush.msrb.mxu3 %v337_v45  ;;  %v2890_v30 = vld [vmem:[#allocation2 + $0xb8] sm:$0xff] }
 0x100   :  { %1056 = vmatmul.f32.gmra.mxu0 %v2858_v44  ;;  %1185 = vmatpush.msrb.mxu1 %v209_v46  ;;  %v2868_v39 = vpop.f32.mrf.mxu2  ;;  %v237_v33 = vld [vmem:[#allocation5 + $0x278] sm:$0xff] }
 0x101   :  { %1143 = vmatmul.f32.gmra.mxu3 %v2760_v38  ;;  %1085 = vmatmul.f32.gmra.mxu1 %v2865_v56  ;;  %v305_v36 = vld [vmem:[#allocation5 + $0x498] sm:$0xff] }
 0x102   :  { %1216 = vmatpush.msrb.mxu2 %v265_v35  ;;  %1244 = vmatpush.msrb.mxu3 %v333_v48  ;;  %v2870_v58 = vpop.f32.mrf.mxu3  ;;  %v177_v37 = vld [vmem:[#allocation5 + $0x98] sm:$0xff]  ;;  %v2897_v35 = vld [vmem:[#allocation2 + $0xc0] sm:$0xff] }
 0x103   :  { %1186 = vmatpush.msrb.mxu1 %v205_v49  ;;  %v2872_v38 = vpop.f32.mrf.mxu0  ;;  %1270 = vmatpush.msra.mxu0 %v409_v34  ;;  %v233_v41 = vld [vmem:[#allocation5 + $0x258] sm:$0xff] }
 0x104   :  { %1217 = vmatpush.msrb.mxu2 %v261_v50  ;;  %1245 = vmatpush.msrb.mxu3 %v329_v59  ;;  %v301_v15 = vld [vmem:[#allocation5 + $0x478] sm:$0xff] }
 0x105   :  { %1187 = vmatpush.msrb.mxu1 %v201_v60  ;;  %v2877_v8 = vpop.f32.mrf.mxu1  ;;  %1117 = vmatmul.f32.gmra.mxu2 %v2766_v54  ;;  %v241_v54 = vld [vmem:[#allocation5 + $0x298] sm:$0xff] }
 0x106   :  { %1218 = vmatpush.msrb.mxu2 %v257_v31  ;;  %1246 = vmatpush.msrb.mxu3 %v325_v1  ;;  %v173_v21 = vld [vmem:[#allocation5 + $0x78] sm:$0xff]  ;;  %v2906_v1 = vld [vmem:[#allocation2 + $0x30] sm:$0xff] }
 0x107   :  { %1188 = vmatpush.msrb.mxu1 %v197_v2  ;;  %1271 = vmatpush.msra.mxu0 %v405_v3  ;;  %v229_v45 = vld [vmem:[#allocation5 + $0x238] sm:$0xff] }
 0x108   :  { %1059 = vmatmul.f32.gmra.mxu0 %v2874_v6  ;;  %1219 = vmatpush.msrb.mxu2 %v253_v53  ;;  %v2884_v11 = vpop.f32.mrf.mxu2  ;;  %v393_v46 = vld [vmem:[#allocation5 + $0x758] sm:$0xff] }
 0x109   :  { %1247 = vmatpush.msrb.mxu3 %v321_v63  ;;  %1189 = vmatpush.msrb.mxu1 %v193_v7  ;;  %v297_v48 = vld [vmem:[#allocation5 + $0x458] sm:$0xff]  ;;  %v2397_v7 = vld [vmem:[#allocation2 + $0x8] sm:$0xff] }
 0x10a   :  { %1146 = vmatmul.f32.gmra.mxu3 %v2771_v61  ;;  %1088 = vmatmul.f32.gmra.mxu1 %v2881_v57  ;;  %v169_v49 = vld [vmem:[#allocation5 + $0x58] sm:$0xff] }
 0x10b   :  { %1220 = vmatpush.msrb.mxu2 %v249_v52  ;;  %1248 = vmatpush.msrb.mxu3 %v317_v9  ;;  %v2886_v28 = vpop.f32.mrf.mxu0  ;;  %v2888_v61 = vpop.f32.mrf.mxu3  ;;  %v293_v34 = vld [vmem:[#allocation5 + $0x438] sm:$0xff] }
 0x10c   :  { %1190 = vmatpush.msrb.mxu1 %v189_v13  ;;  %1272 = vmatpush.msra.mxu0 %v401_v19  ;;  %v165_v59 = vld [vmem:[#allocation5 + $0x38] sm:$0xff] }
 0x10d   :  { %1221 = vmatpush.msrb.mxu2 %v245_v14  ;;  %1249 = vmatpush.msrb.mxu3 %v313_v62  ;;  %v389_v31 = vld [vmem:[#allocation5 + $0x738] sm:$0xff]  ;;  %v2398_v62 = vld [vmem:[#allocation2] sm:$0xff] }
 0x10e   :  { %1191 = vmatpush.msrb.mxu1 %v185_v24  ;;  %v2893_v16 = vpop.f32.mrf.mxu1  ;;  %1120 = vmatmul.f32.gmra.mxu2 %v2777_v18  ;;  %v225_v18 = vld [vmem:[#allocation5 + $0x218] sm:$0xff] }
 0x10f   :  { %1222 = vmatpush.msrb.mxu2 %v241_v54  ;;  %1250 = vmatpush.msrb.mxu3 %v309_v4  ;;  %v289_v2 = vld [vmem:[#allocation5 + $0x418] sm:$0xff] }
 0x110   :  { %1062 = vmatmul.f32.gmra.mxu0 %v2890_v30  ;;  %1192 = vmatpush.msrb.mxu1 %v181_v27  ;;  %v541_v3 = vld [vmem:[#allocation5 + $0xbf8] sm:$0xff] }
 0x111   :  { %1273 = vmatpush.msra.mxu0 %v397_v29  ;;  %1223 = vmatpush.msrb.mxu2 %v237_v33  ;;  %v161_v53 = vld [vmem:[#allocation5 + $0x18] sm:$0xff] }
 0x112   :  { %1251 = vmatpush.msrb.mxu3 %v305_v36  ;;  %1193 = vmatpush.msrb.mxu1 %v177_v37  ;;  %v2900_v50 = vpop.f32.mrf.mxu2  ;;  %v537_v52 = vld [vmem:[#allocation5 + $0xbd8] sm:$0xff] }
 0x113   :  { %1149 = vmatmul.f32.gmra.mxu3 %v2784_v26  ;;  %1091 = vmatmul.f32.gmra.mxu1 %v2897_v35  ;;  %v549_v9 = vld [vmem:[#allocation5 + $0xc38] sm:$0xff] }
 0x114   :  { %1224 = vmatpush.msrb.mxu2 %v233_v41  ;;  %1252 = vmatpush.msrb.mxu3 %v301_v15  ;;  %v2902_v60 = vpop.f32.mrf.mxu0  ;;  %v2904_v26 = vpop.f32.mrf.mxu3  ;;  %v477_v13 = vld [vmem:[#allocation5 + $0x9f8] sm:$0xff] }
 0x115   :  { %1194 = vmatpush.msrb.mxu1 %v173_v21  ;;  %1274 = vmatpush.msra.mxu0 %v393_v46  ;;  %v533_v14 = vld [vmem:[#allocation5 + $0xbb8] sm:$0xff]  ;;  %v2400_v21 = vld [vmem:[#allocation2 + $0x40] sm:$0xff] }
 0x116   :  { %1225 = vmatpush.msrb.mxu2 %v229_v45  ;;  %1253 = vmatpush.msrb.mxu3 %v297_v48  ;;  %v385_v19 = vld [vmem:[#allocation5 + $0x718] sm:$0xff] }
 0x117   :  { %1195 = vmatpush.msrb.mxu1 %v169_v49  ;;  %v2910_v63 = vpop.f32.mrf.mxu1  ;;  %1275 = vmatpush.msra.mxu0 %v389_v31  ;;  %v473_v24 = vld [vmem:[#allocation5 + $0x9d8] sm:$0xff] }
 0x118   :  { %1226 = vmatpush.msrb.mxu2 %v225_v18  ;;  %2365 = vmatmul.msk.f32.vlgmr.msrb.gmra.mxu0 %vm560_vm0, %v2906_v1  ;;  %v529_v4 = vld [vmem:[#allocation5 + $0xb98] sm:$0xff] }
 0x119   :  { %1254 = vmatpush.msrb.mxu3 %v293_v34  ;;  %1196 = vmatpush.msrb.mxu1 %v165_v59  ;;  %v381_v27 = vld [vmem:[#allocation5 + $0x6f8] sm:$0xff] }
 0x11a   :  { %1227 = vmatmul.f32.vlgmr.msrb.gmra.mxu2 %v2397_v7  ;;  %v469_v29 = vld [vmem:[#allocation5 + $0x9b8] sm:$0xff]  ;;  %1276 = vmatpush.msra.mxu0 %v385_v19  ;;  %v2928_v7 = vld [vmem:[#allocation2 + $0xa0] sm:$0xff] }
 0x11b   :  { %1255 = vmatpush.msrb.mxu3 %v289_v2  ;;  %1327 = vmatpush.msra.mxu2 %v541_v3  ;;  %v2913_v54 = vpop.f32.mrf.mxu2  ;;  %v525_v37 = vld [vmem:[#allocation5 + $0xb78] sm:$0xff] }
 0x11c   :  { %1197 = vmatpush.msrb.mxu1 %v161_v53  ;;  %1256 = vmatmul.f32.vlgmr.msrb.gmra.mxu3 %v2842_v25  ;;  %v2919_v25 = vld [vmem:[#allocation2 + $0x68] sm:$0xff]  ;;  %v545_v41 = vld [vmem:[#allocation5 + $0xc18] sm:$0xff] }
 0x11d   :  { %1198 = vmatmul.f32.vlgmr.msrb.gmra.mxu1 %v2398_v62  ;;  %1328 = vmatpush.msra.mxu2 %v537_v52  ;;  %v2915_v33 = vpop.f32.mrf.mxu0  ;;  %v2917_v36 = vpop.f32.mrf.mxu3  ;;  %v465_v15 = vld [vmem:[#allocation5 + $0x998] sm:$0xff] }
 0x11e   :  { %1370 = vmatpush.msra.mxu3 %v549_v9  ;;  %1298 = vmatpush.msra.mxu1 %v477_v13  ;;  %v521_v45 = vld [vmem:[#allocation5 + $0xb58] sm:$0xff] }
 0x11f   :  { %1329 = vmatpush.msra.mxu2 %v533_v14  ;;  %1277 = vmatpush.msra.mxu0 %v381_v27  ;;  %v461_v46 = vld [vmem:[#allocation5 + $0x978] sm:$0xff] }
 0x120   :  { %1299 = vmatpush.msra.mxu1 %v473_v24  ;;  %2366 = vmatmul.msk.f32.gmra.mxu0 %vm560_vm0, %v2919_v25  ;;  %v377_v48 = vld [vmem:[#allocation5 + $0x6d8] sm:$0xff]  ;;  %v2923_v49 = vpop.f32.mrf.mxu1 }
 0x121   :  { %1330 = vmatpush.msra.mxu2 %v529_v4  ;;  %1371 = vmatpush.msra.mxu3 %v545_v41  ;;  %v517_v18 = vld [vmem:[#allocation5 + $0xb38] sm:$0xff] }
 0x122   :  { %1300 = vmatpush.msra.mxu1 %v469_v29  ;;  %1230 = vmatmul.f32.gmra.mxu2 %v2400_v21  ;;  %v2401_v34 = vld [vmem:[#allocation2 + $0x38] sm:$0xff] }
 0x123   :  { %1331 = vmatpush.msra.mxu2 %v525_v37  ;;  %v457_v59 = vld [vmem:[#allocation5 + $0x958] sm:$0xff]  ;;  %1278 = vmatpush.msra.mxu0 %v377_v48  ;;  %v2404_v37 = vld [vmem:[#allocation2 + $0x70] sm:$0xff] }
 0x124   :  { %1301 = vmatpush.msra.mxu1 %v465_v15  ;;  %1259 = vmatmul.f32.gmra.mxu3 %v2858_v44  ;;  %v513_v31 = vld [vmem:[#allocation5 + $0xb18] sm:$0xff]  ;;  %v2926_v3 = vpop.f32.mrf.mxu2 }
 0x125   :  { %1201 = vmatmul.f32.gmra.mxu1 %v2401_v34  ;;  %1332 = vmatpush.msra.mxu2 %v521_v45  ;;  %v373_v2 = vld [vmem:[#allocation5 + $0x6b8] sm:$0xff] }
 0x126   :  { %1302 = vmatpush.msra.mxu1 %v461_v46  ;;  %v453_v53 = vld [vmem:[#allocation5 + $0x938] sm:$0xff]  ;;  %1279 = vmatpush.msra.mxu0 %v373_v2  ;;  %v2932_v13 = vpop.f32.mrf.mxu3  ;;  %v2934_v14 = vpop.f32.mrf.mxu0 }
 0x127   :  { %1333 = vmatpush.msra.mxu2 %v517_v18  ;;  %v509_v44 = vld [vmem:[#allocation5 + $0xaf8] sm:$0xff] }
 0x128   :  { %1303 = vmatpush.msra.mxu1 %v457_v59  ;;  %2367 = vmatmul.msk.f32.gmra.mxu0 %vm560_vm0, %v2928_v7  ;;  %v369_v52 = vld [vmem:[#allocation5 + $0x698] sm:$0xff] }
 0x129   :  { %1334 = vmatpush.msra.mxu2 %v513_v31  ;;  %v449_v9 = vld [vmem:[#allocation5 + $0x918] sm:$0xff]  ;;  %1280 = vmatpush.msra.mxu0 %v369_v52  ;;  %v2937_v29 = vpop.f32.mrf.mxu1  ;;  %v2406_v31 = vld [vmem:[#allocation2 + $0xb0] sm:$0xff] }
 0x12a   :  { %1304 = vmatpush.msra.mxu1 %v453_v53  ;;  %v2403_v19 = vld [vmem:[#allocation2 + $0x78] sm:$0xff] }
 0x12b   :  { %1233 = vmatmul.f32.gmra.mxu2 %v2403_v19  ;;  %v505_v62 = vld [vmem:[#allocation5 + $0xad8] sm:$0xff]  ;;  %v1461_v19 = vld [vmem:[#allocation8 + $0x1e0] sm:$0xff] }
 0x12c   :  { %1335 = vmatpush.msra.mxu2 %v509_v44  ;;  %v445_v24 = vld [vmem:[#allocation5 + $0x8f8] sm:$0xff]  ;;  %1305 = vmatpush.msra.mxu1 %v449_v9 }
 0x12d   :  { %v365_v4 = vld [vmem:[#allocation5 + $0x678] sm:$0xff]  ;;  %1262 = vmatmul.f32.gmra.mxu3 %v2874_v6  ;;  %1204 = vmatmul.f32.gmra.mxu1 %v2404_v37  ;;  %v2943_v18 = vpop.f32.mrf.mxu2  ;;  %v1457_v37 = vld [vmem:[#allocation8 + $0x1c0] sm:$0xff] }
 0x12e   :  { %v501_v27 = vld [vmem:[#allocation5 + $0xab8] sm:$0xff]  ;;  %1336 = vmatpush.msra.mxu2 %v505_v62  ;;  %1306 = vmatpush.msra.mxu1 %v445_v24  ;;  %v2945_v59 = vpop.f32.mrf.mxu0  ;;  %v2407_v62 = vld [vmem:[#allocation2 + $0xa8] sm:$0xff] }
 0x12f   :  { %v441_v41 = vld [vmem:[#allocation5 + $0x8d8] sm:$0xff]  ;;  %1281 = vmatpush.msra.mxu0 %v365_v4 }
 0x130   :  { %v497_v15 = vld [vmem:[#allocation5 + $0xa98] sm:$0xff]  ;;  %1337 = vmatpush.msra.mxu2 %v501_v27  ;;  %1307 = vmatpush.msra.mxu1 %v441_v41  ;;  %v2947_v52 = vpop.f32.mrf.mxu3  ;;  %v2952_v41 = vld [vmem:[#allocation7] sm:$0xf] }
 0x131   :  { %v361_v21 = vld [vmem:[#allocation5 + $0x658] sm:$0xff] }
 0x132   :  { %v437_v45 = vld [vmem:[#allocation5 + $0x8b8] sm:$0xff]  ;;  %1338 = vmatpush.msra.mxu2 %v497_v15  ;;  %1282 = vmatpush.msra.mxu0 %v361_v21  ;;  %v2950_v4 = vpop.f32.mrf.mxu1 }
 0x133   :  { %v2939_v46 = vld [vmem:[#allocation2 + $0xd8] sm:$0xff]  ;;  %1308 = vmatpush.msra.mxu1 %v437_v45  ;;  %1236 = vmatmul.f32.gmra.mxu2 %v2406_v31 }
 0x134   :  { %2368 = vmatmul.msk.f32.gmra.mxu0 %vm560_vm0, %v2939_v46  ;;  %v493_v6 = vld [vmem:[#allocation5 + $0xa78] sm:$0xff] }
 0x135   :  { %v357_v48 = vld [vmem:[#allocation5 + $0x638] sm:$0xff]  ;;  %1339 = vmatpush.msra.mxu2 %v493_v6  ;;  %1265 = vmatmul.f32.gmra.mxu3 %v2890_v30  ;;  %v1453_v30 = vld [vmem:[#allocation8 + $0x1a0] sm:$0xff]  ;;  %v2958_v6 = vperm.slane %v2952_v41, 0 }
 0x136   :  { %v433_v34 = vld [vmem:[#allocation5 + $0x898] sm:$0xff]  ;;  %1283 = vmatpush.msra.mxu0 %v357_v48  ;;  %1207 = vmatmul.f32.gmra.mxu1 %v2407_v62  ;;  %v2955_v45 = vpop.f32.mrf.mxu2  ;;  %v2408_v48 = vld [vmem:[#allocation2 + $0x28] sm:$0xff] }
 0x137   :  { %v489_v2 = vld [vmem:[#allocation5 + $0xa58] sm:$0xff]  ;;  %1309 = vmatpush.msra.mxu1 %v433_v34  ;;  %v1449_v34 = vld [vmem:[#allocation8 + $0x180] sm:$0xff]  ;;  %v2960_v31 = vpop.f32.mrf.mxu0 }
 0x138   :  { %v429_v53 = vld [vmem:[#allocation5 + $0x878] sm:$0xff]  ;;  %1340 = vmatpush.msra.mxu2 %v489_v2  ;;  %v1525_v2 = vld [vmem:[#allocation8 + $0x3e0] sm:$0xff] }
 0x139   :  { %v353_v44 = vld [vmem:[#allocation5 + $0x618] sm:$0xff]  ;;  %1310 = vmatpush.msra.mxu1 %v429_v53  ;;  %v2964_v53 = vpop.f32.mrf.mxu3  ;;  %v1441_v62 = vld [vmem:[#allocation8 + $0x140] sm:$0xff] }
 0x13a   :  { %v485_v9 = vld [vmem:[#allocation5 + $0xa38] sm:$0xff]  ;;  %1284 = vmatpush.msra.mxu0 %v353_v44  ;;  %v2409_v44 = vld [vmem:[#allocation2 + $0x20] sm:$0xff] }
 0x13b   :  { %v425_v24 = vld [vmem:[#allocation5 + $0x858] sm:$0xff]  ;;  %1341 = vmatpush.msra.mxu2 %v485_v9  ;;  %v1521_v9 = vld [vmem:[#allocation8 + $0x3c0] sm:$0xff] }
 0x13c   :  { %v481_v27 = vld [vmem:[#allocation5 + $0xa18] sm:$0xff]  ;;  %1667 = vmatpush.msrb.mxu0 %v1461_v19  ;;  %1311 = vmatpush.msra.mxu1 %v425_v24  ;;  %v591_v19 = vadd.f32 %v2814_v43, %v2958_v6  ;;  %v2968_v24 = vpop.f32.mrf.mxu1  ;;  %v1433_v43 = vld [vmem:[#allocation8 + $0x100] sm:$0xff] }
 0x13d   :  { %v421_v15 = vld [vmem:[#allocation5 + $0x838] sm:$0xff]  ;;  %1285 = vmatmul.f32.vlgmr.msra.gmra.mxu0 %v2848_v17  ;;  %1342 = vmatpush.msra.mxu2 %v481_v27  ;;  %v1445_v17 = vld [vmem:[#allocation8 + $0x160] sm:$0xff]  ;;  %v2971_v27 = vperm.slane %v2952_v41, 1 }
 0x13e   :  { %v417_v21 = vld [vmem:[#allocation5 + $0x818] sm:$0xff]  ;;  %1668 = vmatpush.msrb.mxu0 %v1457_v37  ;;  %1312 = vmatpush.msra.mxu1 %v421_v15  ;;  %v1517_v37 = vld [vmem:[#allocation8 + $0x3a0] sm:$0xff] }
 0x13f   :  { %1343 = vmatmul.f32.vlgmr.msra.gmra.mxu2 %v2408_v48  ;;  %2369 = vmatmul.msk.f32.vlgmr.msra.gmra.mxu3 %vm560_vm0, %v2906_v1  ;;  %v1437_v1 = vld [vmem:[#allocation8 + $0x120] sm:$0xff]  ;;  %v2975_v48 = vpop.f32.mrf.mxu2 }
 0x140   :  { %1669 = vmatpush.msrb.mxu0 %v1453_v30  ;;  %1313 = vmatpush.msra.mxu1 %v417_v21  ;;  %v1513_v15 = vld [vmem:[#allocation8 + $0x380] sm:$0xff]  ;;  %v620_v30 = vadd.f32 %v2818_v40, %v591_v19 }
 0x141   :  { %1314 = vmatmul.f32.vlgmr.msra.gmra.mxu1 %v2409_v44  ;;  %v2410_v21 = vld [vmem:[#allocation2 + $0x60] sm:$0xff]  ;;  %v2411_v44 = vld [vmem:[#allocation2 + $0x58] sm:$0xff] }
 0x142   :  { %1670 = vmatpush.msrb.mxu0 %v1449_v34  ;;  %1696 = vmatpush.msrb.mxu1 %v1525_v2  ;;  %v794_v34 = vadd.f32 %v2888_v61, %v2971_v27  ;;  %v1509_v2 = vld [vmem:[#allocation8 + $0x360] sm:$0xff]  ;;  %v2984_v19 = vpop.f32.mrf.mxu3  ;;  %v594_v61 = vadd.f32 %v2825_v55, %v2958_v6 }
 0x143   :  { %v1417_v55 = vld [vmem:[#allocation8 + $0x80] sm:$0xff] }
 0x144   :  { %1671 = vmatpush.msrb.mxu0 %v1445_v17  ;;  %1697 = vmatpush.msrb.mxu1 %v1521_v9  ;;  %v2981_v17 = vpop.f32.mrf.mxu0  ;;  %v823_v40 = vadd.f32 %v2934_v14, %v794_v34  ;;  %v1505_v9 = vld [vmem:[#allocation8 + $0x340] sm:$0xff]  ;;  %v797_v34 = vadd.f32 %v2904_v26, %v2971_v27 }
 0x145   :  { %1288 = vmatmul.f32.gmra.mxu0 %v2865_v56  ;;  %v1429_v56 = vld [vmem:[#allocation8 + $0xe0] sm:$0xff] }
 0x146   :  { %1672 = vmatpush.msrb.mxu0 %v1441_v62  ;;  %1698 = vmatpush.msrb.mxu1 %v1517_v37  ;;  %v649_v62 = vadd.f32 %v2823_v51, %v620_v30  ;;  %v1425_v37 = vld [vmem:[#allocation8 + $0xc0] sm:$0xff]  ;;  %v623_v51 = vadd.f32 %v2831_v5, %v594_v61  ;;  %v2412_v30 = vld [vmem:[#allocation2 + $0x98] sm:$0xff]  ;;  %v826_v5 = vadd.f32 %v2945_v59, %v797_v34 }
 0x147   :  { %1346 = vmatmul.f32.gmra.mxu2 %v2410_v21  ;;  %2370 = vmatmul.msk.f32.gmra.mxu3 %vm560_vm0, %v2919_v25  ;;  %v1501_v25 = vld [vmem:[#allocation8 + $0x320] sm:$0xff] }
 0x148   :  { %1673 = vmatpush.msrb.mxu0 %v1437_v1  ;;  %1699 = vmatpush.msrb.mxu1 %v1513_v15  ;;  %v2989_v1 = vpop.f32.mrf.mxu1  ;;  %v1421_v14 = vld [vmem:[#allocation8 + $0xa0] sm:$0xff]  ;;  %v852_v15 = vadd.f32 %v2937_v29, %v823_v40  ;;  %v2413_v40 = vld [vmem:[#allocation2 + $0x90] sm:$0xff]  ;;  %v652_v26 = vadd.f32 %v2836_v12, %v623_v51  ;;  %v855_v12 = vadd.f32 %v2950_v4, %v826_v5 }
 0x149   :  { %1317 = vmatmul.f32.gmra.mxu1 %v2411_v44  ;;  %v1497_v21 = vld [vmem:[#allocation8 + $0x300] sm:$0xff] }
 0x14a   :  { %1674 = vmatpush.msrb.mxu0 %v1433_v43  ;;  %1700 = vmatpush.msrb.mxu1 %v1509_v2  ;;  %v678_v43 = vadd.f32 %v2827_v0, %v649_v62  ;;  %v881_v2 = vadd.f32 %v2943_v18, %v852_v15  ;;  %v1413_v0 = vld [vmem:[#allocation8 + $0x60] sm:$0xff]  ;;  %v597_v18 = vadd.f32 %v2838_v20, %v2958_v6 }
 0x14b   :  { %v1489_v44 = vld [vmem:[#allocation8 + $0x2c0] sm:$0xff]  ;;  %v3007_v62 = vpop.f32.mrf.mxu3  ;;  %v681_v15 = vadd.f32 %v2840_v23, %v652_v26  ;;  %v884_v51 = vadd.f32 %v2955_v45, %v855_v12 }
 0x14c   :  { %1675 = vmatpush.msrb.mxu0 %v1429_v56  ;;  %1701 = vmatpush.msrb.mxu1 %v1505_v9  ;;  %v2998_v56 = vpop.f32.mrf.mxu2  ;;  %v707_v29 = vadd.f32 %v2872_v38, %v678_v43  ;;  %v1409_v9 = vld [vmem:[#allocation8 + $0x40] sm:$0xff]  ;;  %v938_v38 = vpop.f32.mrf.mxu0  ;;  %v2414_v43 = vld [vmem:[#allocation2 + $0xd0] sm:$0xff] }
 0x14d   :  { %1291 = vmatmul.f32.gmra.mxu0 %v2881_v57  ;;  %v1493_v57 = vld [vmem:[#allocation8 + $0x2e0] sm:$0xff] }
 0x14e   :  { %1676 = vmatpush.msrb.mxu0 %v1425_v37  ;;  %1702 = vmatpush.msrb.mxu1 %v1501_v25  ;;  %v1485_v61 = vld [vmem:[#allocation8 + $0x2a0] sm:$0xff]  ;;  %v736_v59 = vadd.f32 %v2877_v8, %v707_v29 }
 0x14f   :  { %1349 = vmatmul.f32.gmra.mxu2 %v2412_v30  ;;  %2371 = vmatmul.msk.f32.gmra.mxu3 %vm560_vm0, %v2928_v7  ;;  %v910_v7 = vadd.f32 %v2947_v52, %v881_v2  ;;  %v1405_v37 = vld [vmem:[#allocation8 + $0x20] sm:$0xff]  ;;  %v1462_v30 = vld [vmem:[#allocation8 + $0x1e8] sm:$0xff]  ;;  %v600_v2 = vadd.f32 %v2854_v42, %v2958_v6 }
 0x150   :  { %1677 = vmatpush.msrb.mxu0 %v1421_v14  ;;  %1703 = vmatpush.msrb.mxu1 %v1497_v21  ;;  %v967_v25 = vpop.f32.mrf.mxu1  ;;  %v1481_v20 = vld [vmem:[#allocation8 + $0x280] sm:$0xff]  ;;  %v626_v21 = vadd.f32 %v2845_v22, %v597_v18  ;;  %v765_v52 = vadd.f32 %v2884_v11, %v736_v59  ;;  %v803_v59 = vadd.f32 %v2932_v13, %v2971_v27 }
 0x151   :  { %1320 = vmatmul.f32.gmra.mxu1 %v2413_v40  ;;  %v939_v14 = vadd.f32 %v938_v38, %v910_v7  ;;  %v1401_v8 = vld [vmem:[#allocation8] sm:$0xff]  ;;  %v629_v18 = vadd.f32 %v2861_v47, %v600_v2  ;;  %v1522_v47 = vld [vmem:[#allocation8 + $0x3c8] sm:$0xff] }
 0x152   :  { %1678 = vmatpush.msrb.mxu0 %v1417_v55  ;;  %1704 = vmatpush.msrb.mxu1 %v1493_v57  ;;  %v1477_v4 = vld [vmem:[#allocation8 + $0x260] sm:$0xff]  ;;  %v710_v55 = vadd.f32 %v2886_v28, %v681_v15  ;;  %v655_v45 = vadd.f32 %v2852_v10, %v626_v21  ;;  %v3028_v57 = vmax.f32 %v765_v52, 0.0  ;;  %v1458_v28 = vld [vmem:[#allocation8 + $0x1c8] sm:$0xff] }
 0x153   :  { %v2415_v11 = vld [vmem:[#allocation2 + $0xc8] sm:$0xff]  ;;  %v968_v34 = vadd.f32 %v967_v25, %v939_v14 }
 0x154   :  { %1679 = vmatpush.msrb.mxu0 %v1413_v0  ;;  %1705 = vmatpush.msrb.mxu1 %v1489_v44  ;;  %v3022_v23 = vpop.f32.mrf.mxu2  ;;  %v1469_v29 = vld [vmem:[#allocation8 + $0x220] sm:$0xff]  ;;  %v941_v0 = vpop.f32.mrf.mxu0  ;;  %v739_v5 = vadd.f32 %v2893_v16, %v710_v55  ;;  %v1454_v10 = vld [vmem:[#allocation8 + $0x1a8] sm:$0xff] }
 0x155   :  { %1294 = vmatmul.f32.gmra.mxu0 %v2897_v35  ;;  %v800_v35 = vadd.f32 %v2917_v36, %v2971_v27  ;;  %v1473_v36 = vld [vmem:[#allocation8 + $0x240] sm:$0xff]  ;;  %v3036_v42 = vmax.f32 %v968_v34, 0.0  ;;  %v1450_v16 = vld [vmem:[#allocation8 + $0x188] sm:$0xff] }
 0x156   :  { %1680 = vmatpush.msrb.mxu0 %v1409_v9  ;;  %1706 = vmatpush.msrb.mxu1 %v1485_v61  ;;  %v1465_v6 = vld [vmem:[#allocation8 + $0x200] sm:$0xff]  ;;  %v768_v9 = vadd.f32 %v2900_v50, %v739_v5  ;;  %v1526_v61 = vld [vmem:[#allocation8 + $0x3e8] sm:$0xff] }
 0x157   :  { %1352 = vmatmul.f32.gmra.mxu2 %v2414_v43  ;;  %2372 = vmatmul.msk.f32.gmra.mxu3 %vm560_vm0, %v2939_v46  ;;  %v829_v22 = vadd.f32 %v2960_v31, %v800_v35  ;;  %v913_v46 = vadd.f32 %v2964_v53, %v884_v51  ;;  %v3031_v31 = vpop.f32.mrf.mxu3  ;;  %v684_v53 = vadd.f32 %v2856_v32, %v655_v45  ;;  %v1589_v38 = vld [vmem:[#allocation8 + $0x5e0] sm:$0xff]  ;;  %v1518_v27 = vld [vmem:[#allocation8 + $0x3a8] sm:$0xff] }
 0x158   :  { %1681 = vmatpush.msrb.mxu0 %v1405_v37  ;;  %1707 = vmatpush.msrb.mxu1 %v1481_v20  ;;  %v970_v26 = vpop.f32.mrf.mxu1  ;;  %v1446_v37 = vld [vmem:[#allocation8 + $0x168] sm:$0xff]  ;;  %v1585_v25 = vld [vmem:[#allocation8 + $0x5c0] sm:$0xff]  ;;  %v3049_v12 = vmax.f32 %v768_v9, 0.0  ;;  %v832_v20 = vadd.f32 %v2981_v17, %v803_v59 }
 0x159   :  { %1323 = vmatmul.f32.gmra.mxu1 %v2415_v11  ;;  %v858_v40 = vadd.f32 %v2968_v24, %v829_v22  ;;  %v942_v44 = vadd.f32 %v941_v0, %v913_v46  ;;  %1725 = vmatpush.msrb.mxu2 %v1589_v38  ;;  %v713_v24 = vadd.f32 %v2902_v60, %v684_v53  ;;  %v1442_v60 = vld [vmem:[#allocation8 + $0x148] sm:$0xff]  ;;  %v1581_v52 = vld [vmem:[#allocation8 + $0x5a0] sm:$0xff] }
 0x15a   :  { %1682 = vmatpush.msrb.mxu0 %v1401_v8  ;;  %1708 = vmatpush.msrb.mxu1 %v1477_v4  ;;  %v1514_v17 = vld [vmem:[#allocation8 + $0x388] sm:$0xff]  ;;  %v1577_v35 = vld [vmem:[#allocation8 + $0x580] sm:$0xff] }
 0x15b   :  { %v887_v7 = vadd.f32 %v2975_v48, %v858_v40  ;;  %v971_v32 = vadd.f32 %v970_v26, %v942_v44  ;;  %v658_v48 = vadd.f32 %v2868_v39, %v629_v18  ;;  %1726 = vmatpush.msrb.mxu2 %v1585_v25  ;;  %v742_v14 = vadd.f32 %v2910_v63, %v713_v24  ;;  %v1438_v39 = vld [vmem:[#allocation8 + $0x128] sm:$0xff]  ;;  %v1573_v22 = vld [vmem:[#allocation8 + $0x560] sm:$0xff] }
 0x15c   :  { %1783 = vmatpush.msra.mxu0 %v1462_v30  ;;  %1709 = vmatpush.msrb.mxu1 %v1473_v36  ;;  %v3046_v50 = vpop.f32.mrf.mxu2  ;;  %v861_v63 = vadd.f32 %v2989_v1, %v832_v20  ;;  %v1434_v30 = vld [vmem:[#allocation8 + $0x108] sm:$0xff]  ;;  %v1561_v18 = vld [vmem:[#allocation8 + $0x500] sm:$0xff] }
 0x15d   :  { %1683 = vmatmul.f32.vlgmr.msrb.gmra.mxu0 %v3028_v57  ;;  %v916_v13 = vadd.f32 %v2984_v19, %v887_v7  ;;  %v944_v15 = vpop.f32.mrf.mxu0  ;;  %v3057_v43 = vmax.f32 %v971_v32, 0.0  ;;  %1727 = vmatpush.msrb.mxu2 %v1581_v52  ;;  %v687_v19 = vadd.f32 %v2870_v58, %v658_v48  ;;  %v771_v51 = vadd.f32 %v2913_v54, %v742_v14  ;;  %v1510_v55 = vld [vmem:[#allocation8 + $0x368] sm:$0xff]  ;;  %v1553_v32 = vld [vmem:[#allocation8 + $0x4c0] sm:$0xff]  ;;  %v1459_v52 = vld [vmem:[#allocation8 + $0x1d0] sm:$0xff] }
 0x15e   :  { %1784 = vmatpush.msra.mxu0 %v1458_v28  ;;  %1710 = vmatpush.msrb.mxu1 %v1469_v29  ;;  %v890_v34 = vadd.f32 %v2998_v56, %v861_v63  ;;  %v1430_v36 = vld [vmem:[#allocation8 + $0xe8] sm:$0xff]  ;;  %v1569_v28 = vld [vmem:[#allocation8 + $0x540] sm:$0xff] }
 0x15f   :  { %v3055_v21 = vpop.f32.mrf.mxu3  ;;  %v945_v8 = vadd.f32 %v944_v15, %v916_v13  ;;  %1728 = vmatpush.msrb.mxu2 %v1577_v35  ;;  %v716_v11 = vadd.f32 %v2915_v33, %v687_v19  ;;  %v1506_v54 = vld [vmem:[#allocation8 + $0x348] sm:$0xff]  ;;  %v3065_v45 = vmax.f32 %v771_v51, 0.0  ;;  %v1549_v14 = vld [vmem:[#allocation8 + $0x4a0] sm:$0xff]  ;;  %v1455_v35 = vld [vmem:[#allocation8 + $0x1b0] sm:$0xff] }
 0x160   :  { %1785 = vmatpush.msra.mxu0 %v1454_v10  ;;  %1711 = vmatpush.msrb.mxu1 %v1465_v6  ;;  %v973_v4 = vpop.f32.mrf.mxu1  ;;  %v1426_v2 = vld [vmem:[#allocation8 + $0xc8] sm:$0xff]  ;;  %v919_v56 = vadd.f32 %v3007_v62, %v890_v34  ;;  %v1565_v6 = vld [vmem:[#allocation8 + $0x520] sm:$0xff]  ;;  %v1447_v34 = vld [vmem:[#allocation8 + $0x170] sm:$0xff] }
 0x161   :  { %1712 = vmatmul.f32.vlgmr.msrb.gmra.mxu1 %v3036_v42  ;;  %v974_v58 = vadd.f32 %v973_v4, %v945_v8  ;;  %1729 = vmatpush.msrb.mxu2 %v1573_v22  ;;  %v1502_v46 = vld [vmem:[#allocation8 + $0x328] sm:$0xff]  ;;  %v745_v33 = vadd.f32 %v2923_v49, %v716_v11  ;;  %v1541_v19 = vld [vmem:[#allocation8 + $0x460] sm:$0xff]  ;;  %v1527_v22 = vld [vmem:[#allocation8 + $0x3f0] sm:$0xff] }
 0x162   :  { %1786 = vmatpush.msra.mxu0 %v1450_v16  ;;  %1812 = vmatpush.msra.mxu1 %v1526_v61  ;;  %v1422_v29 = vld [vmem:[#allocation8 + $0xa8] sm:$0xff]  ;;  %v1537_v11 = vld [vmem:[#allocation8 + $0x440] sm:$0xff] }
 0x163   :  { %v3072_v0 = vmax.f32 %v974_v58, 0.0  ;;  %v1498_v5 = vld [vmem:[#allocation8 + $0x308] sm:$0xff]  ;;  %1730 = vmatpush.msrb.mxu2 %v1569_v28  ;;  %v774_v44 = vadd.f32 %v2926_v3, %v745_v33  ;;  %v1557_v3 = vld [vmem:[#allocation8 + $0x4e0] sm:$0xff]  ;;  %v1443_v58 = vld [vmem:[#allocation8 + $0x150] sm:$0xff] }
 0x164   :  { %1787 = vmatpush.msra.mxu0 %v1446_v37  ;;  %1813 = vmatpush.msra.mxu1 %v1522_v47  ;;  %v3067_v1 = vpop.f32.mrf.mxu2  ;;  %v1418_v49 = vld [vmem:[#allocation8 + $0x88] sm:$0xff]  ;;  %v1519_v28 = vld [vmem:[#allocation8 + $0x3b0] sm:$0xff] }
 0x165   :  { %1686 = vmatmul.f32.gmra.mxu0 %v3049_v12  ;;  %v1494_v62 = vld [vmem:[#allocation8 + $0x2e8] sm:$0xff]  ;;  %1731 = vmatpush.msrb.mxu2 %v1565_v6  ;;  %v3078_v7 = vmax.f32 %v774_v44, 0.0  ;;  %v1439_v33 = vld [vmem:[#allocation8 + $0x130] sm:$0xff] }
 0x166   :  { %1788 = vmatpush.msra.mxu0 %v1442_v60  ;;  %1814 = vmatpush.msra.mxu1 %v1518_v27  ;;  %v947_v10 = vpop.f32.mrf.mxu0  ;;  %v1414_v9 = vld [vmem:[#allocation8 + $0x68] sm:$0xff]  ;;  %v1463_v27 = vld [vmem:[#allocation8 + $0x1f0] sm:$0xff] }
 0x167   :  { %v3074_v40 = vpop.f32.mrf.mxu3  ;;  %v948_v26 = vadd.f32 %v947_v10, %v919_v56  ;;  %v1490_v38 = vld [vmem:[#allocation8 + $0x2c8] sm:$0xff]  ;;  %1732 = vmatpush.msrb.mxu2 %v1561_v18  ;;  %v1529_v56 = vld [vmem:[#allocation8 + $0x400] sm:$0xff]  ;;  %v1435_v6 = vld [vmem:[#allocation8 + $0x110] sm:$0xff] }
 0x168   :  { %1789 = vmatpush.msra.mxu0 %v1438_v39  ;;  %1815 = vmatpush.msra.mxu1 %v1514_v17  ;;  %v976_v53 = vpop.f32.mrf.mxu1  ;;  %v1410_v61 = vld [vmem:[#allocation8 + $0x48] sm:$0xff]  ;;  %v1545_v17 = vld [vmem:[#allocation8 + $0x480] sm:$0xff]  ;;  %v1431_v18 = vld [vmem:[#allocation8 + $0xf0] sm:$0xff] }
 0x169   :  { %1715 = vmatmul.f32.gmra.mxu1 %v3057_v43  ;;  %v977_v16 = vadd.f32 %v976_v53, %v948_v26  ;;  %v1486_v24 = vld [vmem:[#allocation8 + $0x2a8] sm:$0xff]  ;;  %1733 = vmatpush.msrb.mxu2 %v1557_v3  ;;  %v1511_v26 = vld [vmem:[#allocation8 + $0x370] sm:$0xff] }
 0x16a   :  { %1790 = vmatpush.msra.mxu0 %v1434_v30  ;;  %1816 = vmatpush.msra.mxu1 %v1510_v55  ;;  %v1406_v37 = vld [vmem:[#allocation8 + $0x28] sm:$0xff]  ;;  %v1451_v30 = vld [vmem:[#allocation8 + $0x190] sm:$0xff] }
 0x16b   :  { %v3083_v47 = vmax.f32 %v977_v16, 0.0  ;;  %v1482_v25 = vld [vmem:[#allocation8 + $0x288] sm:$0xff]  ;;  %1734 = vmatpush.msrb.mxu2 %v1553_v32  ;;  %v1507_v16 = vld [vmem:[#allocation8 + $0x350] sm:$0xff] }
 0x16c   :  { %1791 = vmatpush.msra.mxu0 %v1430_v36  ;;  %1817 = vmatpush.msra.mxu1 %v1506_v54  ;;  %v3080_v59 = vpop.f32.mrf.mxu2  ;;  %v1402_v60 = vld [vmem:[#allocation8 + $0x8] sm:$0xff]  ;;  %v1523_v36 = vld [vmem:[#allocation8 + $0x3d0] sm:$0xff]  ;;  %v1533_v54 = vld [vmem:[#allocation8 + $0x420] sm:$0xff] }
 0x16d   :  { %1689 = vmatmul.f32.gmra.mxu0 %v3065_v45  ;;  %v1478_v13 = vld [vmem:[#allocation8 + $0x268] sm:$0xff]  ;;  %1735 = vmatpush.msrb.mxu2 %v1549_v14  ;;  %v1503_v3 = vld [vmem:[#allocation8 + $0x330] sm:$0xff] }
 0x16e   :  { %1792 = vmatpush.msra.mxu0 %v1426_v2  ;;  %1818 = vmatpush.msra.mxu1 %v1502_v46  ;;  %v1474_v39 = vld [vmem:[#allocation8 + $0x248] sm:$0xff]  ;;  %v3103_v46 = vperm.slane %v2952_v41, 2  ;;  %v1423_v32 = vld [vmem:[#allocation8 + $0xb0] sm:$0xff] }
 0x16f   :  { %v3085_v48 = vpop.f32.mrf.mxu3  ;;  %v1470_v8 = vld [vmem:[#allocation8 + $0x228] sm:$0xff]  ;;  %1736 = vmatpush.msrb.mxu2 %v1545_v17  ;;  %v1419_v14 = vld [vmem:[#allocation8 + $0x90] sm:$0xff] }
 0x170   :  { %1793 = vmatpush.msra.mxu0 %v1422_v29  ;;  %1819 = vmatpush.msra.mxu1 %v1498_v5  ;;  %v1466_v63 = vld [vmem:[#allocation8 + $0x208] sm:$0xff]  ;;  %v1515_v29 = vld [vmem:[#allocation8 + $0x390] sm:$0xff]  ;;  %v1000_v17 = vadd.f32 %v3046_v50, %v3103_v46 }
 0x171   :  { %1718 = vmatmul.f32.gmra.mxu1 %v3072_v0  ;;  %1737 = vmatpush.msrb.mxu2 %v1541_v19  ;;  %v1590_v5 = vld [vmem:[#allocation8 + $0x5e8] sm:$0xff]  ;;  %v1641_v19 = vld [vmem:[#allocation8 + $0x780] sm:$0xff]  ;;  %v1487_v50 = vld [vmem:[#allocation8 + $0x2b0] sm:$0xff] }
 0x172   :  { %1794 = vmatpush.msra.mxu0 %v1418_v49  ;;  %1820 = vmatpush.msra.mxu1 %v1494_v62  ;;  %v1586_v49 = vld [vmem:[#allocation8 + $0x5c8] sm:$0xff]  ;;  %v997_v62 = vadd.f32 %v3022_v23, %v3103_v46 }
 0x173   :  { %1738 = vmatpush.msrb.mxu2 %v1537_v11  ;;  %v1570_v11 = vld [vmem:[#allocation8 + $0x548] sm:$0xff] }
 0x174   :  { %1795 = vmatpush.msra.mxu0 %v1414_v9  ;;  %1821 = vmatpush.msra.mxu1 %v1490_v38  ;;  %v1653_v9 = vld [vmem:[#allocation8 + $0x7e0] sm:$0xff]  ;;  %v1427_v38 = vld [vmem:[#allocation8 + $0xd0] sm:$0xff]  ;;  %v1026_v23 = vadd.f32 %v3031_v31, %v997_v62  ;;  %v1562_v62 = vld [vmem:[#allocation8 + $0x508] sm:$0xff] }
 0x175   :  { %1692 = vmatmul.f32.gmra.mxu0 %v3078_v7  ;;  %v3087_v20 = vpop.f32.mrf.mxu0  ;;  %v3090_v15 = vpop.f32.mrf.mxu1  ;;  %1739 = vmatpush.msrb.mxu2 %v1533_v54  ;;  %v1495_v31 = vld [vmem:[#allocation8 + $0x2f0] sm:$0xff] }
 0x176   :  { %1796 = vmatpush.msra.mxu0 %v1410_v61  ;;  %1822 = vmatpush.msra.mxu1 %v1486_v24  ;;  %v3093_v51 = vpop.f32.mrf.mxu2  ;;  %v1582_v61 = vld [vmem:[#allocation8 + $0x5a8] sm:$0xff]  ;;  %v1649_v24 = vld [vmem:[#allocation8 + $0x7c0] sm:$0xff]  ;;  %v1407_v54 = vld [vmem:[#allocation8 + $0x30] sm:$0xff] }
 0x177   :  { %1740 = vmatpush.msrb.mxu2 %v1529_v56  ;;  %1754 = vmatpush.msrb.mxu3 %v1653_v9  ;;  %v1633_v56 = vld [vmem:[#allocation8 + $0x740] sm:$0xff]  ;;  %v1475_v9 = vld [vmem:[#allocation8 + $0x250] sm:$0xff] }
 0x178   :  { %1797 = vmatpush.msra.mxu0 %v1406_v37  ;;  %1823 = vmatpush.msra.mxu1 %v1482_v25  ;;  %v1578_v25 = vld [vmem:[#allocation8 + $0x588] sm:$0xff] }
 0x179   :  { %1721 = vmatmul.f32.gmra.mxu1 %v3083_v47  ;;  %1841 = vmatpush.msra.mxu2 %v1590_v5  ;;  %v1403_v5 = vld [vmem:[#allocation8 + $0x10] sm:$0xff] }
 0x17a   :  { %1798 = vmatpush.msra.mxu0 %v1402_v60  ;;  %1824 = vmatpush.msra.mxu1 %v1478_v13  ;;  %v3097_v55 = vpop.f32.mrf.mxu3  ;;  %v1499_v60 = vld [vmem:[#allocation8 + $0x310] sm:$0xff]  ;;  %v1645_v13 = vld [vmem:[#allocation8 + $0x7a0] sm:$0xff] }
 0x17b   :  { %1842 = vmatpush.msra.mxu2 %v1586_v49  ;;  %1755 = vmatpush.msrb.mxu3 %v1649_v24 }
 0x17c   :  { %1899 = vmatpush.msrb.mxu0 %v1463_v27  ;;  %1825 = vmatpush.msra.mxu1 %v1474_v39  ;;  %v1055_v27 = vadd.f32 %v3087_v20, %v1026_v23 }
 0x17d   :  { %1799 = vmatmul.f32.vlgmr.msra.gmra.mxu0 %v3028_v57  ;;  %v3095_v4 = vpop.f32.mrf.mxu0  ;;  %1843 = vmatpush.msra.mxu2 %v1582_v61 }
 0x17e   :  { %1900 = vmatpush.msrb.mxu0 %v1459_v52  ;;  %1826 = vmatpush.msra.mxu1 %v1470_v8  ;;  %v3100_v2 = vpop.f32.mrf.mxu1  ;;  %v1574_v52 = vld [vmem:[#allocation8 + $0x568] sm:$0xff] }
 0x17f   :  { %1844 = vmatpush.msra.mxu2 %v1578_v25  ;;  %1756 = vmatpush.msrb.mxu3 %v1645_v13  ;;  %v1554_v25 = vld [vmem:[#allocation8 + $0x4c8] sm:$0xff]  ;;  %v1625_v13 = vld [vmem:[#allocation8 + $0x700] sm:$0xff] }
 0x180   :  { %1901 = vmatpush.msrb.mxu0 %v1455_v35  ;;  %1827 = vmatpush.msra.mxu1 %v1466_v63  ;;  %v3106_v10 = vpop.f32.mrf.mxu2  ;;  %v1415_v35 = vld [vmem:[#allocation8 + $0x70] sm:$0xff] }
 0x181   :  { %1828 = vmatmul.f32.vlgmr.msra.gmra.mxu1 %v3036_v42  ;;  %v1491_v63 = vld [vmem:[#allocation8 + $0x2d0] sm:$0xff]  ;;  %1845 = vmatpush.msra.mxu2 %v1574_v52  ;;  %v1006_v52 = vadd.f32 %v3080_v59, %v3103_v46  ;;  %v1546_v59 = vld [vmem:[#allocation8 + $0x488] sm:$0xff] }
 0x182   :  { %1902 = vmatpush.msrb.mxu0 %v1451_v30  ;;  %1928 = vmatpush.msrb.mxu1 %v1527_v22  ;;  %v1084_v30 = vadd.f32 %v3090_v15, %v1055_v27  ;;  %v1411_v22 = vld [vmem:[#allocation8 + $0x50] sm:$0xff] }
 0x183   :  { %1757 = vmatpush.msrb.mxu3 %v1641_v19  ;;  %v1483_v15 = vld [vmem:[#allocation8 + $0x290] sm:$0xff]  ;;  %1846 = vmatpush.msra.mxu2 %v1570_v11  ;;  %v1621_v19 = vld [vmem:[#allocation8 + $0x6e0] sm:$0xff] }
 0x184   :  { %1903 = vmatpush.msrb.mxu0 %v1447_v34  ;;  %1929 = vmatpush.msrb.mxu1 %v1523_v36  ;;  %v3112_v53 = vpop.f32.mrf.mxu3  ;;  %v1637_v34 = vld [vmem:[#allocation8 + $0x760] sm:$0xff]  ;;  %v1029_v36 = vadd.f32 %v3055_v21, %v1000_v17  ;;  %v1479_v21 = vld [vmem:[#allocation8 + $0x270] sm:$0xff] }
 0x185   :  { %1802 = vmatmul.f32.gmra.mxu0 %v3049_v12  ;;  %v3108_v44 = vpop.f32.mrf.mxu0  ;;  %1758 = vmatpush.msrb.mxu3 %v1637_v34  ;;  %v1035_v34 = vadd.f32 %v3085_v48, %v1006_v52  ;;  %v1436_v48 = vld [vmem:[#allocation8 + $0x118] sm:$0xff] }
 0x186   :  { %1904 = vmatpush.msrb.mxu0 %v1443_v58  ;;  %1930 = vmatpush.msrb.mxu1 %v1519_v28  ;;  %v1113_v58 = vadd.f32 %v3093_v51, %v1084_v30  ;;  %v1566_v28 = vld [vmem:[#allocation8 + $0x528] sm:$0xff]  ;;  %v1003_v51 = vadd.f32 %v3067_v1, %v3103_v46  ;;  %v1460_v1 = vld [vmem:[#allocation8 + $0x1d8] sm:$0xff] }
 0x187   :  { %v3116_v37 = vpop.f32.mrf.mxu1  ;;  %1847 = vmatpush.msra.mxu2 %v1566_v28  ;;  %1759 = vmatpush.msrb.mxu3 %v1633_v56  ;;  %v1524_v30 = vld [vmem:[#allocation8 + $0x3d8] sm:$0xff] }
 0x188   :  { %1905 = vmatpush.msrb.mxu0 %v1439_v33  ;;  %1931 = vmatpush.msrb.mxu1 %v1515_v29  ;;  %v3120_v39 = vpop.f32.mrf.mxu2  ;;  %v1058_v29 = vadd.f32 %v3095_v4, %v1029_v36  ;;  %v1032_v24 = vadd.f32 %v3074_v40, %v1003_v51  ;;  %v1452_v40 = vld [vmem:[#allocation8 + $0x198] sm:$0xff]  ;;  %v1613_v51 = vld [vmem:[#allocation8 + $0x6a0] sm:$0xff] }
 0x189   :  { %1831 = vmatmul.f32.gmra.mxu1 %v3057_v43  ;;  %1848 = vmatpush.msra.mxu2 %v1562_v62  ;;  %v1516_v28 = vld [vmem:[#allocation8 + $0x398] sm:$0xff] }
 0x18a   :  { %1906 = vmatpush.msrb.mxu0 %v1435_v6  ;;  %1932 = vmatpush.msrb.mxu1 %v1511_v26  ;;  %v1464_v6 = vld [vmem:[#allocation8 + $0x1f8] sm:$0xff]  ;;  %v1142_v26 = vadd.f32 %v3097_v55, %v1113_v58  ;;  %v1558_v55 = vld [vmem:[#allocation8 + $0x4e8] sm:$0xff]  ;;  %v1061_v27 = vadd.f32 %v3108_v44, %v1032_v24  ;;  %v1609_v24 = vld [vmem:[#allocation8 + $0x680] sm:$0xff] }
 0x18b   :  { %1849 = vmatpush.msra.mxu2 %v1558_v55  ;;  %v1508_v62 = vld [vmem:[#allocation8 + $0x358] sm:$0xff] }
 0x18c   :  { %1907 = vmatpush.msrb.mxu0 %v1431_v18  ;;  %1933 = vmatpush.msrb.mxu1 %v1507_v16  ;;  %v1629_v18 = vld [vmem:[#allocation8 + $0x720] sm:$0xff]  ;;  %v1087_v16 = vadd.f32 %v3100_v2, %v1058_v29  ;;  %v1456_v2 = vld [vmem:[#allocation8 + $0x1b8] sm:$0xff] }
 0x18d   :  { %1805 = vmatmul.f32.gmra.mxu0 %v3065_v45  ;;  %v3124_v8 = vpop.f32.mrf.mxu0  ;;  %v3127_v20 = vpop.f32.mrf.mxu3  ;;  %1760 = vmatpush.msrb.mxu3 %v1629_v18  ;;  %v1492_v52 = vld [vmem:[#allocation8 + $0x2d8] sm:$0xff] }
 0x18e   :  { %1908 = vmatpush.msrb.mxu0 %v1427_v38  ;;  %1934 = vmatpush.msrb.mxu1 %v1503_v3  ;;  %v1471_v3 = vld [vmem:[#allocation8 + $0x230] sm:$0xff]  ;;  %v1116_v23 = vadd.f32 %v3106_v10, %v1087_v16  ;;  %v1528_v10 = vld [vmem:[#allocation8 + $0x3f8] sm:$0xff]  ;;  %v1064_v56 = vadd.f32 %v3124_v8, %v1035_v34  ;;  %v1534_v16 = vld [vmem:[#allocation8 + $0x428] sm:$0xff] }
 0x18f   :  { %1850 = vmatpush.msra.mxu2 %v1554_v25  ;;  %1761 = vmatpush.msrb.mxu3 %v1625_v13  ;;  %v1605_v13 = vld [vmem:[#allocation8 + $0x660] sm:$0xff] }
 0x190   :  { %1909 = vmatpush.msrb.mxu0 %v1423_v32  ;;  %1935 = vmatpush.msrb.mxu1 %v1499_v60  ;;  %v3133_v33 = vpop.f32.mrf.mxu1  ;;  %v1467_v60 = vld [vmem:[#allocation8 + $0x210] sm:$0xff]  ;;  %v1145_v17 = vadd.f32 %v3112_v53, %v1116_v23  ;;  %v1520_v53 = vld [vmem:[#allocation8 + $0x3b8] sm:$0xff]  ;;  %v1530_v23 = vld [vmem:[#allocation8 + $0x408] sm:$0xff] }
 0x191   :  { %1834 = vmatmul.f32.gmra.mxu1 %v3072_v0  ;;  %v3139_v49 = vpop.f32.mrf.mxu2  ;;  %1762 = vmatpush.msrb.mxu3 %v1621_v19  ;;  %v1093_v18 = vadd.f32 %v3133_v33, %v1064_v56  ;;  %v1500_v33 = vld [vmem:[#allocation8 + $0x318] sm:$0xff] }
 0x192   :  { %1910 = vmatpush.msrb.mxu0 %v1419_v14  ;;  %1936 = vmatpush.msrb.mxu1 %v1495_v31  ;;  %v1550_v31 = vld [vmem:[#allocation8 + $0x4a8] sm:$0xff]  ;;  %v1412_v19 = vld [vmem:[#allocation8 + $0x58] sm:$0xff] }
 0x193   :  { %1851 = vmatpush.msra.mxu2 %v1550_v31 }
 0x194   :  { %1911 = vmatpush.msrb.mxu0 %v1415_v35  ;;  %1937 = vmatpush.msrb.mxu1 %v1491_v63  ;;  %v1448_v35 = vld [vmem:[#allocation8 + $0x178] sm:$0xff] }
 0x195   :  { %1808 = vmatmul.f32.gmra.mxu0 %v3078_v7  ;;  %v1170_v4 = vpop.f32.mrf.mxu0  ;;  %1852 = vmatpush.msra.mxu2 %v1546_v59  ;;  %v1484_v59 = vld [vmem:[#allocation8 + $0x298] sm:$0xff] }
 0x196   :  { %1912 = vmatpush.msrb.mxu0 %v1411_v22  ;;  %1938 = vmatpush.msrb.mxu1 %v1487_v50  ;;  %v3143_v38 = vpop.f32.mrf.mxu3  ;;  %v1171_v61 = vadd.f32 %v1170_v4, %v1142_v26  ;;  %v1090_v22 = vadd.f32 %v3116_v37, %v1061_v27  ;;  %v1444_v50 = vld [vmem:[#allocation8 + $0x158] sm:$0xff] }
 0x197   :  { %v1440_v37 = vld [vmem:[#allocation8 + $0x138] sm:$0xff] }
 0x198   :  { %1913 = vmatpush.msrb.mxu0 %v1407_v54  ;;  %1939 = vmatpush.msrb.mxu1 %v1483_v15  ;;  %v3147_v32 = vmax.f32 %v1171_v61, 0.0  ;;  %v1119_v36 = vadd.f32 %v3120_v39, %v1090_v22  ;;  %v1542_v54 = vld [vmem:[#allocation8 + $0x468] sm:$0xff]  ;;  %v1617_v15 = vld [vmem:[#allocation8 + $0x6c0] sm:$0xff]  ;;  %v1512_v39 = vld [vmem:[#allocation8 + $0x378] sm:$0xff] }
 0x199   :  { %1837 = vmatmul.f32.gmra.mxu1 %v3083_v47  ;;  %1853 = vmatpush.msra.mxu2 %v1542_v54  ;;  %v1583_v54 = vld [vmem:[#allocation8 + $0x5b0] sm:$0xff] }
 0x19a   :  { %1914 = vmatpush.msrb.mxu0 %v1403_v5  ;;  %1940 = vmatpush.msrb.mxu1 %v1479_v21  ;;  %v3151_v14 = vpop.f32.mrf.mxu1  ;;  %v1538_v5 = vld [vmem:[#allocation8 + $0x448] sm:$0xff]  ;;  %v1148_v21 = vadd.f32 %v3127_v20, %v1119_v36  ;;  %v1504_v20 = vld [vmem:[#allocation8 + $0x338] sm:$0xff] }
 0x19b   :  { %1741 = vmatmul.f32.vlgmr.msrb.gmra.mxu2 %v3147_v32  ;;  %1763 = vmatpush.msrb.mxu3 %v1617_v15  ;;  %v1404_v36 = vld [vmem:[#allocation8 + $0x18] sm:$0xff] }
 0x19c   :  { %2015 = vmatpush.msra.mxu0 %v1464_v6  ;;  %1941 = vmatpush.msrb.mxu1 %v1475_v9  ;;  %v1432_v6 = vld [vmem:[#allocation8 + $0xf8] sm:$0xff] }
 0x19d   :  { %1915 = vmatmul.f32.vlgmr.msrb.gmra.mxu0 %v3028_v57  ;;  %v3157_v44 = vpop.f32.mrf.mxu2  ;;  %v1173_v63 = vpop.f32.mrf.mxu0  ;;  %v1428_v9 = vld [vmem:[#allocation8 + $0xd8] sm:$0xff]  ;;  %1854 = vmatpush.msra.mxu2 %v1538_v5  ;;  %v1579_v5 = vld [vmem:[#allocation8 + $0x590] sm:$0xff] }
 0x19e   :  { %2016 = vmatpush.msra.mxu0 %v1460_v1  ;;  %1942 = vmatpush.msrb.mxu1 %v1471_v3  ;;  %v1174_v11 = vadd.f32 %v1173_v63, %v1145_v17  ;;  %v1122_v1 = vadd.f32 %v3139_v49, %v1093_v18  ;;  %v1424_v3 = vld [vmem:[#allocation8 + $0xb8] sm:$0xff]  ;;  %v1601_v63 = vld [vmem:[#allocation8 + $0x640] sm:$0xff]  ;;  %v1650_v18 = vld [vmem:[#allocation8 + $0x7c8] sm:$0xff] }
 0x19f   :  { %v3161_v46 = vpop.f32.mrf.mxu3  ;;  %1764 = vmatpush.msrb.mxu3 %v1613_v51  ;;  %1855 = vmatpush.msra.mxu2 %v1534_v16  ;;  %v1420_v49 = vld [vmem:[#allocation8 + $0x98] sm:$0xff]  ;;  %v1646_v16 = vld [vmem:[#allocation8 + $0x7a8] sm:$0xff] }
 0x1a0   :  { %2017 = vmatpush.msra.mxu0 %v1456_v2  ;;  %1943 = vmatpush.msrb.mxu1 %v1467_v60  ;;  %v3165_v58 = vmax.f32 %v1174_v11, 0.0  ;;  %v3184_v2 = vperm.slane %v2952_v41, 3  ;;  %v1496_v60 = vld [vmem:[#allocation8 + $0x2f8] sm:$0xff]  ;;  %v1151_v27 = vadd.f32 %v3143_v38, %v1122_v1  ;;  %v1567_v1 = vld [vmem:[#allocation8 + $0x530] sm:$0xff] }
 0x1a1   :  { %1944 = vmatmul.f32.vlgmr.msrb.gmra.mxu1 %v3036_v42  ;;  %1765 = vmatpush.msrb.mxu3 %v1609_v24  ;;  %v1408_v11 = vld [vmem:[#allocation8 + $0x38] sm:$0xff]  ;;  %v1642_v24 = vld [vmem:[#allocation8 + $0x788] sm:$0xff] }
 0x1a2   :  { %2018 = vmatpush.msra.mxu0 %v1452_v40  ;;  %2044 = vmatpush.msra.mxu1 %v1528_v10  ;;  %v3169_v29 = vpop.f32.mrf.mxu1  ;;  %v1416_v40 = vld [vmem:[#allocation8 + $0x78] sm:$0xff]  ;;  %v1591_v10 = vld [vmem:[#allocation8 + $0x5f0] sm:$0xff]  ;;  %v1200_v17 = vadd.f32 %v3151_v14, %v3184_v2  ;;  %v1597_v14 = vld [vmem:[#allocation8 + $0x620] sm:$0xff] }
 0x1a3   :  { %1744 = vmatmul.f32.gmra.mxu2 %v3165_v58  ;;  %1766 = vmatpush.msrb.mxu3 %v1605_v13  ;;  %v1472_v51 = vld [vmem:[#allocation8 + $0x238] sm:$0xff]  ;;  %v1638_v13 = vld [vmem:[#allocation8 + $0x768] sm:$0xff] }
 0x1a4   :  { %2019 = vmatpush.msra.mxu0 %v1448_v35  ;;  %2045 = vmatpush.msra.mxu1 %v1524_v30  ;;  %v1488_v30 = vld [vmem:[#allocation8 + $0x2b8] sm:$0xff] }
 0x1a5   :  { %1918 = vmatmul.f32.gmra.mxu0 %v3049_v12  ;;  %v3173_v26 = vpop.f32.mrf.mxu2  ;;  %v1176_v8 = vpop.f32.mrf.mxu0  ;;  %1856 = vmatpush.msra.mxu2 %v1530_v23 }
 0x1a6   :  { %2020 = vmatpush.msra.mxu0 %v1444_v50  ;;  %2046 = vmatpush.msra.mxu1 %v1520_v53  ;;  %v1177_v4 = vadd.f32 %v1176_v8, %v1148_v21  ;;  %v1587_v50 = vld [vmem:[#allocation8 + $0x5d0] sm:$0xff]  ;;  %v1229_v53 = vadd.f32 %v3157_v44, %v1200_v17  ;;  %v1476_v44 = vld [vmem:[#allocation8 + $0x258] sm:$0xff]  ;;  %v1654_v21 = vld [vmem:[#allocation8 + $0x7e8] sm:$0xff] }
 0x1a7   :  { %v3177_v61 = vpop.f32.mrf.mxu3  ;;  %1957 = vmatpush.msrb.mxu2 %v1591_v10  ;;  %1767 = vmatpush.msrb.mxu3 %v1601_v63  ;;  %v1551_v63 = vld [vmem:[#allocation8 + $0x4b0] sm:$0xff] }
 0x1a8   :  { %2021 = vmatpush.msra.mxu0 %v1440_v37  ;;  %2047 = vmatpush.msra.mxu1 %v1516_v28  ;;  %v3180_v55 = vmax.f32 %v1177_v4, 0.0  ;;  %v1480_v37 = vld [vmem:[#allocation8 + $0x278] sm:$0xff]  ;;  %v1593_v28 = vld [vmem:[#allocation8 + $0x600] sm:$0xff] }
 0x1a9   :  { %1947 = vmatmul.f32.gmra.mxu1 %v3057_v43  ;;  %1958 = vmatpush.msrb.mxu2 %v1587_v50  ;;  %v1468_v4 = vld [vmem:[#allocation8 + $0x218] sm:$0xff]  ;;  %v1626_v50 = vld [vmem:[#allocation8 + $0x708] sm:$0xff] }
 0x1aa   :  { %2022 = vmatpush.msra.mxu0 %v1436_v48  ;;  %2048 = vmatpush.msra.mxu1 %v1512_v39  ;;  %v3186_v25 = vpop.f32.mrf.mxu1  ;;  %v1258_v48 = vadd.f32 %v3161_v46, %v1229_v53  ;;  %v1203_v39 = vadd.f32 %v3169_v29, %v3184_v2 }
 0x1ab   :  { %1747 = vmatmul.f32.gmra.mxu2 %v3180_v55  ;;  %1768 = vmatpush.msrb.mxu3 %v1597_v14 }
 0x1ac   :  { %2023 = vmatpush.msra.mxu0 %v1432_v6  ;;  %2049 = vmatpush.msra.mxu1 %v1508_v62  ;;  %v1575_v62 = vld [vmem:[#allocation8 + $0x570] sm:$0xff]  ;;  %v1232_v46 = vadd.f32 %v3173_v26, %v1203_v39  ;;  %v1206_v26 = vadd.f32 %v3186_v25, %v3184_v2  ;;  %v1634_v25 = vld [vmem:[#allocation8 + $0x748] sm:$0xff] }
 0x1ad   :  { %1921 = vmatmul.f32.gmra.mxu0 %v3065_v45  ;;  %1959 = vmatpush.msrb.mxu2 %v1583_v54 }
 0x1ae   :  { %2024 = vmatpush.msra.mxu0 %v1428_v9  ;;  %2050 = vmatpush.msra.mxu1 %v1504_v20  ;;  %v3190_v31 = vpop.f32.mrf.mxu2  ;;  %v1571_v9 = vld [vmem:[#allocation8 + $0x550] sm:$0xff] }
 0x1af   :  { %1769 = vmatpush.msrb.mxu3 %v1593_v28  ;;  %1960 = vmatpush.msrb.mxu2 %v1579_v5  ;;  %v1235_v10 = vadd.f32 %v3190_v31, %v1206_v26  ;;  %v1535_v5 = vld [vmem:[#allocation8 + $0x430] sm:$0xff]  ;;  %v1580_v26 = vld [vmem:[#allocation8 + $0x598] sm:$0xff] }
 0x1b0   :  { %2025 = vmatpush.msra.mxu0 %v1424_v3  ;;  %2051 = vmatpush.msra.mxu1 %v1500_v33  ;;  %v3195_v38 = vpop.f32.mrf.mxu3  ;;  %v1261_v33 = vadd.f32 %v3177_v61, %v1232_v46 }
 0x1b1   :  { %1950 = vmatmul.f32.gmra.mxu1 %v3072_v0  ;;  %v1179_v41 = vpop.f32.mrf.mxu0  ;;  %1870 = vmatpush.msra.mxu3 %v1654_v21  ;;  %v1264_v31 = vadd.f32 %v3195_v38, %v1235_v10  ;;  %v1564_v10 = vld [vmem:[#allocation8 + $0x518] sm:$0xff] }
 0x1b2   :  { %2026 = vmatpush.msra.mxu0 %v1420_v49  ;;  %v1180_v35 = vadd.f32 %v1179_v41, %v1151_v27  ;;  %2052 = vmatpush.msra.mxu1 %v1496_v60  ;;  %v1563_v49 = vld [vmem:[#allocation8 + $0x510] sm:$0xff] }
 0x1b3   :  { %v3201_v34 = vpop.f32.mrf.mxu1  ;;  %1961 = vmatpush.msrb.mxu2 %v1575_v62  ;;  %1871 = vmatpush.msra.mxu3 %v1650_v18  ;;  %v1531_v18 = vld [vmem:[#allocation8 + $0x410] sm:$0xff] }
 0x1b4   :  { %2027 = vmatpush.msra.mxu0 %v1416_v40  ;;  %v3197_v22 = vmax.f32 %v1180_v35, 0.0  ;;  %2053 = vmatpush.msra.mxu1 %v1492_v52  ;;  %v1555_v52 = vld [vmem:[#allocation8 + $0x4d0] sm:$0xff]  ;;  %v1630_v35 = vld [vmem:[#allocation8 + $0x728] sm:$0xff] }
 0x1b5   :  { %1924 = vmatmul.f32.gmra.mxu0 %v3078_v7  ;;  %1962 = vmatpush.msrb.mxu2 %v1571_v9 }
 0x1b6   :  { %2028 = vmatpush.msra.mxu0 %v1412_v19  ;;  %2054 = vmatpush.msra.mxu1 %v1488_v30  ;;  %v3204_v15 = vpop.f32.mrf.mxu2  ;;  %v1209_v30 = vadd.f32 %v3201_v34, %v3184_v2  ;;  %v1543_v2 = vld [vmem:[#allocation8 + $0x470] sm:$0xff]  ;;  %v1618_v34 = vld [vmem:[#allocation8 + $0x6c8] sm:$0xff] }
 0x1b7   :  { %1750 = vmatmul.f32.gmra.mxu2 %v3197_v22  ;;  %1872 = vmatpush.msra.mxu3 %v1646_v16  ;;  %v1602_v16 = vld [vmem:[#allocation8 + $0x648] sm:$0xff] }
 0x1b8   :  { %2029 = vmatpush.msra.mxu0 %v1408_v11  ;;  %2055 = vmatpush.msra.mxu1 %v1484_v59  ;;  %v3210_v6 = vpop.f32.mrf.mxu3 }
 0x1b9   :  { %1953 = vmatmul.f32.gmra.mxu1 %v3083_v47  ;;  %1963 = vmatpush.msrb.mxu2 %v1567_v1 }
 0x1ba   :  { %v1286_v56 = vpop.f32.mrf.mxu0  ;;  %2030 = vmatpush.msra.mxu0 %v1404_v36  ;;  %2056 = vmatpush.msra.mxu1 %v1480_v37  ;;  %v1547_v36 = vld [vmem:[#allocation8 + $0x490] sm:$0xff]  ;;  %v1238_v37 = vadd.f32 %v3204_v15, %v1209_v30  ;;  %v1544_v30 = vld [vmem:[#allocation8 + $0x478] sm:$0xff] }
 0x1bb   :  { %v1287_v8 = vadd.f32 %v1286_v56, %v1258_v48  ;;  %1873 = vmatpush.msra.mxu3 %v1642_v24  ;;  %1964 = vmatpush.msrb.mxu2 %v1563_v49  ;;  %v1539_v56 = vld [vmem:[#allocation8 + $0x450] sm:$0xff]  ;;  %v1614_v48 = vld [vmem:[#allocation8 + $0x6a8] sm:$0xff] }
 0x1bc   :  { %2057 = vmatpush.msra.mxu1 %v1476_v44  ;;  %v1267_v15 = vadd.f32 %v3210_v6, %v1238_v37  ;;  %v1606_v6 = vld [vmem:[#allocation8 + $0x668] sm:$0xff]  ;;  %v1655_v49 = vld [vmem:[#allocation8 + $0x7f0] sm:$0xff] }
 0x1bd   :  { %2031 = vmatmul.f32.vlgmr.msra.gmra.mxu0 %v3028_v57  ;;  %1874 = vmatpush.msra.mxu3 %v1638_v13  ;;  %v1572_v13 = vld [vmem:[#allocation8 + $0x558] sm:$0xff]  ;;  %v1603_v37 = vld [vmem:[#allocation8 + $0x650] sm:$0xff] }
 0x1be   :  { %v1315_v29 = vpop.f32.mrf.mxu1  ;;  %2058 = vmatpush.msra.mxu1 %v1472_v51  ;;  %v1610_v51 = vld [vmem:[#allocation8 + $0x688] sm:$0xff] }
 0x1bf   :  { %1857 = vmatmul.f32.vlgmr.msra.gmra.mxu2 %v3147_v32  ;;  %v1316_v20 = vadd.f32 %v1315_v29, %v1287_v8  ;;  %1875 = vmatpush.msra.mxu3 %v1634_v25  ;;  %v1588_v29 = vld [vmem:[#allocation8 + $0x5d8] sm:$0xff] }
 0x1c0   :  { %2059 = vmatpush.msra.mxu1 %v1468_v4  ;;  %v1592_v4 = vld [vmem:[#allocation8 + $0x5f8] sm:$0xff] }
 0x1c1   :  { %2060 = vmatmul.f32.vlgmr.msra.gmra.mxu1 %v3036_v42  ;;  %v1559_v42 = vld [vmem:[#allocation8 + $0x4f0] sm:$0xff]  ;;  %1876 = vmatpush.msra.mxu3 %v1630_v35  ;;  %v1560_v25 = vld [vmem:[#allocation8 + $0x4f8] sm:$0xff] }
 0x1c2   :  { %v1344_v3 = vpop.f32.mrf.mxu2  ;;  %v1289_v57 = vpop.f32.mrf.mxu0  ;;  %1965 = vmatpush.msrb.mxu2 %v1559_v42  ;;  %v1643_v42 = vld [vmem:[#allocation8 + $0x790] sm:$0xff] }
 0x1c3   :  { %v1345_v23 = vadd.f32 %v1344_v3, %v1316_v20  ;;  %v1373_v60 = vpop.f32.mrf.mxu3  ;;  %v1290_v27 = vadd.f32 %v1289_v57, %v1261_v33  ;;  %1877 = vmatpush.msra.mxu3 %v1626_v50  ;;  %v1598_v3 = vld [vmem:[#allocation8 + $0x628] sm:$0xff]  ;;  %v1631_v35 = vld [vmem:[#allocation8 + $0x730] sm:$0xff]  ;;  %v1540_v50 = vld [vmem:[#allocation8 + $0x458] sm:$0xff] }
 0x1c4   :  { %1966 = vmatpush.msrb.mxu2 %v1555_v52  ;;  %v1594_v33 = vld [vmem:[#allocation8 + $0x608] sm:$0xff]  ;;  %v1635_v52 = vld [vmem:[#allocation8 + $0x750] sm:$0xff] }
 0x1c5   :  { %v1374_v40 = vadd.f32 %v1373_v60, %v1345_v23  ;;  %2034 = vmatmul.f32.gmra.mxu0 %v3049_v12  ;;  %v1576_v60 = vld [vmem:[#allocation8 + $0x578] sm:$0xff] }
 0x1c6   :  { %v1318_v61 = vpop.f32.mrf.mxu1  ;;  %1967 = vmatpush.msrb.mxu2 %v1551_v63  ;;  %v1548_v63 = vld [vmem:[#allocation8 + $0x498] sm:$0xff] }
 0x1c7   :  { %v3221_v41 = vmax.f32 %v1374_v40, 0.0  ;;  %1860 = vmatmul.f32.gmra.mxu2 %v3165_v58  ;;  %v1319_v17 = vadd.f32 %v1318_v61, %v1290_v27  ;;  %v1647_v27 = vld [vmem:[#allocation8 + $0x7b0] sm:$0xff]  ;;  %v1568_v40 = vld [vmem:[#allocation8 + $0x538] sm:$0xff] }
 0x1c8   :  { %1968 = vmatpush.msrb.mxu2 %v1547_v36  ;;  %v1639_v61 = vld [vmem:[#allocation8 + $0x770] sm:$0xff]  ;;  %v1532_v36 = vld [vmem:[#allocation8 + $0x418] sm:$0xff] }
 0x1c9   :  { %1770 = vmatmul.f32.vlgmr.msrb.gmra.mxu3 %v3221_v41  ;;  %2063 = vmatmul.f32.gmra.mxu1 %v3057_v43  ;;  %v1622_v43 = vld [vmem:[#allocation8 + $0x6e8] sm:$0xff] }
 0x1ca   :  { %v1347_v19 = vpop.f32.mrf.mxu2  ;;  %v1292_v12 = vpop.f32.mrf.mxu0  ;;  %1878 = vmatpush.msra.mxu3 %v1622_v43  ;;  %1969 = vmatpush.msrb.mxu2 %v1543_v2  ;;  %v1607_v43 = vld [vmem:[#allocation8 + $0x670] sm:$0xff] }
 0x1cb   :  { %v1348_v11 = vadd.f32 %v1347_v19, %v1319_v17  ;;  %v1376_v59 = vpop.f32.mrf.mxu3  ;;  %v1293_v14 = vadd.f32 %v1292_v12, %v1264_v31  ;;  %v1556_v17 = vld [vmem:[#allocation8 + $0x4d8] sm:$0xff]  ;;  %v1627_v12 = vld [vmem:[#allocation8 + $0x710] sm:$0xff] }
 0x1cc   :  { %1879 = vmatpush.msra.mxu3 %v1618_v34  ;;  %1970 = vmatpush.msrb.mxu2 %v1539_v56  ;;  %v1552_v19 = vld [vmem:[#allocation8 + $0x4b8] sm:$0xff]  ;;  %v1623_v31 = vld [vmem:[#allocation8 + $0x6f0] sm:$0xff] }
 0x1cd   :  { %v1377_v53 = vadd.f32 %v1376_v59, %v1348_v11  ;;  %2037 = vmatmul.f32.gmra.mxu0 %v3065_v45  ;;  %v1619_v11 = vld [vmem:[#allocation8 + $0x6d0] sm:$0xff]  ;;  %v1656_v34 = vld [vmem:[#allocation8 + $0x7f8] sm:$0xff] }
 0x1ce   :  { %v1321_v38 = vpop.f32.mrf.mxu1  ;;  %1880 = vmatpush.msra.mxu3 %v1614_v48  ;;  %1971 = vmatpush.msrb.mxu2 %v1535_v5  ;;  %v1615_v59 = vld [vmem:[#allocation8 + $0x6b0] sm:$0xff]  ;;  %v1648_v56 = vld [vmem:[#allocation8 + $0x7b8] sm:$0xff] }
 0x1cf   :  { %v3231_v54 = vmax.f32 %v1377_v53, 0.0  ;;  %1863 = vmatmul.f32.gmra.mxu2 %v3180_v55  ;;  %v1322_v28 = vadd.f32 %v1321_v38, %v1293_v14  ;;  %v1536_v14 = vld [vmem:[#allocation8 + $0x438] sm:$0xff]  ;;  %v1611_v53 = vld [vmem:[#allocation8 + $0x690] sm:$0xff] }
 0x1d0   :  { %1881 = vmatpush.msra.mxu3 %v1610_v51  ;;  %1972 = vmatpush.msrb.mxu2 %v1531_v18  ;;  %v1599_v38 = vld [vmem:[#allocation8 + $0x630] sm:$0xff]  ;;  %v1636_v48 = vld [vmem:[#allocation8 + $0x758] sm:$0xff] }
 0x1d1   :  { %1773 = vmatmul.f32.gmra.mxu3 %v3231_v54  ;;  %2066 = vmatmul.f32.gmra.mxu1 %v3072_v0  ;;  %v1595_v2 = vld [vmem:[#allocation8 + $0x610] sm:$0xff]  ;;  %v1620_v5 = vld [vmem:[#allocation8 + $0x6d8] sm:$0xff] }
 0x1d2   :  { %v1350_v45 = vpop.f32.mrf.mxu2  ;;  %v1295_v44 = vpop.f32.mrf.mxu0  ;;  %2073 = vmatpush.msra.mxu2 %v1592_v4  ;;  %1882 = vmatpush.msra.mxu3 %v1606_v6  ;;  %v2161_v51 = vld [vmem:[#allocation11 + $0x70] sm:$0xff] }
 0x1d3   :  { %v1351_v39 = vadd.f32 %v1350_v45, %v1322_v28  ;;  %v1379_v21 = vpop.f32.mrf.mxu3  ;;  %v1296_v8 = vadd.f32 %v1295_v44, %v1267_v15  ;;  %v1652_v28 = vld [vmem:[#allocation8 + $0x7d8] sm:$0xff] }
 0x1d4   :  { %2074 = vmatpush.msra.mxu2 %v1588_v29  ;;  %1883 = vmatpush.msra.mxu3 %v1602_v16  ;;  %v1644_v45 = vld [vmem:[#allocation8 + $0x798] sm:$0xff] }
 0x1d5   :  { %v1380_v62 = vadd.f32 %v1379_v21, %v1351_v39  ;;  %2040 = vmatmul.f32.gmra.mxu0 %v3078_v7  ;;  %v1584_v7 = vld [vmem:[#allocation8 + $0x5b8] sm:$0xff] }
 0x1d6   :  { %v1324_v46 = vpop.f32.mrf.mxu1  ;;  %2075 = vmatpush.msra.mxu2 %v1584_v7  ;;  %1884 = vmatpush.msra.mxu3 %v1598_v3  ;;  %v1640_v44 = vld [vmem:[#allocation8 + $0x778] sm:$0xff] }
 0x1d7   :  { %v3238_v0 = vmax.f32 %v1380_v62, 0.0  ;;  %1866 = vmatmul.f32.gmra.mxu2 %v3197_v22  ;;  %v1325_v9 = vadd.f32 %v1324_v46, %v1296_v8  ;;  %v1632_v15 = vld [vmem:[#allocation8 + $0x738] sm:$0xff]  ;;  %v2160_v8 = vld [vmem:[#allocation11 + $0x68] sm:$0xff] }
 0x1d8   :  { %1885 = vmatpush.msra.mxu3 %v1594_v33  ;;  %2076 = vmatpush.msra.mxu2 %v1580_v26  ;;  %v1624_v39 = vld [vmem:[#allocation8 + $0x6f8] sm:$0xff] }
 0x1d9   :  { %1776 = vmatmul.f32.gmra.mxu3 %v3238_v0  ;;  %2069 = vmatmul.f32.gmra.mxu1 %v3083_v47  ;;  %v1651_v47 = vld [vmem:[#allocation8 + $0x7d0] sm:$0xff]  ;;  %v2162_v21 = vld [vmem:[#allocation11 + $0x78] sm:$0xff] }
 0x1da   :  { %v1353_v20 = vpop.f32.mrf.mxu2  ;;  %1986 = vmatpush.msrb.mxu3 %v1655_v49  ;;  %2077 = vmatpush.msra.mxu2 %v1576_v60  ;;  %v1612_v62 = vld [vmem:[#allocation8 + $0x698] sm:$0xff]  ;;  %v1684_v3 = vpop.f32.mrf.mxu0  ;;  %v2148_v60 = vld [vmem:[#allocation11 + $0x8] sm:$0xff] }
 0x1db   :  { %v1354_v1 = vadd.f32 %v1353_v20, %v1325_v9  ;;  %v1382_v57 = vpop.f32.mrf.mxu3  ;;  %2215 = vmatpush.msrb.mxu0 %v2162_v21  ;;  %v1608_v18 = vld [vmem:[#allocation8 + $0x678] sm:$0xff]  ;;  %v2156_v9 = vld [vmem:[#allocation11 + $0x48] sm:$0xff] }
 0x1dc   :  { %1987 = vmatpush.msrb.mxu3 %v1651_v47  ;;  %2078 = vmatpush.msra.mxu2 %v1572_v13  ;;  %v1604_v4 = vld [vmem:[#allocation8 + $0x658] sm:$0xff]  ;;  %v2147_v13 = vld [vmem:[#allocation11] sm:$0xff] }
 0x1dd   :  { %v1383_v24 = vadd.f32 %v1382_v57, %v1354_v1  ;;  %2216 = vmatpush.msrb.mxu0 %v2161_v51  ;;  %v2158_v46 = vld [vmem:[#allocation11 + $0x58] sm:$0xff]  ;;  %v2157_v29 = vld [vmem:[#allocation11 + $0x50] sm:$0xff]  ;;  %v2152_v1 = vld [vmem:[#allocation11 + $0x28] sm:$0xff] }
 0x1de   :  { %1988 = vmatpush.msrb.mxu3 %v1647_v27  ;;  %2079 = vmatpush.msra.mxu2 %v1568_v40  ;;  %v1600_v6 = vld [vmem:[#allocation8 + $0x638] sm:$0xff]  ;;  %v1713_v57 = vpop.f32.mrf.mxu1 }
 0x1df   :  { %v3243_v23 = vmax.f32 %v1383_v24, 0.0  ;;  %1973 = vmatmul.f32.vlgmr.msrb.gmra.mxu2 %v3147_v32  ;;  %2217 = vmatpush.msrb.mxu0 %v2160_v8  ;;  %v1596_v16 = vld [vmem:[#allocation8 + $0x618] sm:$0xff]  ;;  %v2151_v24 = vld [vmem:[#allocation11 + $0x20] sm:$0xff] }
 0x1e0   :  { %1989 = vmatpush.msrb.mxu3 %v1643_v42  ;;  %2080 = vmatpush.msra.mxu2 %v1564_v10  ;;  %v2154_v20 = vld [vmem:[#allocation11 + $0x38] sm:$0xff]  ;;  %v2153_v7 = vld [vmem:[#allocation11 + $0x30] sm:$0xff] }
 0x1e1   :  { %1779 = vmatmul.f32.gmra.mxu3 %v3243_v23  ;;  %v2150_v33 = vld [vmem:[#allocation11 + $0x18] sm:$0xff]  ;;  %v2149_v49 = vld [vmem:[#allocation11 + $0x10] sm:$0xff] }
 0x1e2   :  { %1990 = vmatpush.msrb.mxu3 %v1639_v61  ;;  %2081 = vmatpush.msra.mxu2 %v1560_v25  ;;  %v1687_v47 = vpop.f32.mrf.mxu0  ;;  %v2178_v27 = vld [vmem:[#allocation11 + $0xf8] sm:$0xff]  ;;  %v2177_v10 = vld [vmem:[#allocation11 + $0xf0] sm:$0xff]  ;;  %v2176_v61 = vld [vmem:[#allocation11 + $0xe8] sm:$0xff] }
 0x1e3   :  { %2244 = vmatpush.msrb.mxu1 %v2178_v27  ;;  %v2174_v25 = vld [vmem:[#allocation11 + $0xd8] sm:$0xff]  ;;  %v2193_v51 = vld [vmem:[#allocation11 + $0x170] sm:$0xff] }
 0x1e4   :  { %1991 = vmatpush.msrb.mxu3 %v1635_v52  ;;  %2082 = vmatpush.msra.mxu2 %v1556_v17 }
 0x1e5   :  { %2245 = vmatpush.msrb.mxu1 %v2177_v10 }
 0x1e6   :  { %1992 = vmatpush.msrb.mxu3 %v1631_v35  ;;  %2083 = vmatpush.msra.mxu2 %v1552_v19  ;;  %v1716_v40 = vpop.f32.mrf.mxu1  ;;  %v2173_v35 = vld [vmem:[#allocation11 + $0xd0] sm:$0xff]  ;;  %v2172_v19 = vld [vmem:[#allocation11 + $0xc8] sm:$0xff] }
 0x1e7   :  { %1976 = vmatmul.f32.gmra.mxu2 %v3165_v58  ;;  %2246 = vmatpush.msrb.mxu1 %v2176_v61 }
 0x1e8   :  { %1993 = vmatpush.msrb.mxu3 %v1627_v12  ;;  %2084 = vmatpush.msra.mxu2 %v1548_v63  ;;  %v2171_v12 = vld [vmem:[#allocation11 + $0xc0] sm:$0xff]  ;;  %v3265_v63 = vld [vmem:[#allocation10] sm:$0xf] }
 0x1e9   :  { %1886 = vmatmul.f32.vlgmr.msra.gmra.mxu3 %v3221_v41 }
 0x1ea   :  { %1994 = vmatpush.msrb.mxu3 %v1623_v31  ;;  %2085 = vmatpush.msra.mxu2 %v1544_v30  ;;  %v1690_v52 = vpop.f32.mrf.mxu0  ;;  %v2170_v31 = vld [vmem:[#allocation11 + $0xb8] sm:$0xff]  ;;  %v1659_v30 = vperm.slane %v3265_v63, 0 }
 0x1ec   :  { %1995 = vmatpush.msrb.mxu3 %v1619_v11  ;;  %2086 = vmatpush.msra.mxu2 %v1540_v50  ;;  %v2169_v11 = vld [vmem:[#allocation11 + $0xb0] sm:$0xff] }
 0x1ee   :  { %1996 = vmatpush.msrb.mxu3 %v1615_v59  ;;  %2087 = vmatpush.msra.mxu2 %v1536_v14  ;;  %v1719_v17 = vpop.f32.mrf.mxu1  ;;  %v2168_v59 = vld [vmem:[#allocation11 + $0xa8] sm:$0xff]  ;;  %v1685_v14 = vadd.f32 %v1684_v3, %v1659_v30 }
 0x1ef   :  { %1979 = vmatmul.f32.gmra.mxu2 %v3180_v55  ;;  %v2188_v3 = vld [vmem:[#allocation11 + $0x148] sm:$0xff] }
 0x1f0   :  { %1997 = vmatpush.msrb.mxu3 %v1611_v53  ;;  %2088 = vmatpush.msra.mxu2 %v1532_v36  ;;  %v2167_v53 = vld [vmem:[#allocation11 + $0xa0] sm:$0xff] }
 0x1f1   :  { %1889 = vmatmul.f32.gmra.mxu3 %v3231_v54 }
 0x1f2   :  { %1998 = vmatpush.msrb.mxu3 %v1607_v43  ;;  %v1714_v43 = vadd.f32 %v1713_v57, %v1685_v14 }
 0x1f4   :  { %1999 = vmatpush.msrb.mxu3 %v1603_v37  ;;  %v2166_v37 = vld [vmem:[#allocation11 + $0x98] sm:$0xff] }
 0x1f6   :  { %2000 = vmatpush.msrb.mxu3 %v1599_v38  ;;  %v1722_v50 = vpop.f32.mrf.mxu1 }
 0x1f7   :  { %1982 = vmatmul.f32.gmra.mxu2 %v3197_v22 }
 0x1f8   :  { %2001 = vmatpush.msrb.mxu3 %v1595_v2  ;;  %v2165_v2 = vld [vmem:[#allocation11 + $0x90] sm:$0xff] }
 0x1f9   :  { %1892 = vmatmul.f32.gmra.mxu3 %v3238_v0 }
 0x1fa   :  { %2102 = vmatpush.msra.mxu3 %v1656_v34 }
 0x1fc   :  { %2103 = vmatpush.msra.mxu3 %v1652_v28 }
 0x1fe   :  { %2104 = vmatpush.msra.mxu3 %v1648_v56  ;;  %v2164_v56 = vld [vmem:[#allocation11 + $0x88] sm:$0xff] }
 0x1ff   :  { %2089 = vmatmul.f32.vlgmr.msra.gmra.mxu2 %v3147_v32  ;;  %v1628_v32 = vld [vmem:[#allocation8 + $0x718] sm:$0xff] }
 0x200   :  { %2105 = vmatpush.msra.mxu3 %v1644_v45  ;;  %v1688_v45 = vadd.f32 %v1687_v47, %v1659_v30  ;;  %v1660_v47 = vperm.slane %v3265_v63, 1 }
 0x201   :  { %1895 = vmatmul.f32.gmra.mxu3 %v3243_v23 }
 0x202   :  { %2106 = vmatpush.msra.mxu3 %v1640_v44 }
 0x204   :  { %2107 = vmatpush.msra.mxu3 %v1636_v48  ;;  %v2163_v48 = vld [vmem:[#allocation11 + $0x80] sm:$0xff] }
 0x206   :  { %2108 = vmatpush.msra.mxu3 %v1632_v15  ;;  %v1829_v15 = vpop.f32.mrf.mxu1 }
 0x207   :  { %2092 = vmatmul.f32.gmra.mxu2 %v3165_v58  ;;  %v1616_v58 = vld [vmem:[#allocation8 + $0x6b8] sm:$0xff] }
 0x208   :  { %2109 = vmatpush.msra.mxu3 %v1628_v32  ;;  %v1717_v32 = vadd.f32 %v1716_v40, %v1688_v45 }
 0x209   :  { %2002 = vmatmul.f32.vlgmr.msrb.gmra.mxu3 %v3221_v41 }
 0x20a   :  { %2110 = vmatpush.msra.mxu3 %v1624_v39  ;;  %v2194_v39 = vld [vmem:[#allocation11 + $0x178] sm:$0xff] }
 0x20b   :  { %2273 = vmatpush.msrb.mxu2 %v2194_v39  ;;  %v2206_v39 = vld [vmem:[#allocation11 + $0x1d8] sm:$0xff] }
 0x20c   :  { %2111 = vmatpush.msra.mxu3 %v1620_v5 }
 0x20d   :  { %2274 = vmatpush.msrb.mxu2 %v2193_v51 }
 0x20e   :  { %2112 = vmatpush.msra.mxu3 %v1616_v58 }
 0x20f   :  { %2095 = vmatmul.f32.gmra.mxu2 %v3180_v55  ;;  %v2159_v55 = vld [vmem:[#allocation11 + $0x60] sm:$0xff] }
 0x210   :  { %2113 = vmatpush.msra.mxu3 %v1612_v62  ;;  %2218 = vmatpush.msrb.mxu0 %v2159_v55  ;;  %v2192_v62 = vld [vmem:[#allocation11 + $0x168] sm:$0xff] }
 0x211   :  { %2005 = vmatmul.f32.gmra.mxu3 %v3231_v54  ;;  %2275 = vmatpush.msrb.mxu2 %v2192_v62  ;;  %v2204_v62 = vld [vmem:[#allocation11 + $0x1c8] sm:$0xff] }
 0x212   :  { %2114 = vmatpush.msra.mxu3 %v1608_v18  ;;  %2219 = vmatpush.msrb.mxu0 %v2158_v46  ;;  %v1691_v18 = vadd.f32 %v1690_v52, %v1659_v30 }
 0x214   :  { %2115 = vmatpush.msra.mxu3 %v1604_v4  ;;  %2220 = vmatpush.msrb.mxu0 %v2157_v29  ;;  %v2191_v4 = vld [vmem:[#allocation11 + $0x160] sm:$0xff]  ;;  %v2190_v29 = vld [vmem:[#allocation11 + $0x158] sm:$0xff] }
 0x215   :  { %2276 = vmatpush.msrb.mxu2 %v2191_v4  ;;  %v2203_v4 = vld [vmem:[#allocation11 + $0x1c0] sm:$0xff] }
 0x216   :  { %2116 = vmatpush.msra.mxu3 %v1600_v6  ;;  %2221 = vmatpush.msrb.mxu0 %v2156_v9  ;;  %v1720_v6 = vadd.f32 %v1719_v17, %v1691_v18  ;;  %v1832_v9 = vpop.f32.mrf.mxu1  ;;  %v2183_v17 = vld [vmem:[#allocation11 + $0x120] sm:$0xff] }
 0x217   :  { %2098 = vmatmul.f32.gmra.mxu2 %v3197_v22  ;;  %v2155_v22 = vld [vmem:[#allocation11 + $0x40] sm:$0xff] }
 0x218   :  { %2117 = vmatpush.msra.mxu3 %v1596_v16  ;;  %2222 = vmatpush.msrb.mxu0 %v2155_v22 }
 0x219   :  { %2008 = vmatmul.f32.gmra.mxu3 %v3238_v0  ;;  %2277 = vmatpush.msrb.mxu2 %v2190_v29  ;;  %v2202_v29 = vld [vmem:[#allocation11 + $0x1b8] sm:$0xff] }
 0x21a   :  { %2223 = vmatpush.msrb.mxu0 %v2154_v20 }
 0x21c   :  { %2224 = vmatpush.msrb.mxu0 %v2153_v7  ;;  %v2189_v7 = vld [vmem:[#allocation11 + $0x150] sm:$0xff] }
 0x21d   :  { %2278 = vmatpush.msrb.mxu2 %v2189_v7 }
 0x21e   :  { %2225 = vmatpush.msrb.mxu0 %v2152_v1  ;;  %v1742_v26 = vpop.f32.mrf.mxu2  ;;  %v1835_v27 = vpop.f32.mrf.mxu1 }
 0x21f   :  { %v1743_v38 = vadd.f32 %v1742_v26, %v1714_v43  ;;  %2279 = vmatpush.msrb.mxu2 %v2188_v3 }
 0x220   :  { %2226 = vmatpush.msrb.mxu0 %v2151_v24 }
 0x221   :  { %2011 = vmatmul.f32.gmra.mxu3 %v3243_v23 }
 0x222   :  { %2227 = vmatpush.msrb.mxu0 %v2150_v33  ;;  %v2187_v33 = vld [vmem:[#allocation11 + $0x140] sm:$0xff] }
 0x223   :  { %2280 = vmatpush.msrb.mxu2 %v2187_v33 }
 0x224   :  { %2228 = vmatpush.msrb.mxu0 %v2149_v49  ;;  %v2186_v49 = vld [vmem:[#allocation11 + $0x138] sm:$0xff] }
 0x225   :  { %2281 = vmatpush.msrb.mxu2 %v2186_v49 }
 0x226   :  { %2229 = vmatpush.msrb.mxu0 %v2148_v60  ;;  %v1745_v42 = vpop.f32.mrf.mxu2 }
 0x227   :  { %v1746_v21 = vadd.f32 %v1745_v42, %v1717_v32  ;;  %v2185_v42 = vld [vmem:[#allocation11 + $0x130] sm:$0xff] }
 0x228   :  { %2230 = vmatpush.msrb.mxu0 %v2147_v13  ;;  %2282 = vmatpush.msrb.mxu2 %v2185_v42 }
 0x229   :  { %2118 = vmatmul.f32.vlgmr.msra.gmra.mxu3 %v3221_v41  ;;  %v2175_v41 = vld [vmem:[#allocation11 + $0xe0] sm:$0xff] }
 0x22a   :  { %2247 = vmatpush.msrb.mxu1 %v2175_v41  ;;  %v2184_v41 = vld [vmem:[#allocation11 + $0x128] sm:$0xff] }
 0x22b   :  { %2283 = vmatpush.msrb.mxu2 %v2184_v41  ;;  %v2196_v41 = vld [vmem:[#allocation11 + $0x188] sm:$0xff] }
 0x22c   :  { %2248 = vmatpush.msrb.mxu1 %v2174_v25 }
 0x22d   :  { %2284 = vmatpush.msrb.mxu2 %v2183_v17  ;;  %v2195_v17 = vld [vmem:[#allocation11 + $0x180] sm:$0xff] }
 0x22e   :  { %2249 = vmatpush.msrb.mxu1 %v2173_v35 }
 0x230   :  { %2250 = vmatpush.msrb.mxu1 %v2172_v19 }
 0x231   :  { %2121 = vmatmul.f32.gmra.mxu3 %v3231_v54  ;;  %v1748_v54 = vpop.f32.mrf.mxu2 }
 0x232   :  { %2251 = vmatpush.msrb.mxu1 %v2171_v12  ;;  %v1749_v16 = vadd.f32 %v1748_v54, %v1720_v6  ;;  %v2182_v54 = vld [vmem:[#allocation11 + $0x118] sm:$0xff] }
 0x233   :  { %2285 = vmatpush.msrb.mxu2 %v2182_v54 }
 0x234   :  { %2252 = vmatpush.msrb.mxu1 %v2170_v31 }
 0x236   :  { %2253 = vmatpush.msrb.mxu1 %v2169_v11  ;;  %v1838_v11 = vpop.f32.mrf.mxu1 }
 0x238   :  { %2254 = vmatpush.msrb.mxu1 %v2168_v59 }
 0x239   :  { %2124 = vmatmul.f32.gmra.mxu3 %v3238_v0  ;;  %v1693_v0 = vpop.f32.mrf.mxu0 }
 0x23a   :  { %v1751_v36 = vpop.f32.mrf.mxu2  ;;  %2255 = vmatpush.msrb.mxu1 %v2167_v53  ;;  %v1694_v57 = vadd.f32 %v1693_v0, %v1659_v30  ;;  %v2181_v30 = vld [vmem:[#allocation11 + $0x110] sm:$0xff]  ;;  %v2179_v53 = vld [vmem:[#allocation11 + $0x100] sm:$0xff] }
 0x23b   :  { %2286 = vmatpush.msrb.mxu2 %v2181_v30 }
 0x23c   :  { %2256 = vmatpush.msrb.mxu1 %v2166_v37  ;;  %v1723_v26 = vadd.f32 %v1722_v50, %v1694_v57  ;;  %v2180_v50 = vld [vmem:[#allocation11 + $0x108] sm:$0xff]  ;;  %v2210_v37 = vld [vmem:[#allocation11 + $0x1f8] sm:$0xff] }
 0x23d   :  { %2287 = vmatpush.msrb.mxu2 %v2180_v50  ;;  %2302 = vmatpush.msrb.mxu3 %v2210_v37  ;;  %v2200_v57 = vld [vmem:[#allocation11 + $0x1a8] sm:$0xff] }
 0x23e   :  { %2257 = vmatpush.msrb.mxu1 %v2165_v2  ;;  %v1752_v13 = vadd.f32 %v1751_v36, %v1723_v26  ;;  %v2199_v26 = vld [vmem:[#allocation11 + $0x1a0] sm:$0xff] }
 0x23f   :  { %2288 = vmatpush.msrb.mxu2 %v2179_v53 }
 0x240   :  { %2258 = vmatpush.msrb.mxu1 %v2164_v56  ;;  %v2208_v56 = vld [vmem:[#allocation11 + $0x1e8] sm:$0xff] }
 0x241   :  { %2127 = vmatmul.f32.gmra.mxu3 %v3243_v23  ;;  %v1800_v28 = vpop.f32.mrf.mxu0 }
 0x242   :  { %2259 = vmatpush.msrb.mxu1 %v2163_v48  ;;  %v1858_v5 = vpop.f32.mrf.mxu2  ;;  %v1801_v25 = vadd.f32 %v1800_v28, %v1660_v47  ;;  %v2207_v48 = vld [vmem:[#allocation11 + $0x1e0] sm:$0xff] }
 0x244   :  { %v1830_v35 = vadd.f32 %v1829_v15, %v1801_v25  ;;  %v1945_v15 = vpop.f32.mrf.mxu1 }
 0x246   :  { %v1859_v19 = vadd.f32 %v1858_v5, %v1830_v35 }
 0x249   :  { %v1803_v46 = vpop.f32.mrf.mxu0 }
 0x24a   :  { %v1861_v22 = vpop.f32.mrf.mxu2  ;;  %v1804_v59 = vadd.f32 %v1803_v46, %v1660_v47 }
 0x24c   :  { %v1771_v23 = vpop.f32.mrf.mxu3  ;;  %v1833_v43 = vadd.f32 %v1832_v9, %v1804_v59  ;;  %v1948_v9 = vpop.f32.mrf.mxu1 }
 0x24d   :  { %v1772_v34 = vadd.f32 %v1771_v23, %v1743_v38  ;;  %v2209_v38 = vld [vmem:[#allocation11 + $0x1f0] sm:$0xff] }
 0x24e   :  { %v1862_v23 = vadd.f32 %v1861_v22, %v1833_v43  ;;  %2303 = vmatpush.msrb.mxu3 %v2209_v38  ;;  %v1661_v22 = vperm.slane %v3265_v63, 2 }
 0x24f   :  { %v2131_v44 = vmax.f32 %v1772_v34, 0.0 }
 0x250   :  { %2304 = vmatpush.msrb.mxu3 %v2208_v56 }
 0x251   :  { %2231 = vmatmul.f32.vlgmr.msrb.gmra.mxu0 %v2131_v44  ;;  %v1806_v60 = vpop.f32.mrf.mxu0 }
 0x252   :  { %v1864_v61 = vpop.f32.mrf.mxu2  ;;  %v1807_v45 = vadd.f32 %v1806_v60, %v1660_v47  ;;  %2305 = vmatpush.msrb.mxu3 %v2207_v48  ;;  %v2198_v60 = vld [vmem:[#allocation11 + $0x198] sm:$0xff] }
 0x254   :  { %v1774_v58 = vpop.f32.mrf.mxu3  ;;  %v1836_v32 = vadd.f32 %v1835_v27, %v1807_v45  ;;  %2306 = vmatpush.msrb.mxu3 %v2206_v39 }
 0x255   :  { %v1775_v8 = vadd.f32 %v1774_v58, %v1746_v21  ;;  %v2205_v21 = vld [vmem:[#allocation11 + $0x1d0] sm:$0xff] }
 0x256   :  { %v1865_v58 = vadd.f32 %v1864_v61, %v1836_v32  ;;  %2307 = vmatpush.msrb.mxu3 %v2205_v21 }
 0x257   :  { %v2135_v55 = vmax.f32 %v1775_v8, 0.0 }
 0x258   :  { %2308 = vmatpush.msrb.mxu3 %v2204_v62 }
 0x259   :  { %2234 = vmatmul.f32.gmra.mxu0 %v2135_v55  ;;  %v1809_v12 = vpop.f32.mrf.mxu0 }
 0x25a   :  { %v1867_v36 = vpop.f32.mrf.mxu2  ;;  %v1810_v18 = vadd.f32 %v1809_v12, %v1660_v47  ;;  %2309 = vmatpush.msrb.mxu3 %v2203_v4 }
 0x25c   :  { %v1777_v20 = vpop.f32.mrf.mxu3  ;;  %v1839_v6 = vadd.f32 %v1838_v11, %v1810_v18  ;;  %2310 = vmatpush.msrb.mxu3 %v2202_v29 }
 0x25d   :  { %v1778_v1 = vadd.f32 %v1777_v20, %v1749_v16  ;;  %v2201_v16 = vld [vmem:[#allocation11 + $0x1b0] sm:$0xff] }
 0x25e   :  { %v1868_v20 = vadd.f32 %v1867_v36, %v1839_v6  ;;  %2311 = vmatpush.msrb.mxu3 %v2201_v16 }
 0x25f   :  { %v2139_v24 = vmax.f32 %v1778_v1, 0.0 }
 0x260   :  { %2312 = vmatpush.msrb.mxu3 %v2200_v57 }
 0x261   :  { %2237 = vmatmul.f32.gmra.mxu0 %v2139_v24  ;;  %v1916_v28 = vpop.f32.mrf.mxu0 }
 0x262   :  { %v1974_v5 = vpop.f32.mrf.mxu2  ;;  %v1917_v24 = vadd.f32 %v1916_v28, %v1661_v22  ;;  %2313 = vmatpush.msrb.mxu3 %v2199_v26  ;;  %v1662_v28 = vperm.slane %v3265_v63, 3 }
 0x264   :  { %v1780_v40 = vpop.f32.mrf.mxu3  ;;  %v1946_v49 = vadd.f32 %v1945_v15, %v1917_v24  ;;  %2314 = vmatpush.msrb.mxu3 %v2198_v60 }
 0x265   :  { %v1781_v10 = vadd.f32 %v1780_v40, %v1752_v13  ;;  %v2197_v13 = vld [vmem:[#allocation11 + $0x190] sm:$0xff]  ;;  %v1951_v40 = vpop.f32.mrf.mxu1 }
 0x266   :  { %v1975_v27 = vadd.f32 %v1974_v5, %v1946_v49  ;;  %2315 = vmatpush.msrb.mxu3 %v2197_v13 }
 0x267   :  { %v2143_v52 = vmax.f32 %v1781_v10, 0.0 }
 0x268   :  { %2316 = vmatpush.msrb.mxu3 %v2196_v41  ;;  %v2387_v41 = vld [vmem:[#allocation13] ss:$0 sm:$0xff] }
 0x269   :  { %2240 = vmatmul.f32.gmra.mxu0 %v2143_v52  ;;  %v1919_v46 = vpop.f32.mrf.mxu0 }
 0x26a   :  { %v1977_v7 = vpop.f32.mrf.mxu2  ;;  %v1920_v25 = vadd.f32 %v1919_v46, %v1661_v22  ;;  %2317 = vmatpush.msrb.mxu3 %v2195_v17 }
 0x26c   :  { %v1887_v31 = vpop.f32.mrf.mxu3  ;;  %v1949_v35 = vadd.f32 %v1948_v9, %v1920_v25 }
 0x26d   :  { %v1888_v0 = vadd.f32 %v1887_v31, %v1859_v19  ;;  %v1954_v30 = vpop.f32.mrf.mxu1 }
 0x26e   :  { %v1978_v54 = vadd.f32 %v1977_v7, %v1949_v35 }
 0x26f   :  { %v2132_v14 = vmax.f32 %v1888_v0, 0.0 }
 0x271   :  { %2260 = vmatmul.f32.vlgmr.msrb.gmra.mxu1 %v2132_v14  ;;  %v1922_v47 = vpop.f32.mrf.mxu0 }
 0x272   :  { %v1980_v61 = vpop.f32.mrf.mxu2  ;;  %v1923_v0 = vadd.f32 %v1922_v47, %v1661_v22 }
 0x274   :  { %v1890_v2 = vpop.f32.mrf.mxu3  ;;  %v1952_v59 = vadd.f32 %v1951_v40, %v1923_v0 }
 0x275   :  { %v1891_v34 = vadd.f32 %v1890_v2, %v1862_v23  ;;  %v2061_v23 = vpop.f32.mrf.mxu1 }
 0x276   :  { %v1981_v14 = vadd.f32 %v1980_v61, %v1952_v59 }
 0x277   :  { %v2136_v44 = vmax.f32 %v1891_v34, 0.0 }
 0x279   :  { %2263 = vmatmul.f32.gmra.mxu1 %v2136_v44  ;;  %v1925_v19 = vpop.f32.mrf.mxu0 }
 0x27a   :  { %v1983_v50 = vpop.f32.mrf.mxu2  ;;  %v1926_v37 = vadd.f32 %v1925_v19, %v1661_v22 }
 0x27c   :  { %v1893_v51 = vpop.f32.mrf.mxu3  ;;  %v1955_v2 = vadd.f32 %v1954_v30, %v1926_v37 }
 0x27d   :  { %v1894_v8 = vadd.f32 %v1893_v51, %v1865_v58  ;;  %v2064_v5 = vpop.f32.mrf.mxu1 }
 0x27e   :  { %v1984_v56 = vadd.f32 %v1983_v50, %v1955_v2 }
 0x27f   :  { %v2140_v55 = vmax.f32 %v1894_v8, 0.0 }
 0x281   :  { %2266 = vmatmul.f32.gmra.mxu1 %v2140_v55  ;;  %v2032_v43 = vpop.f32.mrf.mxu0 }
 0x282   :  { %v2090_v34 = vpop.f32.mrf.mxu2  ;;  %v2033_v48 = vadd.f32 %v2032_v43, %v1662_v28 }
 0x284   :  { %v1896_v1 = vpop.f32.mrf.mxu3  ;;  %v2062_v39 = vadd.f32 %v2061_v23, %v2033_v48 }
 0x285   :  { %v1897_v3 = vadd.f32 %v1896_v1, %v1868_v20  ;;  %v2067_v63 = vpop.f32.mrf.mxu1 }
 0x286   :  { %v2091_v21 = vadd.f32 %v2090_v34, %v2062_v39 }
 0x287   :  { %v2144_v33 = vmax.f32 %v1897_v3, 0.0 }
 0x289   :  { %2269 = vmatmul.f32.gmra.mxu1 %v2144_v33  ;;  %v2035_v32 = vpop.f32.mrf.mxu0 }
 0x28a   :  { %v2093_v58 = vpop.f32.mrf.mxu2  ;;  %v2036_v62 = vadd.f32 %v2035_v32, %v1662_v28 }
 0x28c   :  { %v2003_v42 = vpop.f32.mrf.mxu3  ;;  %v2065_v55 = vadd.f32 %v2064_v5, %v2036_v62 }
 0x28d   :  { %v2004_v10 = vadd.f32 %v2003_v42, %v1975_v27  ;;  %v2070_v24 = vpop.f32.mrf.mxu1 }
 0x28e   :  { %v2094_v46 = vadd.f32 %v2093_v58, %v2065_v55 }
 0x28f   :  { %v2133_v52 = vmax.f32 %v2004_v10, 0.0 }
 0x291   :  { %2289 = vmatmul.f32.vlgmr.msrb.gmra.mxu2 %v2133_v52  ;;  %v2038_v4 = vpop.f32.mrf.mxu0 }
 0x292   :  { %v2096_v9 = vpop.f32.mrf.mxu2  ;;  %v2039_v16 = vadd.f32 %v2038_v4, %v1662_v28 }
 0x294   :  { %v2006_v12 = vpop.f32.mrf.mxu3  ;;  %v2068_v20 = vadd.f32 %v2067_v63, %v2039_v16 }
 0x295   :  { %v2007_v31 = vadd.f32 %v2006_v12, %v1978_v54 }
 0x296   :  { %v2097_v7 = vadd.f32 %v2096_v9, %v2068_v20 }
 0x297   :  { %v2137_v11 = vmax.f32 %v2007_v31, 0.0 }
 0x299   :  { %2292 = vmatmul.f32.gmra.mxu2 %v2137_v11  ;;  %v2041_v1 = vpop.f32.mrf.mxu0 }
 0x29a   :  { %v2042_v33 = vadd.f32 %v2041_v1, %v1662_v28  ;;  %v2099_v49 = vpop.f32.mrf.mxu2 }
 0x29c   :  { %v2009_v53 = vpop.f32.mrf.mxu3  ;;  %v2071_v60 = vadd.f32 %v2070_v24, %v2042_v33 }
 0x29d   :  { %v2010_v36 = vadd.f32 %v2009_v53, %v1981_v14 }
 0x29e   :  { %v2100_v47 = vadd.f32 %v2099_v49, %v2071_v60 }
 0x29f   :  { %v2141_v38 = vmax.f32 %v2010_v36, 0.0 }
 0x2a1   :  { %2295 = vmatmul.f32.gmra.mxu2 %v2141_v38 }
 0x2a4   :  { %v2012_v45 = vpop.f32.mrf.mxu3 }
 0x2a5   :  { %v2013_v44 = vadd.f32 %v2012_v45, %v1984_v56 }
 0x2a7   :  { %v2145_v15 = vmax.f32 %v2013_v44, 0.0 }
 0x2a9   :  { %2298 = vmatmul.f32.gmra.mxu2 %v2145_v15 }
 0x2ac   :  { %v2119_v51 = vpop.f32.mrf.mxu3 }
 0x2ad   :  { %v2120_v8 = vadd.f32 %v2119_v51, %v2091_v21 }
 0x2af   :  { %v2134_v18 = vmax.f32 %v2120_v8, 0.0 }
 0x2b1   :  { %2318 = vmatmul.f32.vlgmr.msrb.gmra.mxu3 %v2134_v18 }
 0x2b4   :  { %v2122_v6 = vpop.f32.mrf.mxu3 }
 0x2b5   :  { %v2123_v29 = vadd.f32 %v2122_v6, %v2094_v46 }
 0x2b7   :  { %v2138_v22 = vmax.f32 %v2123_v29, 0.0 }
 0x2b9   :  { %2321 = vmatmul.f32.gmra.mxu3 %v2138_v22 }
 0x2bc   :  { %v2125_v3 = vpop.f32.mrf.mxu3 }
 0x2bd   :  { %v2126_v57 = vadd.f32 %v2125_v3, %v2097_v7 }
 0x2bf   :  { %v2142_v26 = vmax.f32 %v2126_v57, 0.0 }
 0x2c1   :  { %2324 = vmatmul.f32.gmra.mxu3 %v2142_v26 }
 0x2c4   :  { %v2128_v13 = vpop.f32.mrf.mxu3 }
 0x2c5   :  { %v2129_v27 = vadd.f32 %v2128_v13, %v2100_v47 }
 0x2c7   :  { %v2146_v40 = vmax.f32 %v2129_v27, 0.0 }
 0x2c9   :  { %2327 = vmatmul.f32.gmra.mxu3 %v2146_v40 }
 0x2ce   :  { %v2232_v42 = vpop.f32.mrf.mxu0 }
 0x2cf   :  { %v2233_v25 = vadd.f32 %v2387_v41, %v2232_v42 }
 0x2d6   :  { %v2235_v52 = vpop.f32.mrf.mxu0 }
 0x2d7   :  { %v2236_v30 = vadd.f32 %v2387_v41, %v2235_v52 }
 0x2de   :  { %v2238_v11 = vpop.f32.mrf.mxu0 }
 0x2df   :  { %v2239_v43 = vadd.f32 %v2387_v41, %v2238_v11 }
 0x2e6   :  { %v2241_v23 = vpop.f32.mrf.mxu0 }
 0x2e7   :  { %v2242_v56 = vadd.f32 %v2387_v41, %v2241_v23 }
 0x2ee   :  { %v2261_v10 = vpop.f32.mrf.mxu1 }
 0x2ef   :  { %v2262_v17 = vadd.f32 %v2261_v10, %v2233_v25 }
 0x2f6   :  { %v2264_v35 = vpop.f32.mrf.mxu1 }
 0x2f7   :  { %v2265_v0 = vadd.f32 %v2264_v35, %v2236_v30 }
 0x2fe   :  { %v2267_v59 = vpop.f32.mrf.mxu1 }
 0x2ff   :  { %v2268_v37 = vadd.f32 %v2267_v59, %v2239_v43 }
 0x306   :  { %v2270_v28 = vpop.f32.mrf.mxu1 }
 0x307   :  { %v2271_v44 = vadd.f32 %v2270_v28, %v2242_v56 }
 0x314   :  { %v2290_v61 = vpop.f32.mrf.mxu2 }
 0x315   :  { %v2291_v54 = vadd.f32 %v2290_v61, %v2262_v17 }
 0x31c   :  { %v2293_v19 = vpop.f32.mrf.mxu2 }
 0x31d   :  { %v2294_v50 = vadd.f32 %v2293_v19, %v2265_v0 }
 0x324   :  { %v2296_v36 = vpop.f32.mrf.mxu2 }
 0x325   :  { %v2297_v38 = vadd.f32 %v2296_v36, %v2268_v37 }
 0x32c   :  { %v2299_v45 = vpop.f32.mrf.mxu2 }
 0x32d   :  { %v2300_v48 = vadd.f32 %v2299_v45, %v2271_v44 }
 0x334   :  { %v2319_v12 = vpop.f32.mrf.mxu3 }
 0x335   :  { %v2320_v31 = vadd.f32 %v2319_v12, %v2291_v54 }
 0x337   :  { %2331 = vst [vmem:[#allocation14] sm:$0xff] %v2320_v31 }
 0x33c   :  { %v2322_v14 = vpop.f32.mrf.mxu3 }
 0x33d   :  { %v2323_v53 = vadd.f32 %v2322_v14, %v2294_v50 }
 0x33f   :  { %2332 = vst [vmem:[#allocation14 + $0x8] sm:$0xff] %v2323_v53 }
 0x344   :  { %v2325_v2 = vpop.f32.mrf.mxu3 }
 0x345   :  { %v2326_v34 = vadd.f32 %v2325_v2, %v2297_v38 }
 0x347   :  { %2333 = vst [vmem:[#allocation14 + $0x10] sm:$0xff] %v2326_v34 }
 0x34c   :  { %v2328_v15 = vpop.f32.mrf.mxu3 }
 0x34d   :  { %v2329_v32 = vadd.f32 %v2328_v15, %v2300_v48 }
 0x34f   :  { %2334 = vst [vmem:[#allocation14 + $0x18] sm:$0xff] %v2329_v32 }
 0x350   :  { %2347 = dma.vmem_to_hbm [thread:$0]  %s2340_s6, 512, %s2342_s1, [#allocation4], %s2623_s19, %s2623_s19, %s2624_s20  }
 0x351   :  { %2616 = dma.done.wait [#allocation4], 512  }
 0x352   :  { %2617 = vsyncadd [#allocation4], 4294966784 }
 0x353   :  { %2352 = vsyncpa [#allocation3], 1 }
 0x354   :  { %2353 = vsyncpa [#allocation6], 1 }
 0x355   :  { %2354 = vsyncpa [#allocation9], 1 }
 0x356   :  { %2355 = vsyncpa [#allocation12], 1 }
 0x357   :  { %2356 = vsyncpa [#allocation4], 1 }

</bundles_post_ra>
